<compile_context>
chip_gen: v7x
topology: tpu7x:2x2x1
jax: 0.10.0
libtpu: 0.0.40
codegen_flags: <defaults>
</compile_context>

<pallas_src>
import functools

import jax
import jax.numpy as jnp
from jax import lax
from jax.experimental import pallas as pl
from jax.experimental.pallas import tpu as pltpu

# ----------------------------- config ----------------------------------------
IMAGE_SIZE = 16
PATCH_SIZE = 4
IN_CHANNELS = 4
EMB = 32
DEPTH = 2
HEADS = 4
MLP_DIM = 64
NUM_CLASSES = 3
BATCH = 2

N_PATCHES = (IMAGE_SIZE // PATCH_SIZE) ** 2        # 16
SEQ = N_PATCHES + 1                                # 17 (cls token + patches)
S_PAD = 32                                         # seq padded (8-sublane f32 AND 16-row bf16 friendly)
HEAD_DIM = EMB // HEADS                            # 8
PATCH_VEC = IN_CHANNELS * PATCH_SIZE * PATCH_SIZE  # 64
LN_EPS = 1e-5
ATTN_SCALE = 1.0 / (HEAD_DIM ** 0.5)
_INV_SQRT2 = 0.7071067811865476

# Packed small-parameter slab layout (one 128-lane row per vector).
ROWS_PER_LAYER = 8            # ln1_g, ln1_b, ln2_g, ln2_b, bo, b2, b1, bqkv
HEAD_ROWS = 3                 # head_ln_g, head_ln_b, head_b
VEC_ROWS = 24                 # DEPTH*8 + 3 = 19, padded to multiple of 8


# ----------------------------- in-kernel math ---------------------------------
def _layernorm(v, g, b):
    v = v.astype(jnp.float32)
    mu = jnp.mean(v, axis=-1, keepdims=True)
    var = jnp.mean((v - mu) ** 2, axis=-1, keepdims=True)
    return (v - mu) * lax.rsqrt(var + LN_EPS) * g + b


def _erf(z):
    # Abramowitz & Stegun 7.1.26; close to torch's exact-erf GELU.  The 1/(1+pz)
    # divide goes to the EUP via approx reciprocal (tiny extra error, inference-OK).
    p = 0.3275911
    a1, a2, a3, a4, a5 = (0.254829592, -0.284496736, 1.421413741,
                          -1.453152027, 1.061405429)
    az = jnp.abs(z)
    t = pl.reciprocal(1.0 + p * az, approx=True)
    poly = ((((a5 * t + a4) * t + a3) * t + a2) * t + a1) * t
    e = 1.0 - poly * jnp.exp(-az * az)
    return jnp.where(z >= 0, e, -e)


def _gelu_exact(x):
    return 0.5 * x * (1.0 + _erf(x * _INV_SQRT2))


# ----------------------------- fused kernel -----------------------------------
def vit_fused_kernel(patches_ref, addb_ref, pw_ref, wqkv_ref, wo_ref,
                     w1_ref, w2_ref, vec_ref, hw_ref, o_ref, *, batch):
    bf16, f32 = jnp.bfloat16, jnp.float32

    # Patch embedding: one (B*S_PAD, PATCH_VEC)x(PATCH_VEC, EMB) matmul.
    # cls token + positional embedding + patch bias are pre-folded into addb
    # (cls slot row 0 / pad rows of `patches` are zero).
    x = jnp.dot(patches_ref[...], pw_ref[...],
                preferred_element_type=f32) + addb_ref[...]        # (B*S, E) f32

    key_valid = lax.broadcasted_iota(jnp.int32, (1, S_PAD), 1) < SEQ

    for d in range(DEPTH):                                         # static unroll
        base = d * ROWS_PER_LAYER
        ln1_g = vec_ref[base + 0:base + 1, :EMB]
        ln1_b = vec_ref[base + 1:base + 2, :EMB]
        ln2_g = vec_ref[base + 2:base + 3, :EMB]
        ln2_b = vec_ref[base + 3:base + 4, :EMB]
        bo    = vec_ref[base + 4:base + 5, :EMB]
        b2    = vec_ref[base + 5:base + 6, :EMB]
        b1    = vec_ref[base + 6:base + 7, :MLP_DIM]
        bqkv  = vec_ref[base + 7:base + 8, :3 * EMB]

        # ---- multi-head self attention (pre-LN), fused QKV projection -------
        h = _layernorm(x, ln1_g, ln1_b).astype(bf16)               # (B*S, E)
        qkv = jnp.dot(h, wqkv_ref[d],
                      preferred_element_type=f32) + bqkv           # (B*S, 3E)

        ctx_imgs = []
        for b in range(batch):                                     # static unroll
            r0 = b * S_PAD
            qkv_b = qkv[r0:r0 + S_PAD, :]                          # (S, 3E)
            heads = []
            for hd in range(HEADS):                                # static unroll
                c = hd * HEAD_DIM
                qh = qkv_b[:, c:c + HEAD_DIM].astype(bf16)                     # (S, D)
                kh = qkv_b[:, EMB + c:EMB + c + HEAD_DIM].astype(bf16)
                vh = qkv_b[:, 2 * EMB + c:2 * EMB + c + HEAD_DIM].astype(bf16)
                # scores (1/sqrt(D) already folded into q columns of wqkv)
                s = lax.dot_general(qh, kh, (((1,), (1,)), ((), ())),
                                    preferred_element_type=f32)                # (S, S)
                s = jnp.where(key_valid, s, -1e30)                 # mask pad keys
                mx = jnp.max(s, axis=-1, keepdims=True)
                ex = jnp.exp(s - mx)
                denom = jnp.sum(ex, axis=-1, keepdims=True)
                p = (ex * pl.reciprocal(denom, approx=True)).astype(bf16)
                heads.append(jnp.dot(p, vh, preferred_element_type=f32))       # (S, D)
            ctx_imgs.append(jnp.concatenate(heads, axis=-1))       # (S, E) head-concat
        ctx = jnp.concatenate(ctx_imgs, axis=0).astype(bf16)       # (B*S, E)
        # single (B*S,32)x(32,32) output projection; residual
        x = x + jnp.dot(ctx, wo_ref[d], preferred_element_type=f32) + bo

        # ---- MLP (pre-LN) ----------------------------------------------------
        m2 = _layernorm(x, ln2_g, ln2_b).astype(bf16)
        m2 = jnp.dot(m2, w1_ref[d], preferred_element_type=f32) + b1
        m2 = _gelu_exact(m2).astype(bf16)
        m2 = jnp.dot(m2, w2_ref[d], preferred_element_type=f32) + b2
        x = x + m2                                                 # residual

    # ---- classification head on the cls tokens -------------------------------
    hbase = DEPTH * ROWS_PER_LAYER
    hlg = vec_ref[hbase + 0:hbase + 1, :EMB]
    hlb = vec_ref[hbase + 1:hbase + 2, :EMB]
    hb  = vec_ref[hbase + 2:hbase + 3, :]                          # (1, 128)
    cls = jnp.concatenate(
        [x[b * S_PAD:b * S_PAD + 1, :] for b in range(batch)], axis=0)  # (B, E)
    cls = _layernorm(cls, hlg, hlb).astype(bf16)
    logits = jnp.dot(cls, hw_ref[...], preferred_element_type=f32) + hb  # (B, 128)
    o_ref[...] = logits.astype(o_ref.dtype)


# ----------------------------- pallas_call wrapper -----------------------------
def _full(shape):
    """Full-array block for the single-step grid."""
    zeros = (0,) * len(shape)
    return pl.BlockSpec(shape, lambda i, z=zeros: z)


def vit_fused(patches2d, addb, prep):
    rows = patches2d.shape[0]
    B = rows // S_PAD
    kernel = functools.partial(vit_fused_kernel, batch=B)
    out = pl.pallas_call(
        kernel,
        out_shape=jax.ShapeDtypeStruct((B, 128), jnp.float32),     # lane-dense logits
        grid=(1,),
        in_specs=[
            _full(patches2d.shape),
            _full(addb.shape),
            _full(prep['patch_w'].shape),
            _full(prep['wqkv'].shape),
            _full(prep['wo'].shape),
            _full(prep['w1'].shape),
            _full(prep['w2'].shape),
            _full(prep['vecs'].shape),
            _full(prep['head_w'].shape),
        ],
        out_specs=pl.BlockSpec((B, 128), lambda i: (0, 0)),
        compiler_params=pltpu.CompilerParams(
            dimension_semantics=("arbitrary",)),
    )(patches2d, addb, prep['patch_w'], prep['wqkv'], prep['wo'],
      prep['w1'], prep['w2'], prep['vecs'], prep['head_w'])
    return out[:, :NUM_CLASSES]                                    # (B, NUM_CLASSES)


# ----------------------------- glue (plain JAX) --------------------------------
def extract_patches(x):
    # NCHW -> (B, N_patches, C*P*P); (C, P, P) flattening order matches
    # Conv2d(k=P, s=P) weights reshaped as (E, C*P*P).T if real weights are
    # ever loaded.
    B, C, H, W = x.shape
    P = PATCH_SIZE
    x = x.reshape(B, C, H // P, P, W // P, P)
    x = x.transpose(0, 2, 4, 1, 3, 5)          # B, H/P, W/P, C, P, P
    return x.reshape(B, (H // P) * (W // P), C * P * P)


def prepare_params(params):
    """Repack standard (PyTorch-layout) weights into the fused-kernel layout:
    fold cls/pos/patch-bias into one additive slab, fold 1/sqrt(D) into the q
    columns of the fused wqkv, pack all tiny vectors into one (VEC_ROWS,128)
    f32 slab, stack the DEPTH layers, cast matmul weights to bf16."""
    f32, bf16 = jnp.float32, jnp.bfloat16
    pos = params['pos'][0].astype(f32)                       # (SEQ, EMB)
    add = jnp.zeros((S_PAD, EMB), f32)
    add = add.at[0].set(params['cls'][0, 0] + pos[0])
    add = add.at[1:SEQ].set(params['patch_b'][0] + pos[1:])

    scale_vec = jnp.concatenate([jnp.full((EMB,), ATTN_SCALE, f32),
                                 jnp.ones((2 * EMB,), f32)])

    vecs = jnp.zeros((VEC_ROWS, 128), f32)
    wqkv_l, wo_l, w1_l, w2_l = [], [], [], []
    for d, blk in enumerate(params['blocks']):
        base = d * ROWS_PER_LAYER
        wqkv_l.append(blk['wqkv'] * scale_vec[None, :])
        wo_l.append(blk['wo'])
        w1_l.append(blk['w1'])
        w2_l.append(blk['w2'])
        bqkv = blk['bqkv'][0] * scale_vec
        vecs = vecs.at[base + 0, :EMB].set(blk['ln1_g'][0])
        vecs = vecs.at[base + 1, :EMB].set(blk['ln1_b'][0])
        vecs = vecs.at[base + 2, :EMB].set(blk['ln2_g'][0])
        vecs = vecs.at[base + 3, :EMB].set(blk['ln2_b'][0])
        vecs = vecs.at[base + 4, :EMB].set(blk['bo'][0])
        vecs = vecs.at[base + 5, :EMB].set(blk['b2'][0])
        vecs = vecs.at[base + 6, :MLP_DIM].set(blk['b1'][0])
        vecs = vecs.at[base + 7, :3 * EMB].set(bqkv)
    hbase = DEPTH * ROWS_PER_LAYER
    vecs = vecs.at[hbase + 0, :EMB].set(params['head_ln_g'][0])
    vecs = vecs.at[hbase + 1, :EMB].set(params['head_ln_b'][0])
    vecs = vecs.at[hbase + 2, :NUM_CLASSES].set(params['head_b'][0])

    head_w = jnp.zeros((EMB, 128), f32).at[:, :NUM_CLASSES].set(params['head_w'])

    return {
        'add_bias': add,                                   # (S_PAD, EMB) f32
        'patch_w': params['patch_w'].astype(bf16),         # (PATCH_VEC, EMB)
        'wqkv': jnp.stack(wqkv_l).astype(bf16),            # (DEPTH, EMB, 3*EMB)
        'wo': jnp.stack(wo_l).astype(bf16),                # (DEPTH, EMB, EMB)
        'w1': jnp.stack(w1_l).astype(bf16),                # (DEPTH, EMB, MLP_DIM)
        'w2': jnp.stack(w2_l).astype(bf16),                # (DEPTH, MLP_DIM, EMB)
        'vecs': vecs,                                      # (VEC_ROWS, 128) f32
        'head_w': head_w.astype(bf16),                     # (EMB, 128)
    }


def init_params(key):
    keys = jax.random.split(key, 4 + DEPTH)
    nrm = lambda k, s, sc=0.02: jax.random.normal(k, s, jnp.float32) * sc
    params = {
        'cls': nrm(keys[0], (1, 1, EMB), 1.0),
        'pos': nrm(keys[1], (1, SEQ, EMB), 1.0),
        'patch_w': nrm(keys[2], (PATCH_VEC, EMB)),
        'patch_b': jnp.zeros((1, EMB), jnp.float32),
        'head_ln_g': jnp.ones((1, EMB), jnp.float32),
        'head_ln_b': jnp.zeros((1, EMB), jnp.float32),
        'head_w': nrm(keys[3], (EMB, NUM_CLASSES)),
        'head_b': jnp.zeros((1, NUM_CLASSES), jnp.float32),
        'blocks': [],
    }
    for d in range(DEPTH):
        bk = jax.random.split(keys[4 + d], 4)
        params['blocks'].append(dict(
            ln1_g=jnp.ones((1, EMB), jnp.float32), ln1_b=jnp.zeros((1, EMB), jnp.float32),
            wqkv=nrm(bk[0], (EMB, 3 * EMB)), bqkv=jnp.zeros((1, 3 * EMB), jnp.float32),
            wo=nrm(bk[1], (EMB, EMB)), bo=jnp.zeros((1, EMB), jnp.float32),
            ln2_g=jnp.ones((1, EMB), jnp.float32), ln2_b=jnp.zeros((1, EMB), jnp.float32),
            w1=nrm(bk[2], (EMB, MLP_DIM)), b1=jnp.zeros((1, MLP_DIM), jnp.float32),
            w2=nrm(bk[3], (MLP_DIM, EMB)), b2=jnp.zeros((1, EMB), jnp.float32),
        ))
    return params


@jax.jit
def vit_forward(params, x):
    prep = prepare_params(params)
    B = x.shape[0]
    patches = extract_patches(x)                               # (B, N, C*P*P)
    # Row 0 = cls slot, rows SEQ..S_PAD-1 = padding; both zero so the in-kernel
    # patch matmul leaves them untouched (cls/pos live in add_bias).
    patches_pad = jnp.pad(
        patches, ((0, 0), (1, S_PAD - 1 - N_PATCHES), (0, 0)))
    patches2d = patches_pad.reshape(B * S_PAD, PATCH_VEC).astype(jnp.bfloat16)
    addb = jnp.tile(prep['add_bias'], (B, 1))                  # (B*S_PAD, EMB)
    return vit_fused(patches2d, addb, prep)                    # (B, NUM_CLASSES)


# ----------------------------- main --------------------------------------------
if __name__ == "__main__":
    key = jax.random.PRNGKey(0)
    pkey, xkey = jax.random.split(key)
    params = init_params(pkey)
    x = jax.random.normal(xkey, (BATCH, IN_CHANNELS, IMAGE_SIZE, IMAGE_SIZE),
                          jnp.float32)                         # NCHW, like PyTorch
    out = vit_forward(params, x)
    out = jax.block_until_ready(out)
    assert out.shape == (BATCH, NUM_CLASSES), out.shape
    assert bool(jnp.all(jnp.isfinite(out)))
    print("KERNEL_OK")
</pallas_src>

<mosaic_0001>
module attributes {stable_mosaic.version = 11 : i64} {
  func.func @vit_fused_kernel(%arg0: i32, %arg1: memref<64x64xbf16, #tpu.memory_space<vmem>>, %arg2: memref<64x32xf32, #tpu.memory_space<vmem>>, %arg3: memref<64x32xbf16, #tpu.memory_space<vmem>>, %arg4: memref<2x32x96xbf16, #tpu.memory_space<vmem>>, %arg5: memref<2x32x32xbf16, #tpu.memory_space<vmem>>, %arg6: memref<2x32x64xbf16, #tpu.memory_space<vmem>>, %arg7: memref<2x64x32xbf16, #tpu.memory_space<vmem>>, %arg8: memref<24x128xf32, #tpu.memory_space<vmem>>, %arg9: memref<32x128xbf16, #tpu.memory_space<vmem>>, %arg10: memref<2x128xf32, #tpu.memory_space<vmem>>) attributes {dimension_semantics = [#tpu.dimension_semantics<arbitrary>], iteration_bounds = array<i64: 1>, scalar_prefetch = 0 : i64, scratch_operands = 0 : i64, tpu.core_type = #tpu.core_type<tc>, window_params = [{pipeline_mode = #tpu.pipeline_mode<synchronous>, transform_indices = @transform_0, window_bounds = array<i64: 64, 64>}, {pipeline_mode = #tpu.pipeline_mode<synchronous>, transform_indices = @transform_1, window_bounds = array<i64: 64, 32>}, {pipeline_mode = #tpu.pipeline_mode<synchronous>, transform_indices = @transform_2, window_bounds = array<i64: 64, 32>}, {pipeline_mode = #tpu.pipeline_mode<synchronous>, transform_indices = @transform_3, window_bounds = array<i64: 2, 32, 96>}, {pipeline_mode = #tpu.pipeline_mode<synchronous>, transform_indices = @transform_4, window_bounds = array<i64: 2, 32, 32>}, {pipeline_mode = #tpu.pipeline_mode<synchronous>, transform_indices = @transform_5, window_bounds = array<i64: 2, 32, 64>}, {pipeline_mode = #tpu.pipeline_mode<synchronous>, transform_indices = @transform_6, window_bounds = array<i64: 2, 64, 32>}, {pipeline_mode = #tpu.pipeline_mode<synchronous>, transform_indices = @transform_7, window_bounds = array<i64: 24, 128>}, {pipeline_mode = #tpu.pipeline_mode<synchronous>, transform_indices = @transform_8, window_bounds = array<i64: 32, 128>}, {pipeline_mode = #tpu.pipeline_mode<synchronous>, transform_indices = @transform_9, window_bounds = array<i64: 2, 128>}]} {
    %c0 = arith.constant 0 : index
    %c0_0 = arith.constant 0 : index
    %0 = vector.load %arg1[%c0, %c0_0] : memref<64x64xbf16, #tpu.memory_space<vmem>>, vector<64x64xbf16>
    %c0_1 = arith.constant 0 : index
    %c0_2 = arith.constant 0 : index
    %1 = vector.load %arg3[%c0_1, %c0_2] : memref<64x32xbf16, #tpu.memory_space<vmem>>, vector<64x32xbf16>
    %cst = arith.constant dense<0.000000e+00> : vector<64x32xf32>
    %2 = tpu.matmul %0, %1, %cst {dimension_numbers = #tpu.dot_dimension_numbers<[1], [0], [0], [1], [0, 0, 1, 1], [], []>} : vector<64x64xbf16>, vector<64x32xbf16>, vector<64x32xf32> -> vector<64x32xf32>
    %c0_3 = arith.constant 0 : index
    %c0_4 = arith.constant 0 : index
    %3 = vector.load %arg2[%c0_3, %c0_4] : memref<64x32xf32, #tpu.memory_space<vmem>>, vector<64x32xf32>
    %4 = arith.addf %2, %3 : vector<64x32xf32>
    %5 = tpu.iota {dimensions = array<i32: 1>} : vector<1x32xi32>
    %c17_i32 = arith.constant 17 : i32
    %6 = vector.broadcast %c17_i32 : i32 to vector<1x32xi32>
    %7 = arith.cmpi slt, %5, %6 : vector<1x32xi32>
    %c0_5 = arith.constant 0 : index
    %c0_6 = arith.constant 0 : index
    %8 = vector.load %arg8[%c0_5, %c0_6] : memref<24x128xf32, #tpu.memory_space<vmem>>, vector<1x32xf32>
    %c1 = arith.constant 1 : index
    %c0_7 = arith.constant 0 : index
    %9 = vector.load %arg8[%c1, %c0_7] : memref<24x128xf32, #tpu.memory_space<vmem>>, vector<1x32xf32>
    %c2 = arith.constant 2 : index
    %c0_8 = arith.constant 0 : index
    %10 = vector.load %arg8[%c2, %c0_8] : memref<24x128xf32, #tpu.memory_space<vmem>>, vector<1x32xf32>
    %c3 = arith.constant 3 : index
    %c0_9 = arith.constant 0 : index
    %11 = vector.load %arg8[%c3, %c0_9] : memref<24x128xf32, #tpu.memory_space<vmem>>, vector<1x32xf32>
    %c4 = arith.constant 4 : index
    %c0_10 = arith.constant 0 : index
    %12 = vector.load %arg8[%c4, %c0_10] : memref<24x128xf32, #tpu.memory_space<vmem>>, vector<1x32xf32>
    %c5 = arith.constant 5 : index
    %c0_11 = arith.constant 0 : index
    %13 = vector.load %arg8[%c5, %c0_11] : memref<24x128xf32, #tpu.memory_space<vmem>>, vector<1x32xf32>
    %c6 = arith.constant 6 : index
    %c0_12 = arith.constant 0 : index
    %14 = vector.load %arg8[%c6, %c0_12] : memref<24x128xf32, #tpu.memory_space<vmem>>, vector<1x64xf32>
    %c7 = arith.constant 7 : index
    %c0_13 = arith.constant 0 : index
    %15 = vector.load %arg8[%c7, %c0_13] : memref<24x128xf32, #tpu.memory_space<vmem>>, vector<1x96xf32>
    %cst_14 = arith.constant dense<0.000000e+00> : vector<64xf32>
    %16 = vector.multi_reduction <add>, %4, %cst_14 [1] : vector<64x32xf32> to vector<64xf32>
    %17 = vector.shape_cast %16 : vector<64xf32> to vector<64x1xf32>
    %cst_15 = arith.constant 3.200000e+01 : f32
    %18 = vector.broadcast %cst_15 : f32 to vector<64x1xf32>
    %19 = arith.divf %17, %18 : vector<64x1xf32>
    %20 = vector.broadcast %19 : vector<64x1xf32> to vector<64x32xf32>
    %21 = arith.subf %4, %20 : vector<64x32xf32>
    %22 = arith.mulf %21, %21 : vector<64x32xf32>
    %cst_16 = arith.constant dense<0.000000e+00> : vector<64xf32>
    %23 = vector.multi_reduction <add>, %22, %cst_16 [1] : vector<64x32xf32> to vector<64xf32>
    %24 = vector.shape_cast %23 : vector<64xf32> to vector<64x1xf32>
    %cst_17 = arith.constant 3.200000e+01 : f32
    %25 = vector.broadcast %cst_17 : f32 to vector<64x1xf32>
    %26 = arith.divf %24, %25 : vector<64x1xf32>
    %27 = vector.broadcast %19 : vector<64x1xf32> to vector<64x32xf32>
    %28 = arith.subf %4, %27 : vector<64x32xf32>
    %cst_18 = arith.constant 9.99999974E-6 : f32
    %29 = vector.broadcast %cst_18 : f32 to vector<64x1xf32>
    %30 = arith.addf %26, %29 : vector<64x1xf32>
    %31 = math.rsqrt %30 : vector<64x1xf32>
    %32 = vector.broadcast %31 : vector<64x1xf32> to vector<64x32xf32>
    %33 = arith.mulf %28, %32 : vector<64x32xf32>
    %34 = vector.broadcast %8 : vector<1x32xf32> to vector<64x32xf32>
    %35 = arith.mulf %33, %34 : vector<64x32xf32>
    %36 = vector.broadcast %9 : vector<1x32xf32> to vector<64x32xf32>
    %37 = arith.addf %35, %36 : vector<64x32xf32>
    %38 = arith.truncf %37 : vector<64x32xf32> to vector<64x32xbf16>
    %c0_19 = arith.constant 0 : index
    %c0_20 = arith.constant 0 : index
    %c0_21 = arith.constant 0 : index
    %39 = vector.load %arg4[%c0_19, %c0_20, %c0_21] : memref<2x32x96xbf16, #tpu.memory_space<vmem>>, vector<1x32x96xbf16>
    %40 = vector.shape_cast %39 : vector<1x32x96xbf16> to vector<32x96xbf16>
    %cst_22 = arith.constant dense<0.000000e+00> : vector<64x96xf32>
    %41 = tpu.matmul %38, %40, %cst_22 {dimension_numbers = #tpu.dot_dimension_numbers<[1], [0], [0], [1], [0, 0, 1, 1], [], []>} : vector<64x32xbf16>, vector<32x96xbf16>, vector<64x96xf32> -> vector<64x96xf32>
    %42 = vector.broadcast %15 : vector<1x96xf32> to vector<64x96xf32>
    %43 = arith.addf %41, %42 : vector<64x96xf32>
    %44 = vector.extract_strided_slice %43 {offsets = [0, 0], sizes = [32, 96], strides = [1, 1]} : vector<64x96xf32> to vector<32x96xf32>
    %45 = vector.extract_strided_slice %44 {offsets = [0, 0], sizes = [32, 8], strides = [1, 1]} : vector<32x96xf32> to vector<32x8xf32>
    %46 = arith.truncf %45 : vector<32x8xf32> to vector<32x8xbf16>
    %47 = vector.extract_strided_slice %44 {offsets = [0, 32], sizes = [32, 8], strides = [1, 1]} : vector<32x96xf32> to vector<32x8xf32>
    %48 = arith.truncf %47 : vector<32x8xf32> to vector<32x8xbf16>
    %49 = vector.extract_strided_slice %44 {offsets = [0, 64], sizes = [32, 8], strides = [1, 1]} : vector<32x96xf32> to vector<32x8xf32>
    %50 = arith.truncf %49 : vector<32x8xf32> to vector<32x8xbf16>
    %cst_23 = arith.constant dense<0.000000e+00> : vector<32x32xf32>
    %51 = tpu.matmul %46, %48, %cst_23 {dimension_numbers = #tpu.dot_dimension_numbers<[1], [1], [0], [0], [0, 0, 1, 0], [], []>} : vector<32x8xbf16>, vector<32x8xbf16>, vector<32x32xf32> -> vector<32x32xf32>
    %cst_24 = arith.constant -1.000000e+30 : f32
    %52 = vector.shape_cast %7 : vector<1x32xi1> to vector<1x32xi1>
    %53 = vector.broadcast %52 : vector<1x32xi1> to vector<32x32xi1>
    %54 = vector.broadcast %cst_24 : f32 to vector<32x32xf32>
    %55 = arith.select %53, %51, %54 : vector<32x32xi1>, vector<32x32xf32>
    %cst_25 = arith.constant dense<0xFF800000> : vector<32xf32>
    %56 = vector.multi_reduction <maximumf>, %55, %cst_25 [1] : vector<32x32xf32> to vector<32xf32>
    %57 = vector.shape_cast %56 : vector<32xf32> to vector<32x1xf32>
    %58 = vector.broadcast %57 : vector<32x1xf32> to vector<32x32xf32>
    %59 = arith.subf %55, %58 : vector<32x32xf32>
    %60 = math.exp %59 : vector<32x32xf32>
    %cst_26 = arith.constant dense<0.000000e+00> : vector<32xf32>
    %61 = vector.multi_reduction <add>, %60, %cst_26 [1] : vector<32x32xf32> to vector<32xf32>
    %62 = vector.shape_cast %61 : vector<32xf32> to vector<32x1xf32>
    %63 = tpu.reciprocal %62 {approx = true} : vector<32x1xf32> -> vector<32x1xf32>
    %64 = vector.broadcast %63 : vector<32x1xf32> to vector<32x32xf32>
    %65 = arith.mulf %60, %64 : vector<32x32xf32>
    %66 = arith.truncf %65 : vector<32x32xf32> to vector<32x32xbf16>
    %cst_27 = arith.constant dense<0.000000e+00> : vector<32x8xf32>
    %67 = tpu.matmul %66, %50, %cst_27 {dimension_numbers = #tpu.dot_dimension_numbers<[1], [0], [0], [1], [0, 0, 1, 1], [], []>} : vector<32x32xbf16>, vector<32x8xbf16>, vector<32x8xf32> -> vector<32x8xf32>
    %68 = vector.extract_strided_slice %44 {offsets = [0, 8], sizes = [32, 8], strides = [1, 1]} : vector<32x96xf32> to vector<32x8xf32>
    %69 = arith.truncf %68 : vector<32x8xf32> to vector<32x8xbf16>
    %70 = vector.extract_strided_slice %44 {offsets = [0, 40], sizes = [32, 8], strides = [1, 1]} : vector<32x96xf32> to vector<32x8xf32>
    %71 = arith.truncf %70 : vector<32x8xf32> to vector<32x8xbf16>
    %72 = vector.extract_strided_slice %44 {offsets = [0, 72], sizes = [32, 8], strides = [1, 1]} : vector<32x96xf32> to vector<32x8xf32>
    %73 = arith.truncf %72 : vector<32x8xf32> to vector<32x8xbf16>
    %cst_28 = arith.constant dense<0.000000e+00> : vector<32x32xf32>
    %74 = tpu.matmul %69, %71, %cst_28 {dimension_numbers = #tpu.dot_dimension_numbers<[1], [1], [0], [0], [0, 0, 1, 0], [], []>} : vector<32x8xbf16>, vector<32x8xbf16>, vector<32x32xf32> -> vector<32x32xf32>
    %cst_29 = arith.constant -1.000000e+30 : f32
    %75 = vector.shape_cast %7 : vector<1x32xi1> to vector<1x32xi1>
    %76 = vector.broadcast %75 : vector<1x32xi1> to vector<32x32xi1>
    %77 = vector.broadcast %cst_29 : f32 to vector<32x32xf32>
    %78 = arith.select %76, %74, %77 : vector<32x32xi1>, vector<32x32xf32>
    %cst_30 = arith.constant dense<0xFF800000> : vector<32xf32>
    %79 = vector.multi_reduction <maximumf>, %78, %cst_30 [1] : vector<32x32xf32> to vector<32xf32>
    %80 = vector.shape_cast %79 : vector<32xf32> to vector<32x1xf32>
    %81 = vector.broadcast %80 : vector<32x1xf32> to vector<32x32xf32>
    %82 = arith.subf %78, %81 : vector<32x32xf32>
    %83 = math.exp %82 : vector<32x32xf32>
    %cst_31 = arith.constant dense<0.000000e+00> : vector<32xf32>
    %84 = vector.multi_reduction <add>, %83, %cst_31 [1] : vector<32x32xf32> to vector<32xf32>
    %85 = vector.shape_cast %84 : vector<32xf32> to vector<32x1xf32>
    %86 = tpu.reciprocal %85 {approx = true} : vector<32x1xf32> -> vector<32x1xf32>
    %87 = vector.broadcast %86 : vector<32x1xf32> to vector<32x32xf32>
    %88 = arith.mulf %83, %87 : vector<32x32xf32>
    %89 = arith.truncf %88 : vector<32x32xf32> to vector<32x32xbf16>
    %cst_32 = arith.constant dense<0.000000e+00> : vector<32x8xf32>
    %90 = tpu.matmul %89, %73, %cst_32 {dimension_numbers = #tpu.dot_dimension_numbers<[1], [0], [0], [1], [0, 0, 1, 1], [], []>} : vector<32x32xbf16>, vector<32x8xbf16>, vector<32x8xf32> -> vector<32x8xf32>
    %91 = vector.extract_strided_slice %44 {offsets = [0, 16], sizes = [32, 8], strides = [1, 1]} : vector<32x96xf32> to vector<32x8xf32>
    %92 = arith.truncf %91 : vector<32x8xf32> to vector<32x8xbf16>
    %93 = vector.extract_strided_slice %44 {offsets = [0, 48], sizes = [32, 8], strides = [1, 1]} : vector<32x96xf32> to vector<32x8xf32>
    %94 = arith.truncf %93 : vector<32x8xf32> to vector<32x8xbf16>
    %95 = vector.extract_strided_slice %44 {offsets = [0, 80], sizes = [32, 8], strides = [1, 1]} : vector<32x96xf32> to vector<32x8xf32>
    %96 = arith.truncf %95 : vector<32x8xf32> to vector<32x8xbf16>
    %cst_33 = arith.constant dense<0.000000e+00> : vector<32x32xf32>
    %97 = tpu.matmul %92, %94, %cst_33 {dimension_numbers = #tpu.dot_dimension_numbers<[1], [1], [0], [0], [0, 0, 1, 0], [], []>} : vector<32x8xbf16>, vector<32x8xbf16>, vector<32x32xf32> -> vector<32x32xf32>
    %cst_34 = arith.constant -1.000000e+30 : f32
    %98 = vector.shape_cast %7 : vector<1x32xi1> to vector<1x32xi1>
    %99 = vector.broadcast %98 : vector<1x32xi1> to vector<32x32xi1>
    %100 = vector.broadcast %cst_34 : f32 to vector<32x32xf32>
    %101 = arith.select %99, %97, %100 : vector<32x32xi1>, vector<32x32xf32>
    %cst_35 = arith.constant dense<0xFF800000> : vector<32xf32>
    %102 = vector.multi_reduction <maximumf>, %101, %cst_35 [1] : vector<32x32xf32> to vector<32xf32>
    %103 = vector.shape_cast %102 : vector<32xf32> to vector<32x1xf32>
    %104 = vector.broadcast %103 : vector<32x1xf32> to vector<32x32xf32>
    %105 = arith.subf %101, %104 : vector<32x32xf32>
    %106 = math.exp %105 : vector<32x32xf32>
    %cst_36 = arith.constant dense<0.000000e+00> : vector<32xf32>
    %107 = vector.multi_reduction <add>, %106, %cst_36 [1] : vector<32x32xf32> to vector<32xf32>
    %108 = vector.shape_cast %107 : vector<32xf32> to vector<32x1xf32>
    %109 = tpu.reciprocal %108 {approx = true} : vector<32x1xf32> -> vector<32x1xf32>
    %110 = vector.broadcast %109 : vector<32x1xf32> to vector<32x32xf32>
    %111 = arith.mulf %106, %110 : vector<32x32xf32>
    %112 = arith.truncf %111 : vector<32x32xf32> to vector<32x32xbf16>
    %cst_37 = arith.constant dense<0.000000e+00> : vector<32x8xf32>
    %113 = tpu.matmul %112, %96, %cst_37 {dimension_numbers = #tpu.dot_dimension_numbers<[1], [0], [0], [1], [0, 0, 1, 1], [], []>} : vector<32x32xbf16>, vector<32x8xbf16>, vector<32x8xf32> -> vector<32x8xf32>
    %114 = vector.extract_strided_slice %44 {offsets = [0, 24], sizes = [32, 8], strides = [1, 1]} : vector<32x96xf32> to vector<32x8xf32>
    %115 = arith.truncf %114 : vector<32x8xf32> to vector<32x8xbf16>
    %116 = vector.extract_strided_slice %44 {offsets = [0, 56], sizes = [32, 8], strides = [1, 1]} : vector<32x96xf32> to vector<32x8xf32>
    %117 = arith.truncf %116 : vector<32x8xf32> to vector<32x8xbf16>
    %118 = vector.extract_strided_slice %44 {offsets = [0, 88], sizes = [32, 8], strides = [1, 1]} : vector<32x96xf32> to vector<32x8xf32>
    %119 = arith.truncf %118 : vector<32x8xf32> to vector<32x8xbf16>
    %cst_38 = arith.constant dense<0.000000e+00> : vector<32x32xf32>
    %120 = tpu.matmul %115, %117, %cst_38 {dimension_numbers = #tpu.dot_dimension_numbers<[1], [1], [0], [0], [0, 0, 1, 0], [], []>} : vector<32x8xbf16>, vector<32x8xbf16>, vector<32x32xf32> -> vector<32x32xf32>
    %cst_39 = arith.constant -1.000000e+30 : f32
    %121 = vector.shape_cast %7 : vector<1x32xi1> to vector<1x32xi1>
    %122 = vector.broadcast %121 : vector<1x32xi1> to vector<32x32xi1>
    %123 = vector.broadcast %cst_39 : f32 to vector<32x32xf32>
    %124 = arith.select %122, %120, %123 : vector<32x32xi1>, vector<32x32xf32>
    %cst_40 = arith.constant dense<0xFF800000> : vector<32xf32>
    %125 = vector.multi_reduction <maximumf>, %124, %cst_40 [1] : vector<32x32xf32> to vector<32xf32>
    %126 = vector.shape_cast %125 : vector<32xf32> to vector<32x1xf32>
    %127 = vector.broadcast %126 : vector<32x1xf32> to vector<32x32xf32>
    %128 = arith.subf %124, %127 : vector<32x32xf32>
    %129 = math.exp %128 : vector<32x32xf32>
    %cst_41 = arith.constant dense<0.000000e+00> : vector<32xf32>
    %130 = vector.multi_reduction <add>, %129, %cst_41 [1] : vector<32x32xf32> to vector<32xf32>
    %131 = vector.shape_cast %130 : vector<32xf32> to vector<32x1xf32>
    %132 = tpu.reciprocal %131 {approx = true} : vector<32x1xf32> -> vector<32x1xf32>
    %133 = vector.broadcast %132 : vector<32x1xf32> to vector<32x32xf32>
    %134 = arith.mulf %129, %133 : vector<32x32xf32>
    %135 = arith.truncf %134 : vector<32x32xf32> to vector<32x32xbf16>
    %cst_42 = arith.constant dense<0.000000e+00> : vector<32x8xf32>
    %136 = tpu.matmul %135, %119, %cst_42 {dimension_numbers = #tpu.dot_dimension_numbers<[1], [0], [0], [1], [0, 0, 1, 1], [], []>} : vector<32x32xbf16>, vector<32x8xbf16>, vector<32x8xf32> -> vector<32x8xf32>
    %137 = tpu.concatenate %67, %90, %113, %136 in 1 : vector<32x8xf32>, vector<32x8xf32>, vector<32x8xf32>, vector<32x8xf32> -> vector<32x32xf32>
    %138 = vector.extract_strided_slice %43 {offsets = [32, 0], sizes = [32, 96], strides = [1, 1]} : vector<64x96xf32> to vector<32x96xf32>
    %139 = vector.extract_strided_slice %138 {offsets = [0, 0], sizes = [32, 8], strides = [1, 1]} : vector<32x96xf32> to vector<32x8xf32>
    %140 = arith.truncf %139 : vector<32x8xf32> to vector<32x8xbf16>
    %141 = vector.extract_strided_slice %138 {offsets = [0, 32], sizes = [32, 8], strides = [1, 1]} : vector<32x96xf32> to vector<32x8xf32>
    %142 = arith.truncf %141 : vector<32x8xf32> to vector<32x8xbf16>
    %143 = vector.extract_strided_slice %138 {offsets = [0, 64], sizes = [32, 8], strides = [1, 1]} : vector<32x96xf32> to vector<32x8xf32>
    %144 = arith.truncf %143 : vector<32x8xf32> to vector<32x8xbf16>
    %cst_43 = arith.constant dense<0.000000e+00> : vector<32x32xf32>
    %145 = tpu.matmul %140, %142, %cst_43 {dimension_numbers = #tpu.dot_dimension_numbers<[1], [1], [0], [0], [0, 0, 1, 0], [], []>} : vector<32x8xbf16>, vector<32x8xbf16>, vector<32x32xf32> -> vector<32x32xf32>
    %cst_44 = arith.constant -1.000000e+30 : f32
    %146 = vector.shape_cast %7 : vector<1x32xi1> to vector<1x32xi1>
    %147 = vector.broadcast %146 : vector<1x32xi1> to vector<32x32xi1>
    %148 = vector.broadcast %cst_44 : f32 to vector<32x32xf32>
    %149 = arith.select %147, %145, %148 : vector<32x32xi1>, vector<32x32xf32>
    %cst_45 = arith.constant dense<0xFF800000> : vector<32xf32>
    %150 = vector.multi_reduction <maximumf>, %149, %cst_45 [1] : vector<32x32xf32> to vector<32xf32>
    %151 = vector.shape_cast %150 : vector<32xf32> to vector<32x1xf32>
    %152 = vector.broadcast %151 : vector<32x1xf32> to vector<32x32xf32>
    %153 = arith.subf %149, %152 : vector<32x32xf32>
    %154 = math.exp %153 : vector<32x32xf32>
    %cst_46 = arith.constant dense<0.000000e+00> : vector<32xf32>
    %155 = vector.multi_reduction <add>, %154, %cst_46 [1] : vector<32x32xf32> to vector<32xf32>
    %156 = vector.shape_cast %155 : vector<32xf32> to vector<32x1xf32>
    %157 = tpu.reciprocal %156 {approx = true} : vector<32x1xf32> -> vector<32x1xf32>
    %158 = vector.broadcast %157 : vector<32x1xf32> to vector<32x32xf32>
    %159 = arith.mulf %154, %158 : vector<32x32xf32>
    %160 = arith.truncf %159 : vector<32x32xf32> to vector<32x32xbf16>
    %cst_47 = arith.constant dense<0.000000e+00> : vector<32x8xf32>
    %161 = tpu.matmul %160, %144, %cst_47 {dimension_numbers = #tpu.dot_dimension_numbers<[1], [0], [0], [1], [0, 0, 1, 1], [], []>} : vector<32x32xbf16>, vector<32x8xbf16>, vector<32x8xf32> -> vector<32x8xf32>
    %162 = vector.extract_strided_slice %138 {offsets = [0, 8], sizes = [32, 8], strides = [1, 1]} : vector<32x96xf32> to vector<32x8xf32>
    %163 = arith.truncf %162 : vector<32x8xf32> to vector<32x8xbf16>
    %164 = vector.extract_strided_slice %138 {offsets = [0, 40], sizes = [32, 8], strides = [1, 1]} : vector<32x96xf32> to vector<32x8xf32>
    %165 = arith.truncf %164 : vector<32x8xf32> to vector<32x8xbf16>
    %166 = vector.extract_strided_slice %138 {offsets = [0, 72], sizes = [32, 8], strides = [1, 1]} : vector<32x96xf32> to vector<32x8xf32>
    %167 = arith.truncf %166 : vector<32x8xf32> to vector<32x8xbf16>
    %cst_48 = arith.constant dense<0.000000e+00> : vector<32x32xf32>
    %168 = tpu.matmul %163, %165, %cst_48 {dimension_numbers = #tpu.dot_dimension_numbers<[1], [1], [0], [0], [0, 0, 1, 0], [], []>} : vector<32x8xbf16>, vector<32x8xbf16>, vector<32x32xf32> -> vector<32x32xf32>
    %cst_49 = arith.constant -1.000000e+30 : f32
    %169 = vector.shape_cast %7 : vector<1x32xi1> to vector<1x32xi1>
    %170 = vector.broadcast %169 : vector<1x32xi1> to vector<32x32xi1>
    %171 = vector.broadcast %cst_49 : f32 to vector<32x32xf32>
    %172 = arith.select %170, %168, %171 : vector<32x32xi1>, vector<32x32xf32>
    %cst_50 = arith.constant dense<0xFF800000> : vector<32xf32>
    %173 = vector.multi_reduction <maximumf>, %172, %cst_50 [1] : vector<32x32xf32> to vector<32xf32>
    %174 = vector.shape_cast %173 : vector<32xf32> to vector<32x1xf32>
    %175 = vector.broadcast %174 : vector<32x1xf32> to vector<32x32xf32>
    %176 = arith.subf %172, %175 : vector<32x32xf32>
    %177 = math.exp %176 : vector<32x32xf32>
    %cst_51 = arith.constant dense<0.000000e+00> : vector<32xf32>
    %178 = vector.multi_reduction <add>, %177, %cst_51 [1] : vector<32x32xf32> to vector<32xf32>
    %179 = vector.shape_cast %178 : vector<32xf32> to vector<32x1xf32>
    %180 = tpu.reciprocal %179 {approx = true} : vector<32x1xf32> -> vector<32x1xf32>
    %181 = vector.broadcast %180 : vector<32x1xf32> to vector<32x32xf32>
    %182 = arith.mulf %177, %181 : vector<32x32xf32>
    %183 = arith.truncf %182 : vector<32x32xf32> to vector<32x32xbf16>
    %cst_52 = arith.constant dense<0.000000e+00> : vector<32x8xf32>
    %184 = tpu.matmul %183, %167, %cst_52 {dimension_numbers = #tpu.dot_dimension_numbers<[1], [0], [0], [1], [0, 0, 1, 1], [], []>} : vector<32x32xbf16>, vector<32x8xbf16>, vector<32x8xf32> -> vector<32x8xf32>
    %185 = vector.extract_strided_slice %138 {offsets = [0, 16], sizes = [32, 8], strides = [1, 1]} : vector<32x96xf32> to vector<32x8xf32>
    %186 = arith.truncf %185 : vector<32x8xf32> to vector<32x8xbf16>
    %187 = vector.extract_strided_slice %138 {offsets = [0, 48], sizes = [32, 8], strides = [1, 1]} : vector<32x96xf32> to vector<32x8xf32>
    %188 = arith.truncf %187 : vector<32x8xf32> to vector<32x8xbf16>
    %189 = vector.extract_strided_slice %138 {offsets = [0, 80], sizes = [32, 8], strides = [1, 1]} : vector<32x96xf32> to vector<32x8xf32>
    %190 = arith.truncf %189 : vector<32x8xf32> to vector<32x8xbf16>
    %cst_53 = arith.constant dense<0.000000e+00> : vector<32x32xf32>
    %191 = tpu.matmul %186, %188, %cst_53 {dimension_numbers = #tpu.dot_dimension_numbers<[1], [1], [0], [0], [0, 0, 1, 0], [], []>} : vector<32x8xbf16>, vector<32x8xbf16>, vector<32x32xf32> -> vector<32x32xf32>
    %cst_54 = arith.constant -1.000000e+30 : f32
    %192 = vector.shape_cast %7 : vector<1x32xi1> to vector<1x32xi1>
    %193 = vector.broadcast %192 : vector<1x32xi1> to vector<32x32xi1>
    %194 = vector.broadcast %cst_54 : f32 to vector<32x32xf32>
    %195 = arith.select %193, %191, %194 : vector<32x32xi1>, vector<32x32xf32>
    %cst_55 = arith.constant dense<0xFF800000> : vector<32xf32>
    %196 = vector.multi_reduction <maximumf>, %195, %cst_55 [1] : vector<32x32xf32> to vector<32xf32>
    %197 = vector.shape_cast %196 : vector<32xf32> to vector<32x1xf32>
    %198 = vector.broadcast %197 : vector<32x1xf32> to vector<32x32xf32>
    %199 = arith.subf %195, %198 : vector<32x32xf32>
    %200 = math.exp %199 : vector<32x32xf32>
    %cst_56 = arith.constant dense<0.000000e+00> : vector<32xf32>
    %201 = vector.multi_reduction <add>, %200, %cst_56 [1] : vector<32x32xf32> to vector<32xf32>
    %202 = vector.shape_cast %201 : vector<32xf32> to vector<32x1xf32>
    %203 = tpu.reciprocal %202 {approx = true} : vector<32x1xf32> -> vector<32x1xf32>
    %204 = vector.broadcast %203 : vector<32x1xf32> to vector<32x32xf32>
    %205 = arith.mulf %200, %204 : vector<32x32xf32>
    %206 = arith.truncf %205 : vector<32x32xf32> to vector<32x32xbf16>
    %cst_57 = arith.constant dense<0.000000e+00> : vector<32x8xf32>
    %207 = tpu.matmul %206, %190, %cst_57 {dimension_numbers = #tpu.dot_dimension_numbers<[1], [0], [0], [1], [0, 0, 1, 1], [], []>} : vector<32x32xbf16>, vector<32x8xbf16>, vector<32x8xf32> -> vector<32x8xf32>
    %208 = vector.extract_strided_slice %138 {offsets = [0, 24], sizes = [32, 8], strides = [1, 1]} : vector<32x96xf32> to vector<32x8xf32>
    %209 = arith.truncf %208 : vector<32x8xf32> to vector<32x8xbf16>
    %210 = vector.extract_strided_slice %138 {offsets = [0, 56], sizes = [32, 8], strides = [1, 1]} : vector<32x96xf32> to vector<32x8xf32>
    %211 = arith.truncf %210 : vector<32x8xf32> to vector<32x8xbf16>
    %212 = vector.extract_strided_slice %138 {offsets = [0, 88], sizes = [32, 8], strides = [1, 1]} : vector<32x96xf32> to vector<32x8xf32>
    %213 = arith.truncf %212 : vector<32x8xf32> to vector<32x8xbf16>
    %cst_58 = arith.constant dense<0.000000e+00> : vector<32x32xf32>
    %214 = tpu.matmul %209, %211, %cst_58 {dimension_numbers = #tpu.dot_dimension_numbers<[1], [1], [0], [0], [0, 0, 1, 0], [], []>} : vector<32x8xbf16>, vector<32x8xbf16>, vector<32x32xf32> -> vector<32x32xf32>
    %cst_59 = arith.constant -1.000000e+30 : f32
    %215 = vector.shape_cast %7 : vector<1x32xi1> to vector<1x32xi1>
    %216 = vector.broadcast %215 : vector<1x32xi1> to vector<32x32xi1>
    %217 = vector.broadcast %cst_59 : f32 to vector<32x32xf32>
    %218 = arith.select %216, %214, %217 : vector<32x32xi1>, vector<32x32xf32>
    %cst_60 = arith.constant dense<0xFF800000> : vector<32xf32>
    %219 = vector.multi_reduction <maximumf>, %218, %cst_60 [1] : vector<32x32xf32> to vector<32xf32>
    %220 = vector.shape_cast %219 : vector<32xf32> to vector<32x1xf32>
    %221 = vector.broadcast %220 : vector<32x1xf32> to vector<32x32xf32>
    %222 = arith.subf %218, %221 : vector<32x32xf32>
    %223 = math.exp %222 : vector<32x32xf32>
    %cst_61 = arith.constant dense<0.000000e+00> : vector<32xf32>
    %224 = vector.multi_reduction <add>, %223, %cst_61 [1] : vector<32x32xf32> to vector<32xf32>
    %225 = vector.shape_cast %224 : vector<32xf32> to vector<32x1xf32>
    %226 = tpu.reciprocal %225 {approx = true} : vector<32x1xf32> -> vector<32x1xf32>
    %227 = vector.broadcast %226 : vector<32x1xf32> to vector<32x32xf32>
    %228 = arith.mulf %223, %227 : vector<32x32xf32>
    %229 = arith.truncf %228 : vector<32x32xf32> to vector<32x32xbf16>
    %cst_62 = arith.constant dense<0.000000e+00> : vector<32x8xf32>
    %230 = tpu.matmul %229, %213, %cst_62 {dimension_numbers = #tpu.dot_dimension_numbers<[1], [0], [0], [1], [0, 0, 1, 1], [], []>} : vector<32x32xbf16>, vector<32x8xbf16>, vector<32x8xf32> -> vector<32x8xf32>
    %231 = tpu.concatenate %161, %184, %207, %230 in 1 : vector<32x8xf32>, vector<32x8xf32>, vector<32x8xf32>, vector<32x8xf32> -> vector<32x32xf32>
    %232 = tpu.concatenate %137, %231 in 0 : vector<32x32xf32>, vector<32x32xf32> -> vector<64x32xf32>
    %233 = arith.truncf %232 : vector<64x32xf32> to vector<64x32xbf16>
    %c0_63 = arith.constant 0 : index
    %c0_64 = arith.constant 0 : index
    %c0_65 = arith.constant 0 : index
    %234 = vector.load %arg5[%c0_63, %c0_64, %c0_65] : memref<2x32x32xbf16, #tpu.memory_space<vmem>>, vector<1x32x32xbf16>
    %235 = vector.shape_cast %234 : vector<1x32x32xbf16> to vector<32x32xbf16>
    %cst_66 = arith.constant dense<0.000000e+00> : vector<64x32xf32>
    %236 = tpu.matmul %233, %235, %cst_66 {dimension_numbers = #tpu.dot_dimension_numbers<[1], [0], [0], [1], [0, 0, 1, 1], [], []>} : vector<64x32xbf16>, vector<32x32xbf16>, vector<64x32xf32> -> vector<64x32xf32>
    %237 = arith.addf %4, %236 : vector<64x32xf32>
    %238 = vector.broadcast %12 : vector<1x32xf32> to vector<64x32xf32>
    %239 = arith.addf %237, %238 : vector<64x32xf32>
    %cst_67 = arith.constant dense<0.000000e+00> : vector<64xf32>
    %240 = vector.multi_reduction <add>, %239, %cst_67 [1] : vector<64x32xf32> to vector<64xf32>
    %241 = vector.shape_cast %240 : vector<64xf32> to vector<64x1xf32>
    %cst_68 = arith.constant 3.200000e+01 : f32
    %242 = vector.broadcast %cst_68 : f32 to vector<64x1xf32>
    %243 = arith.divf %241, %242 : vector<64x1xf32>
    %244 = vector.broadcast %243 : vector<64x1xf32> to vector<64x32xf32>
    %245 = arith.subf %239, %244 : vector<64x32xf32>
    %246 = arith.mulf %245, %245 : vector<64x32xf32>
    %cst_69 = arith.constant dense<0.000000e+00> : vector<64xf32>
    %247 = vector.multi_reduction <add>, %246, %cst_69 [1] : vector<64x32xf32> to vector<64xf32>
    %248 = vector.shape_cast %247 : vector<64xf32> to vector<64x1xf32>
    %cst_70 = arith.constant 3.200000e+01 : f32
    %249 = vector.broadcast %cst_70 : f32 to vector<64x1xf32>
    %250 = arith.divf %248, %249 : vector<64x1xf32>
    %251 = vector.broadcast %243 : vector<64x1xf32> to vector<64x32xf32>
    %252 = arith.subf %239, %251 : vector<64x32xf32>
    %cst_71 = arith.constant 9.99999974E-6 : f32
    %253 = vector.broadcast %cst_71 : f32 to vector<64x1xf32>
    %254 = arith.addf %250, %253 : vector<64x1xf32>
    %255 = math.rsqrt %254 : vector<64x1xf32>
    %256 = vector.broadcast %255 : vector<64x1xf32> to vector<64x32xf32>
    %257 = arith.mulf %252, %256 : vector<64x32xf32>
    %258 = vector.broadcast %10 : vector<1x32xf32> to vector<64x32xf32>
    %259 = arith.mulf %257, %258 : vector<64x32xf32>
    %260 = vector.broadcast %11 : vector<1x32xf32> to vector<64x32xf32>
    %261 = arith.addf %259, %260 : vector<64x32xf32>
    %262 = arith.truncf %261 : vector<64x32xf32> to vector<64x32xbf16>
    %c0_72 = arith.constant 0 : index
    %c0_73 = arith.constant 0 : index
    %c0_74 = arith.constant 0 : index
    %263 = vector.load %arg6[%c0_72, %c0_73, %c0_74] : memref<2x32x64xbf16, #tpu.memory_space<vmem>>, vector<1x32x64xbf16>
    %264 = vector.shape_cast %263 : vector<1x32x64xbf16> to vector<32x64xbf16>
    %cst_75 = arith.constant dense<0.000000e+00> : vector<64x64xf32>
    %265 = tpu.matmul %262, %264, %cst_75 {dimension_numbers = #tpu.dot_dimension_numbers<[1], [0], [0], [1], [0, 0, 1, 1], [], []>} : vector<64x32xbf16>, vector<32x64xbf16>, vector<64x64xf32> -> vector<64x64xf32>
    %266 = vector.broadcast %14 : vector<1x64xf32> to vector<64x64xf32>
    %267 = arith.addf %265, %266 : vector<64x64xf32>
    %cst_76 = arith.constant 5.000000e-01 : f32
    %268 = vector.broadcast %cst_76 : f32 to vector<64x64xf32>
    %269 = arith.mulf %268, %267 : vector<64x64xf32>
    %cst_77 = arith.constant 0.707106769 : f32
    %270 = vector.broadcast %cst_77 : f32 to vector<64x64xf32>
    %271 = arith.mulf %267, %270 : vector<64x64xf32>
    %272 = math.absf %271 : vector<64x64xf32>
    %cst_78 = arith.constant 0.327591091 : f32
    %273 = vector.broadcast %cst_78 : f32 to vector<64x64xf32>
    %274 = arith.mulf %273, %272 : vector<64x64xf32>
    %cst_79 = arith.constant 1.000000e+00 : f32
    %275 = vector.broadcast %cst_79 : f32 to vector<64x64xf32>
    %276 = arith.addf %275, %274 : vector<64x64xf32>
    %277 = tpu.reciprocal %276 {approx = true} : vector<64x64xf32> -> vector<64x64xf32>
    %cst_80 = arith.constant 1.06140542 : f32
    %278 = vector.broadcast %cst_80 : f32 to vector<64x64xf32>
    %279 = arith.mulf %278, %277 : vector<64x64xf32>
    %cst_81 = arith.constant -1.45315206 : f32
    %280 = vector.broadcast %cst_81 : f32 to vector<64x64xf32>
    %281 = arith.addf %279, %280 : vector<64x64xf32>
    %282 = arith.mulf %281, %277 : vector<64x64xf32>
    %cst_82 = arith.constant 1.42141378 : f32
    %283 = vector.broadcast %cst_82 : f32 to vector<64x64xf32>
    %284 = arith.addf %282, %283 : vector<64x64xf32>
    %285 = arith.mulf %284, %277 : vector<64x64xf32>
    %cst_83 = arith.constant -0.284496725 : f32
    %286 = vector.broadcast %cst_83 : f32 to vector<64x64xf32>
    %287 = arith.addf %285, %286 : vector<64x64xf32>
    %288 = arith.mulf %287, %277 : vector<64x64xf32>
    %cst_84 = arith.constant 0.254829586 : f32
    %289 = vector.broadcast %cst_84 : f32 to vector<64x64xf32>
    %290 = arith.addf %288, %289 : vector<64x64xf32>
    %291 = arith.mulf %290, %277 : vector<64x64xf32>
    %cst_85 = arith.constant 0.000000e+00 : f32
    %292 = vector.broadcast %cst_85 : f32 to vector<64x64xf32>
    %293 = arith.subf %292, %272 : vector<64x64xf32>
    %294 = arith.mulf %293, %272 : vector<64x64xf32>
    %295 = math.exp %294 : vector<64x64xf32>
    %296 = arith.mulf %291, %295 : vector<64x64xf32>
    %cst_86 = arith.constant 1.000000e+00 : f32
    %297 = vector.broadcast %cst_86 : f32 to vector<64x64xf32>
    %298 = arith.subf %297, %296 : vector<64x64xf32>
    %cst_87 = arith.constant 0.000000e+00 : f32
    %299 = vector.broadcast %cst_87 : f32 to vector<64x64xf32>
    %300 = arith.cmpf oge, %271, %299 : vector<64x64xf32>
    %cst_88 = arith.constant 0.000000e+00 : f32
    %301 = vector.broadcast %cst_88 : f32 to vector<64x64xf32>
    %302 = arith.subf %301, %298 : vector<64x64xf32>
    %303 = arith.select %300, %298, %302 : vector<64x64xi1>, vector<64x64xf32>
    %cst_89 = arith.constant 1.000000e+00 : f32
    %304 = vector.broadcast %cst_89 : f32 to vector<64x64xf32>
    %305 = arith.addf %304, %303 : vector<64x64xf32>
    %306 = arith.mulf %269, %305 : vector<64x64xf32>
    %307 = arith.truncf %306 : vector<64x64xf32> to vector<64x64xbf16>
    %c0_90 = arith.constant 0 : index
    %c0_91 = arith.constant 0 : index
    %c0_92 = arith.constant 0 : index
    %308 = vector.load %arg7[%c0_90, %c0_91, %c0_92] : memref<2x64x32xbf16, #tpu.memory_space<vmem>>, vector<1x64x32xbf16>
    %309 = vector.shape_cast %308 : vector<1x64x32xbf16> to vector<64x32xbf16>
    %cst_93 = arith.constant dense<0.000000e+00> : vector<64x32xf32>
    %310 = tpu.matmul %307, %309, %cst_93 {dimension_numbers = #tpu.dot_dimension_numbers<[1], [0], [0], [1], [0, 0, 1, 1], [], []>} : vector<64x64xbf16>, vector<64x32xbf16>, vector<64x32xf32> -> vector<64x32xf32>
    %311 = vector.broadcast %13 : vector<1x32xf32> to vector<64x32xf32>
    %312 = arith.addf %310, %311 : vector<64x32xf32>
    %313 = arith.addf %239, %312 : vector<64x32xf32>
    %c8 = arith.constant 8 : index
    %c0_94 = arith.constant 0 : index
    %314 = vector.load %arg8[%c8, %c0_94] : memref<24x128xf32, #tpu.memory_space<vmem>>, vector<1x32xf32>
    %c9 = arith.constant 9 : index
    %c0_95 = arith.constant 0 : index
    %315 = vector.load %arg8[%c9, %c0_95] : memref<24x128xf32, #tpu.memory_space<vmem>>, vector<1x32xf32>
    %c10 = arith.constant 10 : index
    %c0_96 = arith.constant 0 : index
    %316 = vector.load %arg8[%c10, %c0_96] : memref<24x128xf32, #tpu.memory_space<vmem>>, vector<1x32xf32>
    %c11 = arith.constant 11 : index
    %c0_97 = arith.constant 0 : index
    %317 = vector.load %arg8[%c11, %c0_97] : memref<24x128xf32, #tpu.memory_space<vmem>>, vector<1x32xf32>
    %c12 = arith.constant 12 : index
    %c0_98 = arith.constant 0 : index
    %318 = vector.load %arg8[%c12, %c0_98] : memref<24x128xf32, #tpu.memory_space<vmem>>, vector<1x32xf32>
    %c13 = arith.constant 13 : index
    %c0_99 = arith.constant 0 : index
    %319 = vector.load %arg8[%c13, %c0_99] : memref<24x128xf32, #tpu.memory_space<vmem>>, vector<1x32xf32>
    %c14 = arith.constant 14 : index
    %c0_100 = arith.constant 0 : index
    %320 = vector.load %arg8[%c14, %c0_100] : memref<24x128xf32, #tpu.memory_space<vmem>>, vector<1x64xf32>
    %c15 = arith.constant 15 : index
    %c0_101 = arith.constant 0 : index
    %321 = vector.load %arg8[%c15, %c0_101] : memref<24x128xf32, #tpu.memory_space<vmem>>, vector<1x96xf32>
    %cst_102 = arith.constant dense<0.000000e+00> : vector<64xf32>
    %322 = vector.multi_reduction <add>, %313, %cst_102 [1] : vector<64x32xf32> to vector<64xf32>
    %323 = vector.shape_cast %322 : vector<64xf32> to vector<64x1xf32>
    %cst_103 = arith.constant 3.200000e+01 : f32
    %324 = vector.broadcast %cst_103 : f32 to vector<64x1xf32>
    %325 = arith.divf %323, %324 : vector<64x1xf32>
    %326 = vector.broadcast %325 : vector<64x1xf32> to vector<64x32xf32>
    %327 = arith.subf %313, %326 : vector<64x32xf32>
    %328 = arith.mulf %327, %327 : vector<64x32xf32>
    %cst_104 = arith.constant dense<0.000000e+00> : vector<64xf32>
    %329 = vector.multi_reduction <add>, %328, %cst_104 [1] : vector<64x32xf32> to vector<64xf32>
    %330 = vector.shape_cast %329 : vector<64xf32> to vector<64x1xf32>
    %cst_105 = arith.constant 3.200000e+01 : f32
    %331 = vector.broadcast %cst_105 : f32 to vector<64x1xf32>
    %332 = arith.divf %330, %331 : vector<64x1xf32>
    %333 = vector.broadcast %325 : vector<64x1xf32> to vector<64x32xf32>
    %334 = arith.subf %313, %333 : vector<64x32xf32>
    %cst_106 = arith.constant 9.99999974E-6 : f32
    %335 = vector.broadcast %cst_106 : f32 to vector<64x1xf32>
    %336 = arith.addf %332, %335 : vector<64x1xf32>
    %337 = math.rsqrt %336 : vector<64x1xf32>
    %338 = vector.broadcast %337 : vector<64x1xf32> to vector<64x32xf32>
    %339 = arith.mulf %334, %338 : vector<64x32xf32>
    %340 = vector.broadcast %314 : vector<1x32xf32> to vector<64x32xf32>
    %341 = arith.mulf %339, %340 : vector<64x32xf32>
    %342 = vector.broadcast %315 : vector<1x32xf32> to vector<64x32xf32>
    %343 = arith.addf %341, %342 : vector<64x32xf32>
    %344 = arith.truncf %343 : vector<64x32xf32> to vector<64x32xbf16>
    %c1_107 = arith.constant 1 : index
    %c0_108 = arith.constant 0 : index
    %c0_109 = arith.constant 0 : index
    %345 = vector.load %arg4[%c1_107, %c0_108, %c0_109] : memref<2x32x96xbf16, #tpu.memory_space<vmem>>, vector<1x32x96xbf16>
    %346 = vector.shape_cast %345 : vector<1x32x96xbf16> to vector<32x96xbf16>
    %cst_110 = arith.constant dense<0.000000e+00> : vector<64x96xf32>
    %347 = tpu.matmul %344, %346, %cst_110 {dimension_numbers = #tpu.dot_dimension_numbers<[1], [0], [0], [1], [0, 0, 1, 1], [], []>} : vector<64x32xbf16>, vector<32x96xbf16>, vector<64x96xf32> -> vector<64x96xf32>
    %348 = vector.broadcast %321 : vector<1x96xf32> to vector<64x96xf32>
    %349 = arith.addf %347, %348 : vector<64x96xf32>
    %350 = vector.extract_strided_slice %349 {offsets = [0, 0], sizes = [32, 96], strides = [1, 1]} : vector<64x96xf32> to vector<32x96xf32>
    %351 = vector.extract_strided_slice %350 {offsets = [0, 0], sizes = [32, 8], strides = [1, 1]} : vector<32x96xf32> to vector<32x8xf32>
    %352 = arith.truncf %351 : vector<32x8xf32> to vector<32x8xbf16>
    %353 = vector.extract_strided_slice %350 {offsets = [0, 32], sizes = [32, 8], strides = [1, 1]} : vector<32x96xf32> to vector<32x8xf32>
    %354 = arith.truncf %353 : vector<32x8xf32> to vector<32x8xbf16>
    %355 = vector.extract_strided_slice %350 {offsets = [0, 64], sizes = [32, 8], strides = [1, 1]} : vector<32x96xf32> to vector<32x8xf32>
    %356 = arith.truncf %355 : vector<32x8xf32> to vector<32x8xbf16>
    %cst_111 = arith.constant dense<0.000000e+00> : vector<32x32xf32>
    %357 = tpu.matmul %352, %354, %cst_111 {dimension_numbers = #tpu.dot_dimension_numbers<[1], [1], [0], [0], [0, 0, 1, 0], [], []>} : vector<32x8xbf16>, vector<32x8xbf16>, vector<32x32xf32> -> vector<32x32xf32>
    %cst_112 = arith.constant -1.000000e+30 : f32
    %358 = vector.shape_cast %7 : vector<1x32xi1> to vector<1x32xi1>
    %359 = vector.broadcast %358 : vector<1x32xi1> to vector<32x32xi1>
    %360 = vector.broadcast %cst_112 : f32 to vector<32x32xf32>
    %361 = arith.select %359, %357, %360 : vector<32x32xi1>, vector<32x32xf32>
    %cst_113 = arith.constant dense<0xFF800000> : vector<32xf32>
    %362 = vector.multi_reduction <maximumf>, %361, %cst_113 [1] : vector<32x32xf32> to vector<32xf32>
    %363 = vector.shape_cast %362 : vector<32xf32> to vector<32x1xf32>
    %364 = vector.broadcast %363 : vector<32x1xf32> to vector<32x32xf32>
    %365 = arith.subf %361, %364 : vector<32x32xf32>
    %366 = math.exp %365 : vector<32x32xf32>
    %cst_114 = arith.constant dense<0.000000e+00> : vector<32xf32>
    %367 = vector.multi_reduction <add>, %366, %cst_114 [1] : vector<32x32xf32> to vector<32xf32>
    %368 = vector.shape_cast %367 : vector<32xf32> to vector<32x1xf32>
    %369 = tpu.reciprocal %368 {approx = true} : vector<32x1xf32> -> vector<32x1xf32>
    %370 = vector.broadcast %369 : vector<32x1xf32> to vector<32x32xf32>
    %371 = arith.mulf %366, %370 : vector<32x32xf32>
    %372 = arith.truncf %371 : vector<32x32xf32> to vector<32x32xbf16>
    %cst_115 = arith.constant dense<0.000000e+00> : vector<32x8xf32>
    %373 = tpu.matmul %372, %356, %cst_115 {dimension_numbers = #tpu.dot_dimension_numbers<[1], [0], [0], [1], [0, 0, 1, 1], [], []>} : vector<32x32xbf16>, vector<32x8xbf16>, vector<32x8xf32> -> vector<32x8xf32>
    %374 = vector.extract_strided_slice %350 {offsets = [0, 8], sizes = [32, 8], strides = [1, 1]} : vector<32x96xf32> to vector<32x8xf32>
    %375 = arith.truncf %374 : vector<32x8xf32> to vector<32x8xbf16>
    %376 = vector.extract_strided_slice %350 {offsets = [0, 40], sizes = [32, 8], strides = [1, 1]} : vector<32x96xf32> to vector<32x8xf32>
    %377 = arith.truncf %376 : vector<32x8xf32> to vector<32x8xbf16>
    %378 = vector.extract_strided_slice %350 {offsets = [0, 72], sizes = [32, 8], strides = [1, 1]} : vector<32x96xf32> to vector<32x8xf32>
    %379 = arith.truncf %378 : vector<32x8xf32> to vector<32x8xbf16>
    %cst_116 = arith.constant dense<0.000000e+00> : vector<32x32xf32>
    %380 = tpu.matmul %375, %377, %cst_116 {dimension_numbers = #tpu.dot_dimension_numbers<[1], [1], [0], [0], [0, 0, 1, 0], [], []>} : vector<32x8xbf16>, vector<32x8xbf16>, vector<32x32xf32> -> vector<32x32xf32>
    %cst_117 = arith.constant -1.000000e+30 : f32
    %381 = vector.shape_cast %7 : vector<1x32xi1> to vector<1x32xi1>
    %382 = vector.broadcast %381 : vector<1x32xi1> to vector<32x32xi1>
    %383 = vector.broadcast %cst_117 : f32 to vector<32x32xf32>
    %384 = arith.select %382, %380, %383 : vector<32x32xi1>, vector<32x32xf32>
    %cst_118 = arith.constant dense<0xFF800000> : vector<32xf32>
    %385 = vector.multi_reduction <maximumf>, %384, %cst_118 [1] : vector<32x32xf32> to vector<32xf32>
    %386 = vector.shape_cast %385 : vector<32xf32> to vector<32x1xf32>
    %387 = vector.broadcast %386 : vector<32x1xf32> to vector<32x32xf32>
    %388 = arith.subf %384, %387 : vector<32x32xf32>
    %389 = math.exp %388 : vector<32x32xf32>
    %cst_119 = arith.constant dense<0.000000e+00> : vector<32xf32>
    %390 = vector.multi_reduction <add>, %389, %cst_119 [1] : vector<32x32xf32> to vector<32xf32>
    %391 = vector.shape_cast %390 : vector<32xf32> to vector<32x1xf32>
    %392 = tpu.reciprocal %391 {approx = true} : vector<32x1xf32> -> vector<32x1xf32>
    %393 = vector.broadcast %392 : vector<32x1xf32> to vector<32x32xf32>
    %394 = arith.mulf %389, %393 : vector<32x32xf32>
    %395 = arith.truncf %394 : vector<32x32xf32> to vector<32x32xbf16>
    %cst_120 = arith.constant dense<0.000000e+00> : vector<32x8xf32>
    %396 = tpu.matmul %395, %379, %cst_120 {dimension_numbers = #tpu.dot_dimension_numbers<[1], [0], [0], [1], [0, 0, 1, 1], [], []>} : vector<32x32xbf16>, vector<32x8xbf16>, vector<32x8xf32> -> vector<32x8xf32>
    %397 = vector.extract_strided_slice %350 {offsets = [0, 16], sizes = [32, 8], strides = [1, 1]} : vector<32x96xf32> to vector<32x8xf32>
    %398 = arith.truncf %397 : vector<32x8xf32> to vector<32x8xbf16>
    %399 = vector.extract_strided_slice %350 {offsets = [0, 48], sizes = [32, 8], strides = [1, 1]} : vector<32x96xf32> to vector<32x8xf32>
    %400 = arith.truncf %399 : vector<32x8xf32> to vector<32x8xbf16>
    %401 = vector.extract_strided_slice %350 {offsets = [0, 80], sizes = [32, 8], strides = [1, 1]} : vector<32x96xf32> to vector<32x8xf32>
    %402 = arith.truncf %401 : vector<32x8xf32> to vector<32x8xbf16>
    %cst_121 = arith.constant dense<0.000000e+00> : vector<32x32xf32>
    %403 = tpu.matmul %398, %400, %cst_121 {dimension_numbers = #tpu.dot_dimension_numbers<[1], [1], [0], [0], [0, 0, 1, 0], [], []>} : vector<32x8xbf16>, vector<32x8xbf16>, vector<32x32xf32> -> vector<32x32xf32>
    %cst_122 = arith.constant -1.000000e+30 : f32
    %404 = vector.shape_cast %7 : vector<1x32xi1> to vector<1x32xi1>
    %405 = vector.broadcast %404 : vector<1x32xi1> to vector<32x32xi1>
    %406 = vector.broadcast %cst_122 : f32 to vector<32x32xf32>
    %407 = arith.select %405, %403, %406 : vector<32x32xi1>, vector<32x32xf32>
    %cst_123 = arith.constant dense<0xFF800000> : vector<32xf32>
    %408 = vector.multi_reduction <maximumf>, %407, %cst_123 [1] : vector<32x32xf32> to vector<32xf32>
    %409 = vector.shape_cast %408 : vector<32xf32> to vector<32x1xf32>
    %410 = vector.broadcast %409 : vector<32x1xf32> to vector<32x32xf32>
    %411 = arith.subf %407, %410 : vector<32x32xf32>
    %412 = math.exp %411 : vector<32x32xf32>
    %cst_124 = arith.constant dense<0.000000e+00> : vector<32xf32>
    %413 = vector.multi_reduction <add>, %412, %cst_124 [1] : vector<32x32xf32> to vector<32xf32>
    %414 = vector.shape_cast %413 : vector<32xf32> to vector<32x1xf32>
    %415 = tpu.reciprocal %414 {approx = true} : vector<32x1xf32> -> vector<32x1xf32>
    %416 = vector.broadcast %415 : vector<32x1xf32> to vector<32x32xf32>
    %417 = arith.mulf %412, %416 : vector<32x32xf32>
    %418 = arith.truncf %417 : vector<32x32xf32> to vector<32x32xbf16>
    %cst_125 = arith.constant dense<0.000000e+00> : vector<32x8xf32>
    %419 = tpu.matmul %418, %402, %cst_125 {dimension_numbers = #tpu.dot_dimension_numbers<[1], [0], [0], [1], [0, 0, 1, 1], [], []>} : vector<32x32xbf16>, vector<32x8xbf16>, vector<32x8xf32> -> vector<32x8xf32>
    %420 = vector.extract_strided_slice %350 {offsets = [0, 24], sizes = [32, 8], strides = [1, 1]} : vector<32x96xf32> to vector<32x8xf32>
    %421 = arith.truncf %420 : vector<32x8xf32> to vector<32x8xbf16>
    %422 = vector.extract_strided_slice %350 {offsets = [0, 56], sizes = [32, 8], strides = [1, 1]} : vector<32x96xf32> to vector<32x8xf32>
    %423 = arith.truncf %422 : vector<32x8xf32> to vector<32x8xbf16>
    %424 = vector.extract_strided_slice %350 {offsets = [0, 88], sizes = [32, 8], strides = [1, 1]} : vector<32x96xf32> to vector<32x8xf32>
    %425 = arith.truncf %424 : vector<32x8xf32> to vector<32x8xbf16>
    %cst_126 = arith.constant dense<0.000000e+00> : vector<32x32xf32>
    %426 = tpu.matmul %421, %423, %cst_126 {dimension_numbers = #tpu.dot_dimension_numbers<[1], [1], [0], [0], [0, 0, 1, 0], [], []>} : vector<32x8xbf16>, vector<32x8xbf16>, vector<32x32xf32> -> vector<32x32xf32>
    %cst_127 = arith.constant -1.000000e+30 : f32
    %427 = vector.shape_cast %7 : vector<1x32xi1> to vector<1x32xi1>
    %428 = vector.broadcast %427 : vector<1x32xi1> to vector<32x32xi1>
    %429 = vector.broadcast %cst_127 : f32 to vector<32x32xf32>
    %430 = arith.select %428, %426, %429 : vector<32x32xi1>, vector<32x32xf32>
    %cst_128 = arith.constant dense<0xFF800000> : vector<32xf32>
    %431 = vector.multi_reduction <maximumf>, %430, %cst_128 [1] : vector<32x32xf32> to vector<32xf32>
    %432 = vector.shape_cast %431 : vector<32xf32> to vector<32x1xf32>
    %433 = vector.broadcast %432 : vector<32x1xf32> to vector<32x32xf32>
    %434 = arith.subf %430, %433 : vector<32x32xf32>
    %435 = math.exp %434 : vector<32x32xf32>
    %cst_129 = arith.constant dense<0.000000e+00> : vector<32xf32>
    %436 = vector.multi_reduction <add>, %435, %cst_129 [1] : vector<32x32xf32> to vector<32xf32>
    %437 = vector.shape_cast %436 : vector<32xf32> to vector<32x1xf32>
    %438 = tpu.reciprocal %437 {approx = true} : vector<32x1xf32> -> vector<32x1xf32>
    %439 = vector.broadcast %438 : vector<32x1xf32> to vector<32x32xf32>
    %440 = arith.mulf %435, %439 : vector<32x32xf32>
    %441 = arith.truncf %440 : vector<32x32xf32> to vector<32x32xbf16>
    %cst_130 = arith.constant dense<0.000000e+00> : vector<32x8xf32>
    %442 = tpu.matmul %441, %425, %cst_130 {dimension_numbers = #tpu.dot_dimension_numbers<[1], [0], [0], [1], [0, 0, 1, 1], [], []>} : vector<32x32xbf16>, vector<32x8xbf16>, vector<32x8xf32> -> vector<32x8xf32>
    %443 = tpu.concatenate %373, %396, %419, %442 in 1 : vector<32x8xf32>, vector<32x8xf32>, vector<32x8xf32>, vector<32x8xf32> -> vector<32x32xf32>
    %444 = vector.extract_strided_slice %349 {offsets = [32, 0], sizes = [32, 96], strides = [1, 1]} : vector<64x96xf32> to vector<32x96xf32>
    %445 = vector.extract_strided_slice %444 {offsets = [0, 0], sizes = [32, 8], strides = [1, 1]} : vector<32x96xf32> to vector<32x8xf32>
    %446 = arith.truncf %445 : vector<32x8xf32> to vector<32x8xbf16>
    %447 = vector.extract_strided_slice %444 {offsets = [0, 32], sizes = [32, 8], strides = [1, 1]} : vector<32x96xf32> to vector<32x8xf32>
    %448 = arith.truncf %447 : vector<32x8xf32> to vector<32x8xbf16>
    %449 = vector.extract_strided_slice %444 {offsets = [0, 64], sizes = [32, 8], strides = [1, 1]} : vector<32x96xf32> to vector<32x8xf32>
    %450 = arith.truncf %449 : vector<32x8xf32> to vector<32x8xbf16>
    %cst_131 = arith.constant dense<0.000000e+00> : vector<32x32xf32>
    %451 = tpu.matmul %446, %448, %cst_131 {dimension_numbers = #tpu.dot_dimension_numbers<[1], [1], [0], [0], [0, 0, 1, 0], [], []>} : vector<32x8xbf16>, vector<32x8xbf16>, vector<32x32xf32> -> vector<32x32xf32>
    %cst_132 = arith.constant -1.000000e+30 : f32
    %452 = vector.shape_cast %7 : vector<1x32xi1> to vector<1x32xi1>
    %453 = vector.broadcast %452 : vector<1x32xi1> to vector<32x32xi1>
    %454 = vector.broadcast %cst_132 : f32 to vector<32x32xf32>
    %455 = arith.select %453, %451, %454 : vector<32x32xi1>, vector<32x32xf32>
    %cst_133 = arith.constant dense<0xFF800000> : vector<32xf32>
    %456 = vector.multi_reduction <maximumf>, %455, %cst_133 [1] : vector<32x32xf32> to vector<32xf32>
    %457 = vector.shape_cast %456 : vector<32xf32> to vector<32x1xf32>
    %458 = vector.broadcast %457 : vector<32x1xf32> to vector<32x32xf32>
    %459 = arith.subf %455, %458 : vector<32x32xf32>
    %460 = math.exp %459 : vector<32x32xf32>
    %cst_134 = arith.constant dense<0.000000e+00> : vector<32xf32>
    %461 = vector.multi_reduction <add>, %460, %cst_134 [1] : vector<32x32xf32> to vector<32xf32>
    %462 = vector.shape_cast %461 : vector<32xf32> to vector<32x1xf32>
    %463 = tpu.reciprocal %462 {approx = true} : vector<32x1xf32> -> vector<32x1xf32>
    %464 = vector.broadcast %463 : vector<32x1xf32> to vector<32x32xf32>
    %465 = arith.mulf %460, %464 : vector<32x32xf32>
    %466 = arith.truncf %465 : vector<32x32xf32> to vector<32x32xbf16>
    %cst_135 = arith.constant dense<0.000000e+00> : vector<32x8xf32>
    %467 = tpu.matmul %466, %450, %cst_135 {dimension_numbers = #tpu.dot_dimension_numbers<[1], [0], [0], [1], [0, 0, 1, 1], [], []>} : vector<32x32xbf16>, vector<32x8xbf16>, vector<32x8xf32> -> vector<32x8xf32>
    %468 = vector.extract_strided_slice %444 {offsets = [0, 8], sizes = [32, 8], strides = [1, 1]} : vector<32x96xf32> to vector<32x8xf32>
    %469 = arith.truncf %468 : vector<32x8xf32> to vector<32x8xbf16>
    %470 = vector.extract_strided_slice %444 {offsets = [0, 40], sizes = [32, 8], strides = [1, 1]} : vector<32x96xf32> to vector<32x8xf32>
    %471 = arith.truncf %470 : vector<32x8xf32> to vector<32x8xbf16>
    %472 = vector.extract_strided_slice %444 {offsets = [0, 72], sizes = [32, 8], strides = [1, 1]} : vector<32x96xf32> to vector<32x8xf32>
    %473 = arith.truncf %472 : vector<32x8xf32> to vector<32x8xbf16>
    %cst_136 = arith.constant dense<0.000000e+00> : vector<32x32xf32>
    %474 = tpu.matmul %469, %471, %cst_136 {dimension_numbers = #tpu.dot_dimension_numbers<[1], [1], [0], [0], [0, 0, 1, 0], [], []>} : vector<32x8xbf16>, vector<32x8xbf16>, vector<32x32xf32> -> vector<32x32xf32>
    %cst_137 = arith.constant -1.000000e+30 : f32
    %475 = vector.shape_cast %7 : vector<1x32xi1> to vector<1x32xi1>
    %476 = vector.broadcast %475 : vector<1x32xi1> to vector<32x32xi1>
    %477 = vector.broadcast %cst_137 : f32 to vector<32x32xf32>
    %478 = arith.select %476, %474, %477 : vector<32x32xi1>, vector<32x32xf32>
    %cst_138 = arith.constant dense<0xFF800000> : vector<32xf32>
    %479 = vector.multi_reduction <maximumf>, %478, %cst_138 [1] : vector<32x32xf32> to vector<32xf32>
    %480 = vector.shape_cast %479 : vector<32xf32> to vector<32x1xf32>
    %481 = vector.broadcast %480 : vector<32x1xf32> to vector<32x32xf32>
    %482 = arith.subf %478, %481 : vector<32x32xf32>
    %483 = math.exp %482 : vector<32x32xf32>
    %cst_139 = arith.constant dense<0.000000e+00> : vector<32xf32>
    %484 = vector.multi_reduction <add>, %483, %cst_139 [1] : vector<32x32xf32> to vector<32xf32>
    %485 = vector.shape_cast %484 : vector<32xf32> to vector<32x1xf32>
    %486 = tpu.reciprocal %485 {approx = true} : vector<32x1xf32> -> vector<32x1xf32>
    %487 = vector.broadcast %486 : vector<32x1xf32> to vector<32x32xf32>
    %488 = arith.mulf %483, %487 : vector<32x32xf32>
    %489 = arith.truncf %488 : vector<32x32xf32> to vector<32x32xbf16>
    %cst_140 = arith.constant dense<0.000000e+00> : vector<32x8xf32>
    %490 = tpu.matmul %489, %473, %cst_140 {dimension_numbers = #tpu.dot_dimension_numbers<[1], [0], [0], [1], [0, 0, 1, 1], [], []>} : vector<32x32xbf16>, vector<32x8xbf16>, vector<32x8xf32> -> vector<32x8xf32>
    %491 = vector.extract_strided_slice %444 {offsets = [0, 16], sizes = [32, 8], strides = [1, 1]} : vector<32x96xf32> to vector<32x8xf32>
    %492 = arith.truncf %491 : vector<32x8xf32> to vector<32x8xbf16>
    %493 = vector.extract_strided_slice %444 {offsets = [0, 48], sizes = [32, 8], strides = [1, 1]} : vector<32x96xf32> to vector<32x8xf32>
    %494 = arith.truncf %493 : vector<32x8xf32> to vector<32x8xbf16>
    %495 = vector.extract_strided_slice %444 {offsets = [0, 80], sizes = [32, 8], strides = [1, 1]} : vector<32x96xf32> to vector<32x8xf32>
    %496 = arith.truncf %495 : vector<32x8xf32> to vector<32x8xbf16>
    %cst_141 = arith.constant dense<0.000000e+00> : vector<32x32xf32>
    %497 = tpu.matmul %492, %494, %cst_141 {dimension_numbers = #tpu.dot_dimension_numbers<[1], [1], [0], [0], [0, 0, 1, 0], [], []>} : vector<32x8xbf16>, vector<32x8xbf16>, vector<32x32xf32> -> vector<32x32xf32>
    %cst_142 = arith.constant -1.000000e+30 : f32
    %498 = vector.shape_cast %7 : vector<1x32xi1> to vector<1x32xi1>
    %499 = vector.broadcast %498 : vector<1x32xi1> to vector<32x32xi1>
    %500 = vector.broadcast %cst_142 : f32 to vector<32x32xf32>
    %501 = arith.select %499, %497, %500 : vector<32x32xi1>, vector<32x32xf32>
    %cst_143 = arith.constant dense<0xFF800000> : vector<32xf32>
    %502 = vector.multi_reduction <maximumf>, %501, %cst_143 [1] : vector<32x32xf32> to vector<32xf32>
    %503 = vector.shape_cast %502 : vector<32xf32> to vector<32x1xf32>
    %504 = vector.broadcast %503 : vector<32x1xf32> to vector<32x32xf32>
    %505 = arith.subf %501, %504 : vector<32x32xf32>
    %506 = math.exp %505 : vector<32x32xf32>
    %cst_144 = arith.constant dense<0.000000e+00> : vector<32xf32>
    %507 = vector.multi_reduction <add>, %506, %cst_144 [1] : vector<32x32xf32> to vector<32xf32>
    %508 = vector.shape_cast %507 : vector<32xf32> to vector<32x1xf32>
    %509 = tpu.reciprocal %508 {approx = true} : vector<32x1xf32> -> vector<32x1xf32>
    %510 = vector.broadcast %509 : vector<32x1xf32> to vector<32x32xf32>
    %511 = arith.mulf %506, %510 : vector<32x32xf32>
    %512 = arith.truncf %511 : vector<32x32xf32> to vector<32x32xbf16>
    %cst_145 = arith.constant dense<0.000000e+00> : vector<32x8xf32>
    %513 = tpu.matmul %512, %496, %cst_145 {dimension_numbers = #tpu.dot_dimension_numbers<[1], [0], [0], [1], [0, 0, 1, 1], [], []>} : vector<32x32xbf16>, vector<32x8xbf16>, vector<32x8xf32> -> vector<32x8xf32>
    %514 = vector.extract_strided_slice %444 {offsets = [0, 24], sizes = [32, 8], strides = [1, 1]} : vector<32x96xf32> to vector<32x8xf32>
    %515 = arith.truncf %514 : vector<32x8xf32> to vector<32x8xbf16>
    %516 = vector.extract_strided_slice %444 {offsets = [0, 56], sizes = [32, 8], strides = [1, 1]} : vector<32x96xf32> to vector<32x8xf32>
    %517 = arith.truncf %516 : vector<32x8xf32> to vector<32x8xbf16>
    %518 = vector.extract_strided_slice %444 {offsets = [0, 88], sizes = [32, 8], strides = [1, 1]} : vector<32x96xf32> to vector<32x8xf32>
    %519 = arith.truncf %518 : vector<32x8xf32> to vector<32x8xbf16>
    %cst_146 = arith.constant dense<0.000000e+00> : vector<32x32xf32>
    %520 = tpu.matmul %515, %517, %cst_146 {dimension_numbers = #tpu.dot_dimension_numbers<[1], [1], [0], [0], [0, 0, 1, 0], [], []>} : vector<32x8xbf16>, vector<32x8xbf16>, vector<32x32xf32> -> vector<32x32xf32>
    %cst_147 = arith.constant -1.000000e+30 : f32
    %521 = vector.shape_cast %7 : vector<1x32xi1> to vector<1x32xi1>
    %522 = vector.broadcast %521 : vector<1x32xi1> to vector<32x32xi1>
    %523 = vector.broadcast %cst_147 : f32 to vector<32x32xf32>
    %524 = arith.select %522, %520, %523 : vector<32x32xi1>, vector<32x32xf32>
    %cst_148 = arith.constant dense<0xFF800000> : vector<32xf32>
    %525 = vector.multi_reduction <maximumf>, %524, %cst_148 [1] : vector<32x32xf32> to vector<32xf32>
    %526 = vector.shape_cast %525 : vector<32xf32> to vector<32x1xf32>
    %527 = vector.broadcast %526 : vector<32x1xf32> to vector<32x32xf32>
    %528 = arith.subf %524, %527 : vector<32x32xf32>
    %529 = math.exp %528 : vector<32x32xf32>
    %cst_149 = arith.constant dense<0.000000e+00> : vector<32xf32>
    %530 = vector.multi_reduction <add>, %529, %cst_149 [1] : vector<32x32xf32> to vector<32xf32>
    %531 = vector.shape_cast %530 : vector<32xf32> to vector<32x1xf32>
    %532 = tpu.reciprocal %531 {approx = true} : vector<32x1xf32> -> vector<32x1xf32>
    %533 = vector.broadcast %532 : vector<32x1xf32> to vector<32x32xf32>
    %534 = arith.mulf %529, %533 : vector<32x32xf32>
    %535 = arith.truncf %534 : vector<32x32xf32> to vector<32x32xbf16>
    %cst_150 = arith.constant dense<0.000000e+00> : vector<32x8xf32>
    %536 = tpu.matmul %535, %519, %cst_150 {dimension_numbers = #tpu.dot_dimension_numbers<[1], [0], [0], [1], [0, 0, 1, 1], [], []>} : vector<32x32xbf16>, vector<32x8xbf16>, vector<32x8xf32> -> vector<32x8xf32>
    %537 = tpu.concatenate %467, %490, %513, %536 in 1 : vector<32x8xf32>, vector<32x8xf32>, vector<32x8xf32>, vector<32x8xf32> -> vector<32x32xf32>
    %538 = tpu.concatenate %443, %537 in 0 : vector<32x32xf32>, vector<32x32xf32> -> vector<64x32xf32>
    %539 = arith.truncf %538 : vector<64x32xf32> to vector<64x32xbf16>
    %c1_151 = arith.constant 1 : index
    %c0_152 = arith.constant 0 : index
    %c0_153 = arith.constant 0 : index
    %540 = vector.load %arg5[%c1_151, %c0_152, %c0_153] : memref<2x32x32xbf16, #tpu.memory_space<vmem>>, vector<1x32x32xbf16>
    %541 = vector.shape_cast %540 : vector<1x32x32xbf16> to vector<32x32xbf16>
    %cst_154 = arith.constant dense<0.000000e+00> : vector<64x32xf32>
    %542 = tpu.matmul %539, %541, %cst_154 {dimension_numbers = #tpu.dot_dimension_numbers<[1], [0], [0], [1], [0, 0, 1, 1], [], []>} : vector<64x32xbf16>, vector<32x32xbf16>, vector<64x32xf32> -> vector<64x32xf32>
    %543 = arith.addf %313, %542 : vector<64x32xf32>
    %544 = vector.broadcast %318 : vector<1x32xf32> to vector<64x32xf32>
    %545 = arith.addf %543, %544 : vector<64x32xf32>
    %cst_155 = arith.constant dense<0.000000e+00> : vector<64xf32>
    %546 = vector.multi_reduction <add>, %545, %cst_155 [1] : vector<64x32xf32> to vector<64xf32>
    %547 = vector.shape_cast %546 : vector<64xf32> to vector<64x1xf32>
    %cst_156 = arith.constant 3.200000e+01 : f32
    %548 = vector.broadcast %cst_156 : f32 to vector<64x1xf32>
    %549 = arith.divf %547, %548 : vector<64x1xf32>
    %550 = vector.broadcast %549 : vector<64x1xf32> to vector<64x32xf32>
    %551 = arith.subf %545, %550 : vector<64x32xf32>
    %552 = arith.mulf %551, %551 : vector<64x32xf32>
    %cst_157 = arith.constant dense<0.000000e+00> : vector<64xf32>
    %553 = vector.multi_reduction <add>, %552, %cst_157 [1] : vector<64x32xf32> to vector<64xf32>
    %554 = vector.shape_cast %553 : vector<64xf32> to vector<64x1xf32>
    %cst_158 = arith.constant 3.200000e+01 : f32
    %555 = vector.broadcast %cst_158 : f32 to vector<64x1xf32>
    %556 = arith.divf %554, %555 : vector<64x1xf32>
    %557 = vector.broadcast %549 : vector<64x1xf32> to vector<64x32xf32>
    %558 = arith.subf %545, %557 : vector<64x32xf32>
    %cst_159 = arith.constant 9.99999974E-6 : f32
    %559 = vector.broadcast %cst_159 : f32 to vector<64x1xf32>
    %560 = arith.addf %556, %559 : vector<64x1xf32>
    %561 = math.rsqrt %560 : vector<64x1xf32>
    %562 = vector.broadcast %561 : vector<64x1xf32> to vector<64x32xf32>
    %563 = arith.mulf %558, %562 : vector<64x32xf32>
    %564 = vector.broadcast %316 : vector<1x32xf32> to vector<64x32xf32>
    %565 = arith.mulf %563, %564 : vector<64x32xf32>
    %566 = vector.broadcast %317 : vector<1x32xf32> to vector<64x32xf32>
    %567 = arith.addf %565, %566 : vector<64x32xf32>
    %568 = arith.truncf %567 : vector<64x32xf32> to vector<64x32xbf16>
    %c1_160 = arith.constant 1 : index
    %c0_161 = arith.constant 0 : index
    %c0_162 = arith.constant 0 : index
    %569 = vector.load %arg6[%c1_160, %c0_161, %c0_162] : memref<2x32x64xbf16, #tpu.memory_space<vmem>>, vector<1x32x64xbf16>
    %570 = vector.shape_cast %569 : vector<1x32x64xbf16> to vector<32x64xbf16>
    %cst_163 = arith.constant dense<0.000000e+00> : vector<64x64xf32>
    %571 = tpu.matmul %568, %570, %cst_163 {dimension_numbers = #tpu.dot_dimension_numbers<[1], [0], [0], [1], [0, 0, 1, 1], [], []>} : vector<64x32xbf16>, vector<32x64xbf16>, vector<64x64xf32> -> vector<64x64xf32>
    %572 = vector.broadcast %320 : vector<1x64xf32> to vector<64x64xf32>
    %573 = arith.addf %571, %572 : vector<64x64xf32>
    %cst_164 = arith.constant 5.000000e-01 : f32
    %574 = vector.broadcast %cst_164 : f32 to vector<64x64xf32>
    %575 = arith.mulf %574, %573 : vector<64x64xf32>
    %cst_165 = arith.constant 0.707106769 : f32
    %576 = vector.broadcast %cst_165 : f32 to vector<64x64xf32>
    %577 = arith.mulf %573, %576 : vector<64x64xf32>
    %578 = math.absf %577 : vector<64x64xf32>
    %cst_166 = arith.constant 0.327591091 : f32
    %579 = vector.broadcast %cst_166 : f32 to vector<64x64xf32>
    %580 = arith.mulf %579, %578 : vector<64x64xf32>
    %cst_167 = arith.constant 1.000000e+00 : f32
    %581 = vector.broadcast %cst_167 : f32 to vector<64x64xf32>
    %582 = arith.addf %581, %580 : vector<64x64xf32>
    %583 = tpu.reciprocal %582 {approx = true} : vector<64x64xf32> -> vector<64x64xf32>
    %cst_168 = arith.constant 1.06140542 : f32
    %584 = vector.broadcast %cst_168 : f32 to vector<64x64xf32>
    %585 = arith.mulf %584, %583 : vector<64x64xf32>
    %cst_169 = arith.constant -1.45315206 : f32
    %586 = vector.broadcast %cst_169 : f32 to vector<64x64xf32>
    %587 = arith.addf %585, %586 : vector<64x64xf32>
    %588 = arith.mulf %587, %583 : vector<64x64xf32>
    %cst_170 = arith.constant 1.42141378 : f32
    %589 = vector.broadcast %cst_170 : f32 to vector<64x64xf32>
    %590 = arith.addf %588, %589 : vector<64x64xf32>
    %591 = arith.mulf %590, %583 : vector<64x64xf32>
    %cst_171 = arith.constant -0.284496725 : f32
    %592 = vector.broadcast %cst_171 : f32 to vector<64x64xf32>
    %593 = arith.addf %591, %592 : vector<64x64xf32>
    %594 = arith.mulf %593, %583 : vector<64x64xf32>
    %cst_172 = arith.constant 0.254829586 : f32
    %595 = vector.broadcast %cst_172 : f32 to vector<64x64xf32>
    %596 = arith.addf %594, %595 : vector<64x64xf32>
    %597 = arith.mulf %596, %583 : vector<64x64xf32>
    %cst_173 = arith.constant 0.000000e+00 : f32
    %598 = vector.broadcast %cst_173 : f32 to vector<64x64xf32>
    %599 = arith.subf %598, %578 : vector<64x64xf32>
    %600 = arith.mulf %599, %578 : vector<64x64xf32>
    %601 = math.exp %600 : vector<64x64xf32>
    %602 = arith.mulf %597, %601 : vector<64x64xf32>
    %cst_174 = arith.constant 1.000000e+00 : f32
    %603 = vector.broadcast %cst_174 : f32 to vector<64x64xf32>
    %604 = arith.subf %603, %602 : vector<64x64xf32>
    %cst_175 = arith.constant 0.000000e+00 : f32
    %605 = vector.broadcast %cst_175 : f32 to vector<64x64xf32>
    %606 = arith.cmpf oge, %577, %605 : vector<64x64xf32>
    %cst_176 = arith.constant 0.000000e+00 : f32
    %607 = vector.broadcast %cst_176 : f32 to vector<64x64xf32>
    %608 = arith.subf %607, %604 : vector<64x64xf32>
    %609 = arith.select %606, %604, %608 : vector<64x64xi1>, vector<64x64xf32>
    %cst_177 = arith.constant 1.000000e+00 : f32
    %610 = vector.broadcast %cst_177 : f32 to vector<64x64xf32>
    %611 = arith.addf %610, %609 : vector<64x64xf32>
    %612 = arith.mulf %575, %611 : vector<64x64xf32>
    %613 = arith.truncf %612 : vector<64x64xf32> to vector<64x64xbf16>
    %c1_178 = arith.constant 1 : index
    %c0_179 = arith.constant 0 : index
    %c0_180 = arith.constant 0 : index
    %614 = vector.load %arg7[%c1_178, %c0_179, %c0_180] : memref<2x64x32xbf16, #tpu.memory_space<vmem>>, vector<1x64x32xbf16>
    %615 = vector.shape_cast %614 : vector<1x64x32xbf16> to vector<64x32xbf16>
    %cst_181 = arith.constant dense<0.000000e+00> : vector<64x32xf32>
    %616 = tpu.matmul %613, %615, %cst_181 {dimension_numbers = #tpu.dot_dimension_numbers<[1], [0], [0], [1], [0, 0, 1, 1], [], []>} : vector<64x64xbf16>, vector<64x32xbf16>, vector<64x32xf32> -> vector<64x32xf32>
    %617 = vector.broadcast %319 : vector<1x32xf32> to vector<64x32xf32>
    %618 = arith.addf %616, %617 : vector<64x32xf32>
    %619 = arith.addf %545, %618 : vector<64x32xf32>
    %c16 = arith.constant 16 : index
    %c0_182 = arith.constant 0 : index
    %620 = vector.load %arg8[%c16, %c0_182] : memref<24x128xf32, #tpu.memory_space<vmem>>, vector<1x32xf32>
    %c17 = arith.constant 17 : index
    %c0_183 = arith.constant 0 : index
    %621 = vector.load %arg8[%c17, %c0_183] : memref<24x128xf32, #tpu.memory_space<vmem>>, vector<1x32xf32>
    %c18 = arith.constant 18 : index
    %c0_184 = arith.constant 0 : index
    %622 = vector.load %arg8[%c18, %c0_184] : memref<24x128xf32, #tpu.memory_space<vmem>>, vector<1x128xf32>
    %623 = vector.extract_strided_slice %619 {offsets = [0, 0], sizes = [1, 32], strides = [1, 1]} : vector<64x32xf32> to vector<1x32xf32>
    %624 = vector.extract_strided_slice %619 {offsets = [32, 0], sizes = [1, 32], strides = [1, 1]} : vector<64x32xf32> to vector<1x32xf32>
    %625 = tpu.concatenate %623, %624 in 0 : vector<1x32xf32>, vector<1x32xf32> -> vector<2x32xf32>
    %cst_185 = arith.constant dense<0.000000e+00> : vector<2xf32>
    %626 = vector.multi_reduction <add>, %625, %cst_185 [1] : vector<2x32xf32> to vector<2xf32>
    %627 = vector.shape_cast %626 : vector<2xf32> to vector<2x1xf32>
    %cst_186 = arith.constant 3.200000e+01 : f32
    %628 = vector.broadcast %cst_186 : f32 to vector<2x1xf32>
    %629 = arith.divf %627, %628 : vector<2x1xf32>
    %630 = vector.broadcast %629 : vector<2x1xf32> to vector<2x32xf32>
    %631 = arith.subf %625, %630 : vector<2x32xf32>
    %632 = arith.mulf %631, %631 : vector<2x32xf32>
    %cst_187 = arith.constant dense<0.000000e+00> : vector<2xf32>
    %633 = vector.multi_reduction <add>, %632, %cst_187 [1] : vector<2x32xf32> to vector<2xf32>
    %634 = vector.shape_cast %633 : vector<2xf32> to vector<2x1xf32>
    %cst_188 = arith.constant 3.200000e+01 : f32
    %635 = vector.broadcast %cst_188 : f32 to vector<2x1xf32>
    %636 = arith.divf %634, %635 : vector<2x1xf32>
    %637 = vector.broadcast %629 : vector<2x1xf32> to vector<2x32xf32>
    %638 = arith.subf %625, %637 : vector<2x32xf32>
    %cst_189 = arith.constant 9.99999974E-6 : f32
    %639 = vector.broadcast %cst_189 : f32 to vector<2x1xf32>
    %640 = arith.addf %636, %639 : vector<2x1xf32>
    %641 = math.rsqrt %640 : vector<2x1xf32>
    %642 = vector.broadcast %641 : vector<2x1xf32> to vector<2x32xf32>
    %643 = arith.mulf %638, %642 : vector<2x32xf32>
    %644 = vector.broadcast %620 : vector<1x32xf32> to vector<2x32xf32>
    %645 = arith.mulf %643, %644 : vector<2x32xf32>
    %646 = vector.broadcast %621 : vector<1x32xf32> to vector<2x32xf32>
    %647 = arith.addf %645, %646 : vector<2x32xf32>
    %648 = arith.truncf %647 : vector<2x32xf32> to vector<2x32xbf16>
    %c0_190 = arith.constant 0 : index
    %c0_191 = arith.constant 0 : index
    %649 = vector.load %arg9[%c0_190, %c0_191] : memref<32x128xbf16, #tpu.memory_space<vmem>>, vector<32x128xbf16>
    %cst_192 = arith.constant dense<0.000000e+00> : vector<2x128xf32>
    %650 = tpu.matmul %648, %649, %cst_192 {dimension_numbers = #tpu.dot_dimension_numbers<[1], [0], [0], [1], [0, 0, 1, 1], [], []>} : vector<2x32xbf16>, vector<32x128xbf16>, vector<2x128xf32> -> vector<2x128xf32>
    %651 = vector.broadcast %622 : vector<1x128xf32> to vector<2x128xf32>
    %652 = arith.addf %650, %651 : vector<2x128xf32>
    %c0_193 = arith.constant 0 : index
    %c0_194 = arith.constant 0 : index
    %653 = vector.load %arg10[%c0_193, %c0_194] : memref<2x128xf32, #tpu.memory_space<vmem>>, vector<2x128xf32>
    tpu.vector_store %arg10[%c0_193, %c0_194], %652 {strides = array<i32>} : memref<2x128xf32, #tpu.memory_space<vmem>>, vector<2x128xf32>,
    return
  }
  func.func @transform_0(%arg0: i32) -> (i32, i32) {
    %c0_i32 = arith.constant 0 : i32
    %c0_i32_0 = arith.constant 0 : i32
    %c0_i32_1 = arith.constant 0 : i32
    return %c0_i32, %c0_i32_0 : i32, i32
  }
  func.func @transform_1(%arg0: i32) -> (i32, i32) {
    %c0_i32 = arith.constant 0 : i32
    %c0_i32_0 = arith.constant 0 : i32
    %c0_i32_1 = arith.constant 0 : i32
    return %c0_i32, %c0_i32_0 : i32, i32
  }
  func.func @transform_2(%arg0: i32) -> (i32, i32) {
    %c0_i32 = arith.constant 0 : i32
    %c0_i32_0 = arith.constant 0 : i32
    %c0_i32_1 = arith.constant 0 : i32
    return %c0_i32, %c0_i32_0 : i32, i32
  }
  func.func @transform_3(%arg0: i32) -> (i32, i32, i32) {
    %c0_i32 = arith.constant 0 : i32
    %c0_i32_0 = arith.constant 0 : i32
    %c0_i32_1 = arith.constant 0 : i32
    %c0_i32_2 = arith.constant 0 : i32
    return %c0_i32, %c0_i32_0, %c0_i32_1 : i32, i32, i32
  }
  func.func @transform_4(%arg0: i32) -> (i32, i32, i32) {
    %c0_i32 = arith.constant 0 : i32
    %c0_i32_0 = arith.constant 0 : i32
    %c0_i32_1 = arith.constant 0 : i32
    %c0_i32_2 = arith.constant 0 : i32
    return %c0_i32, %c0_i32_0, %c0_i32_1 : i32, i32, i32
  }
  func.func @transform_5(%arg0: i32) -> (i32, i32, i32) {
    %c0_i32 = arith.constant 0 : i32
    %c0_i32_0 = arith.constant 0 : i32
    %c0_i32_1 = arith.constant 0 : i32
    %c0_i32_2 = arith.constant 0 : i32
    return %c0_i32, %c0_i32_0, %c0_i32_1 : i32, i32, i32
  }
  func.func @transform_6(%arg0: i32) -> (i32, i32, i32) {
    %c0_i32 = arith.constant 0 : i32
    %c0_i32_0 = arith.constant 0 : i32
    %c0_i32_1 = arith.constant 0 : i32
    %c0_i32_2 = arith.constant 0 : i32
    return %c0_i32, %c0_i32_0, %c0_i32_1 : i32, i32, i32
  }
  func.func @transform_7(%arg0: i32) -> (i32, i32) {
    %c0_i32 = arith.constant 0 : i32
    %c0_i32_0 = arith.constant 0 : i32
    %c0_i32_1 = arith.constant 0 : i32
    return %c0_i32, %c0_i32_0 : i32, i32
  }
  func.func @transform_8(%arg0: i32) -> (i32, i32) {
    %c0_i32 = arith.constant 0 : i32
    %c0_i32_0 = arith.constant 0 : i32
    %c0_i32_1 = arith.constant 0 : i32
    return %c0_i32, %c0_i32_0 : i32, i32
  }
  func.func @transform_9(%arg0: i32) -> (i32, i32) {
    %c0_i32 = arith.constant 0 : i32
    %c0_i32_0 = arith.constant 0 : i32
    %c0_i32_1 = arith.constant 0 : i32
    return %c0_i32, %c0_i32_0 : i32, i32
  }
}

</mosaic_0001>

<bundles_post_ra>
// kernel: vit_forward.1
= control target key start
LH: loop header
LB: loop body
LE: loop exit
PB: predicated region body
PF: predicated region fallthrough
CT: control target
= control target key end

     0   :  { %vm102_vm0 = vcmask 523264   ;;  %s8391_s0 = inlined_call_operand.vmem [shape: bf16[64,64], index: 0, kind: input, shape index: {}]   ;;  %s8392_s1 = inlined_call_operand.vmem [shape: f32[64,32], index: 1, kind: input, shape index: {}]   ;;  %s8393_s2 = inlined_call_operand.vmem [shape: bf16[64,32], index: 2, kind: input, shape index: {}]   ;;  %s8394_s3 = inlined_call_operand.vmem [shape: bf16[2,32,96], index: 3, kind: input, shape index: {}]   ;;  %s8395_s4 = inlined_call_operand.vmem [shape: bf16[2,32,32], index: 4, kind: input, shape index: {}]   ;;  %s8396_s5 = inlined_call_operand.vmem [shape: bf16[2,32,64], index: 5, kind: input, shape index: {}]   ;;  %s8397_s6 = inlined_call_operand.vmem [shape: bf16[2,64,32], index: 6, kind: input, shape index: {}]   ;;  %s8398_s7 = inlined_call_operand.vmem [shape: f32[24,128], index: 7, kind: input, shape index: {}]   ;;  %s8399_s8 = inlined_call_operand.vmem [shape: bf16[32,128], index: 8, kind: input, shape index: {}]   ;;  %s8400_s9 = inlined_call_operand.hbm [shape: f32[2,128], index: 9, kind: output, shape index: {}]  }
   0x1   :  { %v6159_v0 = vld [vmem:[%s8393_s2] sm:$0xff]   ;;  %v6160_v1 = vld [vmem:[%s8393_s2 + $0x8] sm:$0xff]   ;;  %v6161_v2 = vld [vmem:[%s8393_s2 + $0x10] sm:$0xff]  }
   0x2   :  { %5606 = vmatprep.subr.bf16.mxu0 %v6159_v0  ;;  %v6163_v3 = vld [vmem:[%s8391_s0] sm:$0xff]   ;;  %v6162_v4 = vld [vmem:[%s8393_s2 + $0x18] sm:$0xff]   ;;  %v6164_v5 = vld [vmem:[%s8391_s0 + $0x8] sm:$0xff]  }
   0x3   :  { %5607 = vmatpush3.bf16.msra.mxu0 %v6159_v0  ;;  %5614 = vmatprep.mubr.msk.bf16.mxu0 %vm102_vm0, %v6163_v3  ;;  %v6165_v6 = vld [vmem:[%s8391_s0 + $0x10] sm:$0xff]   ;;  %v6166_v7 = vld [vmem:[%s8391_s0 + $0x18] sm:$0xff]  }
   0x4   :  { %5608 = vmatprep.subr.bf16.mxu0 %v6160_v1 }
   0x7   :  { %5609 = vmatpush3.bf16.msra.mxu0 %v6160_v1 }
   0x8   :  { %5610 = vmatprep.subr.bf16.mxu0 %v6161_v2 }
   0xb   :  { %5611 = vmatpush3.bf16.msra.mxu0 %v6161_v2 }
   0xc   :  { %5612 = vmatprep.subr.bf16.mxu0 %v6162_v4 }
   0xf   :  { %5613 = vmatpush3.bf16.msra.mxu0 %v6162_v4 }
  0x12   :  { %5615 = vmatmul.mubr.msk.bf16.vlgmr.msra.gmra.mrb[0].mxu0 %vm102_vm0, %v6164_v5 }
  0x13   :  { %5618 = vmatprep.mubr.msk.bf16.mxu0 %vm102_vm0, %v6165_v6 }
  0x14   :  { %14 = vsyncpa [#allocation3], 0  ;;  %v52_v8 = vld [vmem:[%s8392_s1 + $0x10] sm:$0xff]  ;;  %v50_v9 = vld [vmem:[%s8392_s1] sm:$0xff]  ;;  %vm191_vm1 = vcmask 261120   ;;  %vm430_vm2 = vcmask 64512  }
  0x15   :  { %v53_v11 = vld [vmem:[%s8392_s1 + $0x18] sm:$0xff]  ;;  %v51_v14 = vld [vmem:[%s8392_s1 + $0x8] sm:$0xff]  ;;  %v54_v39 = vld [vmem:[%s8392_s1 + $0x20] sm:$0xff]  ;;  %s6599_s26 = smov 96   ;;  %s6600_s27 = smov 88   ;;  %vm1197_vm4 = vcmask 130048  }
  0x16   :  { %v56_v46 = vld [vmem:[%s8392_s1 + $0x30] sm:$0xff]  ;;  %v55_v47 = vld [vmem:[%s8392_s1 + $0x28] sm:$0xff]  ;;  %v57_v54 = vld [vmem:[%s8392_s1 + $0x38] sm:$0xff]  ;;  %s6601_s28 = smov 120   ;;  %s6602_s29 = smov 64   ;;  %vm1202_vm5 = vcmask 195584  }
  0x17   :  { %v6167_v60 = vld [vmem:[%s8394_s3] sm:$0xff]   ;;  %v6168_v61 = vld [vmem:[%s8394_s3 + $0x8] sm:$0xff]   ;;  %s6603_s0 = smov 56   ;;  %s6604_s30 = smov 80  }
  0x18   :  { %5622 = vmatprep.subr.bf16.mxu1 %v6167_v60  ;;  %s6605_s10 = smov 112   ;;  %s6606_s11 = smov 48  }
  0x19   :  { %5623 = vmatpush3.bf16.msra.mxu1 %v6167_v60  ;;  %s6607_s12 = smov 72   ;;  %s6608_s13 = smov 104  }
  0x1a   :  { %5619 = vmatmul.mubr.msk.bf16.gmra.mrb[4].mxu0 %vm102_vm0, %v6166_v7  ;;  %5624 = vmatprep.subr.bf16.mxu1 %v6168_v61  ;;  %s6609_s14 = smov 40   ;;  %s6610_s15 = smov 8  }
  0x1b   :  { %s6611_s16 = smov 16   ;;  %s6612_s17 = smov 24  }
  0x1d   :  { %5625 = vmatpush3.bf16.msra.mxu1 %v6168_v61 }
  0xe5   :  { %v5616_v10 = vpop.f32.mrb[0].mxu0 }
  0xe6   :  { %v6703_v12 = vadd.f32 %v5616_v10, %v52_v8  ;;  %v149_v13 = vpop.f32.mrb[1].mxu0 }
  0xe7   :  { %v6708_v15 = vadd.f32 %v149_v13, %v50_v9  ;;  %v5617_v16 = vpop.f32.mrb[2].mxu0 }
  0xe8   :  { %v6710_v17 = vadd.f32 %v5617_v16, %v53_v11  ;;  %v152_v18 = vpop.f32.mrb[3].mxu0  ;;  %v198_v19 = vsel %vm191_vm1, %v6703_v12, 0.0 }
  0xe9   :  { %v6714_v20 = vadd.f32 %v152_v18, %v51_v14  ;;  %199 = vadd.xlane.f32.xlu1 %v198_v19  ;;  %v192_v21 = vsel %vm191_vm1, %v6708_v15, 0.0 }
  0xea   :  { %193 = vadd.xlane.f32.xlu0 %v192_v21  ;;  %v201_v22 = vsel %vm191_vm1, %v6710_v17, 0.0 }
  0xeb   :  { %v195_v23 = vsel %vm191_vm1, %v6714_v20, 0.0 }
  0xed   :  { %202 = vadd.xlane.f32.xlu1 %v201_v22  ;;  %v5620_v24 = vpop.f32.mrb[4].mxu0 }
  0xee   :  { %196 = vadd.xlane.f32.xlu0 %v195_v23  ;;  %v165_v25 = vpop.f32.mrb[5].mxu0  ;;  %v6756_v51 = vadd.f32 %v5620_v24, %v56_v46 }
  0xef   :  { %v5621_v26 = vpop.f32.mrb[6].mxu0  ;;  %v6742_v44 = vadd.f32 %v165_v25, %v54_v39  ;;  %v5257_v25 = vld [vmem:[%s8398_s7] ss:$0 sm:$0xff] }
  0xf0   :  { %v168_v27 = vpop.f32.mrb[7].mxu0  ;;  %v6766_v56 = vadd.f32 %v5621_v26, %v57_v54  ;;  %v210_v57 = vsel %vm191_vm1, %v6756_v51, 0.0 }
  0xf1   :  { %v6758_v52 = vadd.f32 %v168_v27, %v55_v47  ;;  %v204_v53 = vsel %vm191_vm1, %v6742_v44, 0.0 }
  0xf2   :  { %v213_v59 = vsel %vm191_vm1, %v6766_v56, 0.0 }
  0xf3   :  { %v207_v58 = vsel %vm191_vm1, %v6758_v52, 0.0 }
 0x176   :  { %v200_v28 = vpop.xlane.xlu1 %199 }
 0x177   :  { %v219_v29 = vmul.f32 0.03125, %v200_v28  ;;  %v194_v30 = vpop.xlane.xlu0 %193 }
 0x178   :  { %v217_v31 = vmul.f32 0.03125, %v194_v30 }
 0x179   :  { %v6723_v32 = vsub.f32 %v6703_v12, %v219_v29 }
 0x17a   :  { %v6726_v33 = vsub.f32 %v6708_v15, %v217_v31  ;;  %v203_v34 = vpop.xlane.xlu1 %202 }
 0x17b   :  { %v220_v35 = vmul.f32 0.03125, %v203_v34  ;;  %v197_v36 = vpop.xlane.xlu0 %196  ;;  %v235_v43 = vmul.f32 %v6723_v32, %v6723_v32 }
 0x17c   :  { %v218_v37 = vmul.f32 0.03125, %v197_v36  ;;  %v233_v38 = vmul.f32 %v6726_v33, %v6726_v33 }
 0x17d   :  { %v6734_v40 = vsub.f32 %v6710_v17, %v220_v35  ;;  %v247_v48 = vsel %vm191_vm1, %v235_v43, 0.0 }
 0x17e   :  { %v6737_v41 = vsub.f32 %v6714_v20, %v218_v37  ;;  %v241_v42 = vsel %vm191_vm1, %v233_v38, 0.0 }
 0x17f   :  { %242 = vadd.xlane.f32.xlu0 %v241_v42  ;;  %v236_v50 = vmul.f32 %v6734_v40, %v6734_v40 }
 0x180   :  { %v234_v45 = vmul.f32 %v6737_v41, %v6737_v41 }
 0x181   :  { %v250_v55 = vsel %vm191_vm1, %v236_v50, 0.0 }
 0x182   :  { %v244_v49 = vsel %vm191_vm1, %v234_v45, 0.0 }
 0x183   :  { %248 = vadd.xlane.f32.xlu0 %v247_v48  ;;  %245 = vadd.xlane.f32.xlu1 %v244_v49 }
 0x187   :  { %205 = vadd.xlane.f32.xlu0 %v204_v53  ;;  %251 = vadd.xlane.f32.xlu1 %v250_v55 }
 0x18b   :  { %211 = vadd.xlane.f32.xlu0 %v210_v57  ;;  %208 = vadd.xlane.f32.xlu1 %v207_v58 }
 0x18f   :  { %214 = vadd.xlane.f32.xlu1 %v213_v59 }
 0x20c   :  { %v243_v62 = vpop.xlane.xlu0 %242 }
 0x20d   :  { %v265_v63 = vmul.f32 0.03125, %v243_v62 }
 0x20f   :  { %v273_v0 = vadd.f32 1e-05, %v265_v63 }
 0x210   :  { %v246_v1 = vpop.xlane.xlu1 %245  ;;  %v249_v2 = vpop.xlane.xlu0 %248 }
 0x211   :  { %6189 = vrsqrt.f32 %v273_v0  ;;  %v266_v3 = vmul.f32 0.03125, %v246_v1  ;;  %v267_v4 = vmul.f32 0.03125, %v249_v2 }
 0x213   :  { %v274_v5 = vadd.f32 1e-05, %v266_v3  ;;  %v275_v6 = vadd.f32 1e-05, %v267_v4 }
 0x214   :  { %v252_v7 = vpop.xlane.xlu1 %251  ;;  %v206_v8 = vpop.xlane.xlu0 %205 }
 0x215   :  { %6191 = vrsqrt.f32 %v274_v5  ;;  %v268_v9 = vmul.f32 0.03125, %v252_v7  ;;  %v221_v10 = vmul.f32 0.03125, %v206_v8 }
 0x216   :  { %6193 = vrsqrt.f32 %v275_v6 }
 0x217   :  { %v276_v11 = vadd.f32 1e-05, %v268_v9  ;;  %v6781_v16 = vsub.f32 %v6742_v44, %v221_v10 }
 0x218   :  { %v209_v13 = vpop.xlane.xlu1 %208  ;;  %v212_v14 = vpop.xlane.xlu0 %211 }
 0x219   :  { %6195 = vrsqrt.f32 %v276_v11  ;;  %v222_v18 = vmul.f32 0.03125, %v209_v13  ;;  %v223_v19 = vmul.f32 0.03125, %v212_v14  ;;  %v237_v30 = vmul.f32 %v6781_v16, %v6781_v16 }
 0x21b   :  { %v6190_v21 = vpop.eup %6189  ;;  %v230_v22 = vsub.f32 %v6758_v52, %v222_v18  ;;  %v231_v23 = vsub.f32 %v6756_v51, %v223_v19  ;;  %v253_v43 = vsel %vm191_vm1, %v237_v30, 0.0 }
 0x21c   :  { %v215_v24 = vpop.xlane.xlu1 %214  ;;  %v289_v26 = vmul.f32 %v6190_v21, %v6726_v33  ;;  %v5258_v33 = vld [vmem:[%s8398_s7 + $0x1] ss:$0 sm:$0xff] }
 0x21d   :  { %v224_v27 = vmul.f32 0.03125, %v215_v24  ;;  %v238_v28 = vmul.f32 %v230_v22, %v230_v22  ;;  %v239_v29 = vmul.f32 %v231_v23, %v231_v23 }
 0x21e   :  { %v301_v37 = vmul.f32 %v5257_v25, %v289_v26 }
 0x21f   :  { %v6192_v31 = vpop.eup %6191  ;;  %v232_v34 = vsub.f32 %v6766_v56, %v224_v27  ;;  %v256_v35 = vsel %vm191_vm1, %v238_v28, 0.0  ;;  %v259_v36 = vsel %vm191_vm1, %v239_v29, 0.0 }
 0x220   :  { %v6194_v38 = vpop.eup %6193  ;;  %257 = vadd.xlane.f32.xlu1 %v256_v35  ;;  %260 = vadd.xlane.f32.xlu0 %v259_v36  ;;  %v290_v39 = vmul.f32 %v6192_v31, %v6737_v41  ;;  %v313_v49 = vadd.f32 %v5258_v33, %v301_v37 }
 0x221   :  { %v240_v42 = vmul.f32 %v232_v34, %v232_v34  ;;  %v291_v45 = vmul.f32 %v6194_v38, %v6723_v32 }
 0x222   :  { %v302_v46 = vmul.f32 %v5257_v25, %v290_v39 }
 0x223   :  { %v6196_v47 = vpop.eup %6195  ;;  %v262_v48 = vsel %vm191_vm1, %v240_v42, 0.0  ;;  %v303_v54 = vmul.f32 %v5257_v25, %v291_v45 }
 0x224   :  { %263 = vadd.xlane.f32.xlu1 %v262_v48  ;;  %254 = vadd.xlane.f32.xlu0 %v253_v43  ;;  %v314_v50 = vadd.f32 %v5258_v33, %v302_v46  ;;  %v292_v53 = vmul.f32 %v6196_v47, %v6734_v40 }
 0x225   :  { %v315_v41 = vadd.f32 %v5258_v33, %v303_v54 }
 0x226   :  { %v321_v55 = vpack.c.bf16 %v314_v50, %v313_v49  ;;  %v304_v57 = vmul.f32 %v5257_v25, %v292_v53 }
 0x228   :  { %5626 = vmatprep.mubr.msk.bf16.mxu1 %vm191_vm1, %v321_v55  ;;  %v316_v58 = vadd.f32 %v5258_v33, %v304_v57 }
 0x22a   :  { %v322_v59 = vpack.c.bf16 %v316_v58, %v315_v41 }
 0x22c   :  { %5627 = vmatmul.mubr.msk.bf16.vlgmr.msra.gmra.mrb[0].mxu1 %vm191_vm1, %v322_v59 }
 0x2ad   :  { %v258_v32 = vpop.xlane.xlu1 %257  ;;  %v261_v60 = vpop.xlane.xlu0 %260 }
 0x2ae   :  { %v270_v61 = vmul.f32 0.03125, %v258_v32  ;;  %v271_v62 = vmul.f32 0.03125, %v261_v60 }
 0x2b0   :  { %v278_v63 = vadd.f32 1e-05, %v270_v61  ;;  %v279_v0 = vadd.f32 1e-05, %v271_v62 }
 0x2b1   :  { %v264_v1 = vpop.xlane.xlu1 %263  ;;  %v255_v2 = vpop.xlane.xlu0 %254 }
 0x2b2   :  { %6197 = vrsqrt.f32 %v278_v63  ;;  %v272_v40 = vmul.f32 0.03125, %v264_v1  ;;  %v269_v3 = vmul.f32 0.03125, %v255_v2 }
 0x2b3   :  { %6199 = vrsqrt.f32 %v279_v0  ;;  %v180_v0 = vlaneseq }
 0x2b4   :  { %v280_v4 = vadd.f32 1e-05, %v272_v40  ;;  %v277_v5 = vadd.f32 1e-05, %v269_v3 }
 0x2b5   :  { %v6844_v1 = vand.u32 127, %v180_v0 }
 0x2b6   :  { %6201 = vrsqrt.f32 %v280_v4 }
 0x2b7   :  { %6203 = vrsqrt.f32 %v277_v5  ;;  %vm182_vm3 = vcmp.lt.s32.totalorder %v6844_v1, 17 }
 0x2bc   :  { %v6198_v6 = vpop.eup %6197 }
 0x2bd   :  { %v6200_v7 = vpop.eup %6199  ;;  %v294_v8 = vmul.f32 %v6198_v6, %v230_v22 }
 0x2be   :  { %v295_v9 = vmul.f32 %v6200_v7, %v231_v23  ;;  %v5259_v23 = vld [vmem:[%s8398_s7 + $0x7] ss:$0 sm:$0xff] }
 0x2bf   :  { %v306_v19 = vmul.f32 %v5257_v25, %v294_v8 }
 0x2c0   :  { %v6202_v10 = vpop.eup %6201  ;;  %v307_v14 = vmul.f32 %v5257_v25, %v295_v9 }
 0x2c1   :  { %v6204_v11 = vpop.eup %6203  ;;  %v296_v13 = vmul.f32 %v6202_v10, %v232_v34  ;;  %v318_v29 = vadd.f32 %v5258_v33, %v306_v19 }
 0x2c2   :  { %v293_v18 = vmul.f32 %v6204_v11, %v6781_v16  ;;  %v319_v26 = vadd.f32 %v5258_v33, %v307_v14 }
 0x2c3   :  { %v308_v21 = vmul.f32 %v5257_v25, %v296_v13 }
 0x2c4   :  { %v305_v24 = vmul.f32 %v5257_v25, %v293_v18 }
 0x2c5   :  { %v320_v27 = vadd.f32 %v5258_v33, %v308_v21 }
 0x2c6   :  { %v317_v28 = vadd.f32 %v5258_v33, %v305_v24 }
 0x2c7   :  { %v324_v30 = vpack.c.bf16 %v320_v27, %v319_v26 }
 0x2c8   :  { %v323_v31 = vpack.c.bf16 %v318_v29, %v317_v28 }
 0x2ca   :  { %5630 = vmatprep.mubr.msk.bf16.mxu1 %vm191_vm1, %v323_v31 }
 0x2cb   :  { %5631 = vmatmul.mubr.msk.bf16.gmra.mrb[4].mxu1 %vm191_vm1, %v324_v30 }
 0x2ff   :  { %v5628_v22 = vpop.f32.mrb[0].mxu1 }
 0x300   :  { %v391_v34 = vpop.f32.mrb[1].mxu1  ;;  %v400_v35 = vadd.f32 %v5628_v22, %v5259_v23 }
 0x301   :  { %v5629_v16 = vpop.f32.mrb[2].mxu1  ;;  %v392_v37 = vadd.f32 %v5259_v23, %v391_v34 }
 0x302   :  { %v403_v36 = vadd.f32 %v5629_v16, %v5259_v23  ;;  %v394_v25 = vpop.f32.mrb[3].mxu1 }
 0x303   :  { %v395_v38 = vadd.f32 %v5259_v23, %v394_v25 }
 0x304   :  { %v6810_v39 = vpack.c.bf16 %v403_v36, %v400_v35 }
 0x305   :  { %v6812_v33 = vpack.c.bf16 %v395_v38, %v392_v37 }
 0x306   :  { %428 = vrot.lane.b32.xlu1 %v6810_v39, %s6599_s26 }
 0x307   :  { %426 = vrot.lane.b32.xlu0 %v6812_v33, %s6599_s26  ;;  %5638 = vmatprep.mubr.msk.bf16.mxu1 %vm430_vm2, %v6812_v33 }
 0x30a   :  { %609 = vrot.lane.b32.xlu1 %v6812_v33, %s6600_s27 }
 0x30b   :  { %605 = vrot.lane.b32.xlu0 %v6812_v33, %s6601_s28 }
 0x30e   :  { %611 = vrot.lane.b32.xlu1 %v6810_v39, %s6600_s27 }
 0x312   :  { %607 = vrot.lane.b32.xlu1 %v6810_v39, %s6601_s28 }
 0x378   :  { %v429_v45 = vpop.permute.xlu1 %428 }
 0x379   :  { %v427_v42 = vpop.permute.xlu0 %426  ;;  %v441_v46 = vsel %vm430_vm2, %v429_v45, 0 }
 0x37a   :  { %5990 = vmatprep.subr.msk.bf16.mxu1 %vm430_vm2, %v427_v42  ;;  %v438_v43 = vsel %vm430_vm2, %v427_v42, 0 }
 0x37b   :  { %5635 = vmatpush3.bf16.xpose.msra.mxu1 %v438_v43 }
 0x37c   :  { %5991 = vmatprep.subr.msk.bf16.mxu1 %vm430_vm2, %v429_v45  ;;  %v610_v47 = vpop.permute.xlu1 %609 }
 0x37d   :  { %v606_v48 = vpop.permute.xlu0 %605  ;;  %v620_v49 = vsel %vm430_vm2, %v610_v47, 0 }
 0x380   :  { %v612_v50 = vpop.permute.xlu1 %611 }
 0x381   :  { %v623_v53 = vsel %vm430_vm2, %v612_v50, 0 }
 0x383   :  { %5637 = vmatpush3.bf16.xpose.msra.mxu1 %v441_v46 }
 0x384   :  { %5992 = vmatprep.subr.msk.bf16.mxu1 %vm430_vm2, %v610_v47  ;;  %v608_v54 = vpop.permute.xlu1 %607 }
 0x38a   :  { %5639 = vmatmul.mubr.msk.bf16.vlgmr.msra.gmra.mrb[8].mxu1 %vm430_vm2, %v6810_v39 }
 0x38b   :  { %5651 = vmatpush3.bf16.xpose.msra.mxu1 %v620_v49  ;;  %5654 = vmatprep.mubr.msk.bf16.mxu1 %vm430_vm2, %v606_v48 }
 0x38c   :  { %5993 = vmatprep.subr.msk.bf16.mxu1 %vm430_vm2, %v612_v50 }
 0x393   :  { %5653 = vmatpush3.bf16.xpose.msra.mxu1 %v623_v53 }
 0x39a   :  { %5655 = vmatmul.mubr.msk.bf16.vlgmr.msra.gmra.mrb[12].mxu1 %vm430_vm2, %v608_v54 }
 0x39e   :  { %v5632_v55 = vpop.f32.mrb[4].mxu1 }
 0x39f   :  { %v407_v57 = vpop.f32.mrb[5].mxu1  ;;  %v416_v58 = vadd.f32 %v5632_v55, %v5259_v23 }
 0x3a0   :  { %v5633_v41 = vpop.f32.mrb[6].mxu1  ;;  %v408_v60 = vadd.f32 %v5259_v23, %v407_v57 }
 0x3a1   :  { %v419_v59 = vadd.f32 %v5633_v41, %v5259_v23  ;;  %v410_v32 = vpop.f32.mrb[7].mxu1 }
 0x3a2   :  { %v411_v61 = vadd.f32 %v5259_v23, %v410_v32 }
 0x3a3   :  { %v6840_v62 = vpack.c.bf16 %v419_v59, %v416_v58 }
 0x3a4   :  { %v6842_v63 = vpack.c.bf16 %v411_v61, %v408_v60 }
 0x45d   :  { %v5640_v2 = vpop.f32.mrb[8].mxu1 }
 0x45e   :  { %v477_v40 = vpop.f32.mrb[9].mxu1  ;;  %v496_v7 = vsel %vm182_vm3, %v5640_v2, -1e+30 }
 0x45f   :  { %v494_v3 = vsel %vm182_vm3, %v477_v40, -1e+30  ;;  %v5641_v4 = vpop.f32.mrb[10].mxu1  ;;  %v504_v10 = vsel %vm191_vm1, %v496_v7, -inf }
 0x460   :  { %v480_v5 = vpop.f32.mrb[11].mxu1  ;;  %v498_v6 = vsel %vm191_vm1, %v494_v3, -inf  ;;  %v497_v11 = vsel %vm182_vm3, %v5641_v4, -1e+30 }
 0x461   :  { %v495_v8 = vsel %vm182_vm3, %v480_v5, -1e+30  ;;  %499 = vmax.xlane.f32.xlu0 %v498_v6  ;;  %v507_v13 = vsel %vm191_vm1, %v497_v11, -inf }
 0x462   :  { %v501_v9 = vsel %vm191_vm1, %v495_v8, -inf }
 0x463   :  { %502 = vmax.xlane.f32.xlu1 %v501_v9 }
 0x465   :  { %505 = vmax.xlane.f32.xlu0 %v504_v10 }
 0x469   :  { %508 = vmax.xlane.f32.xlu0 %v507_v13 }
 0x46d   :  { %v5656_v14 = vpop.f32.mrb[12].mxu1 }
 0x46e   :  { %v659_v18 = vpop.f32.mrb[13].mxu1  ;;  %v676_v27 = vsel %vm182_vm3, %v5656_v14, -1e+30 }
 0x46f   :  { %v6861_v19 = vsel %vm182_vm3, %v659_v18, -1e+30  ;;  %v5657_v21 = vpop.f32.mrb[14].mxu1  ;;  %v684_v31 = vsel %vm191_vm1, %v676_v27, -inf }
 0x470   :  { %v662_v24 = vpop.f32.mrb[15].mxu1  ;;  %v678_v26 = vsel %vm191_vm1, %v6861_v19, -inf  ;;  %v677_v30 = vsel %vm182_vm3, %v5657_v21, -1e+30 }
 0x471   :  { %v675_v28 = vsel %vm182_vm3, %v662_v24, -1e+30  ;;  %679 = vmax.xlane.f32.xlu0 %v678_v26  ;;  %v687_v22 = vsel %vm191_vm1, %v677_v30, -inf }
 0x472   :  { %v681_v29 = vsel %vm191_vm1, %v675_v28, -inf }
 0x473   :  { %682 = vmax.xlane.f32.xlu1 %v681_v29 }
 0x475   :  { %685 = vmax.xlane.f32.xlu0 %v684_v31 }
 0x477   :  { %688 = vmax.xlane.f32.xlu1 %v687_v22 }
 0x488   :  { %546 = vrot.lane.b32.xlu1 %v6810_v39, %s6602_s29 }
 0x48c   :  { %724 = vrot.lane.b32.xlu1 %v6812_v33, %s6603_s0 }
 0x4ee   :  { %v500_v23 = vpop.xlane.xlu0 %499 }
 0x4ef   :  { %v510_v34 = vsub.f32 %v494_v3, %v500_v23 }
 0x4f0   :  { %v503_v16 = vpop.xlane.xlu1 %502 }
 0x4f1   :  { %v514_v25 = vmul.f32 1.442695, %v510_v34  ;;  %v511_v37 = vsub.f32 %v495_v8, %v503_v16 }
 0x4f2   :  { %v506_v35 = vpop.xlane.xlu0 %505 }
 0x4f3   :  { %v512_v36 = vsub.f32 %v496_v7, %v506_v35  ;;  %v516_v45 = vmul.f32 1.442695, %v511_v37 }
 0x4f5   :  { %v518_v38 = vmul.f32 1.442695, %v512_v36 }
 0x4f6   :  { %v509_v42 = vpop.xlane.xlu0 %508 }
 0x4f7   :  { %6205 = vpow2.f32 %v518_v38  ;;  %v513_v43 = vsub.f32 %v497_v11, %v509_v42 }
 0x4f8   :  { %6207 = vpow2.f32 %v514_v25 }
 0x4f9   :  { %v520_v46 = vmul.f32 1.442695, %v513_v43 }
 0x4fb   :  { %6209 = vpow2.f32 %v520_v46 }
 0x4fc   :  { %6211 = vpow2.f32 %v516_v45 }
 0x4fe   :  { %v680_v4 = vpop.xlane.xlu0 %679 }
 0x4ff   :  { %v690_v7 = vsub.f32 %v6861_v19, %v680_v4 }
 0x500   :  { %v683_v47 = vpop.xlane.xlu1 %682 }
 0x501   :  { %v6878_v48 = vpop.eup %6205  ;;  %v691_v53 = vsub.f32 %v675_v28, %v683_v47  ;;  %v694_v9 = vmul.f32 1.442695, %v690_v7 }
 0x502   :  { %v528_v49 = vsel %vm191_vm1, %v6878_v48, 0.0  ;;  %v6882_v50 = vpop.eup %6207  ;;  %v686_v5 = vpop.xlane.xlu0 %685 }
 0x503   :  { %529 = vadd.xlane.f32.xlu0 %v528_v49  ;;  %v522_v41 = vsel %vm191_vm1, %v6882_v50, 0.0  ;;  %v696_v32 = vmul.f32 1.442695, %v691_v53  ;;  %v692_v6 = vsub.f32 %v676_v27, %v686_v5 }
 0x504   :  { %v689_v54 = vpop.xlane.xlu1 %688 }
 0x505   :  { %v6210_v55 = vpop.eup %6209  ;;  %v693_v57 = vsub.f32 %v677_v30, %v689_v54  ;;  %v698_v8 = vmul.f32 1.442695, %v692_v6 }
 0x506   :  { %v531_v58 = vsel %vm191_vm1, %v6210_v55, 0.0  ;;  %v6212_v59 = vpop.eup %6211 }
 0x507   :  { %v700_v60 = vmul.f32 1.442695, %v693_v57  ;;  %523 = vadd.xlane.f32.xlu0 %v522_v41  ;;  %532 = vadd.xlane.f32.xlu1 %v531_v58  ;;  %v525_v61 = vsel %vm191_vm1, %v6212_v59, 0.0 }
 0x508   :  { %v547_v18 = vpop.permute.xlu1 %546 }
 0x509   :  { %6213 = vpow2.f32 %v700_v60 }
 0x50a   :  { %6215 = vpow2.f32 %v696_v32 }
 0x50b   :  { %526 = vadd.xlane.f32.xlu1 %v525_v61  ;;  %6217 = vpow2.f32 %v698_v8 }
 0x50c   :  { %6219 = vpow2.f32 %v694_v9  ;;  %v725_v19 = vpop.permute.xlu1 %724 }
 0x513   :  { %v6888_v0 = vpop.eup %6213 }
 0x514   :  { %v711_v2 = vsel %vm191_vm1, %v6888_v0, 0.0  ;;  %v6892_v40 = vpop.eup %6215 }
 0x515   :  { %712 = vadd.xlane.f32.xlu1 %v711_v2  ;;  %v705_v3 = vsel %vm191_vm1, %v6892_v40, 0.0  ;;  %v6218_v10 = vpop.eup %6217 }
 0x516   :  { %v708_v11 = vsel %vm191_vm1, %v6218_v10, 0.0  ;;  %v6220_v13 = vpop.eup %6219 }
 0x517   :  { %v702_v14 = vsel %vm191_vm1, %v6220_v13, 0.0 }
 0x519   :  { %706 = vadd.xlane.f32.xlu1 %v705_v3 }
 0x51d   :  { %544 = vrot.lane.b32.xlu0 %v6812_v33, %s6602_s29 }
 0x52a   :  { %726 = vrot.lane.b32.xlu1 %v6810_v39, %s6603_s0 }
 0x52e   :  { %791 = vrot.lane.b32.xlu1 %v6810_v39, %s6604_s30 }
 0x532   :  { %787 = vrot.lane.b32.xlu1 %v6810_v39, %s6605_s10 }
 0x53c   :  { %709 = vadd.xlane.f32.xlu0 %v708_v11 }
 0x540   :  { %703 = vadd.xlane.f32.xlu0 %v702_v14 }
 0x556   :  { %789 = vrot.lane.b32.xlu0 %v6812_v33, %s6604_s30 }
 0x55a   :  { %785 = vrot.lane.b32.xlu0 %v6812_v33, %s6605_s10 }
 0x590   :  { %v530_v21 = vpop.xlane.xlu0 %529 }
 0x594   :  { %v533_v24 = vpop.xlane.xlu1 %532  ;;  %v524_v26 = vpop.xlane.xlu0 %523 }
 0x595   :  { %6221 = vrcp.f32 %v533_v24 }
 0x596   :  { %6223 = vrcp.f32 %v524_v26 }
 0x597   :  { %6225 = vrcp.f32 %v530_v21 }
 0x598   :  { %v527_v27 = vpop.xlane.xlu1 %526  ;;  %v545_v28 = vpop.permute.xlu0 %544 }
 0x599   :  { %6227 = vrcp.f32 %v527_v27  ;;  %5642 = vmatprep.subr.bf16.mxu0 %v545_v28 }
 0x59a   :  { %5643 = vmatpush3.bf16.msra.mxu0 %v545_v28 }
 0x59b   :  { %5644 = vmatprep.subr.bf16.mxu0 %v547_v18 }
 0x59e   :  { %5645 = vmatpush3.bf16.msra.mxu0 %v547_v18 }
 0x59f   :  { %5658 = vmatprep.subr.bf16.mxu0 %v725_v19  ;;  %v6222_v29 = vpop.eup %6221 }
 0x5a0   :  { %v6224_v30 = vpop.eup %6223  ;;  %v541_v34 = vmul.f32 %v6222_v29, %v6210_v55 }
 0x5a1   :  { %v6226_v31 = vpop.eup %6225  ;;  %v538_v16 = vmul.f32 %v6224_v30, %v6882_v50 }
 0x5a2   :  { %v713_v22 = vpop.xlane.xlu1 %712  ;;  %v540_v36 = vmul.f32 %v6226_v31, %v6878_v48 }
 0x5a3   :  { %v6228_v23 = vpop.eup %6227 }
 0x5a4   :  { %v539_v35 = vmul.f32 %v6228_v23, %v6212_v59  ;;  %v543_v38 = vpack.c.bf16 %v541_v34, %v540_v36 }
 0x5a6   :  { %v707_v25 = vpop.xlane.xlu1 %706  ;;  %v542_v37 = vpack.c.bf16 %v539_v35, %v538_v16 }
 0x5a8   :  { %5646 = vmatprep.mubr.msk.bf16.mxu0 %vm191_vm1, %v542_v37 }
 0x5a9   :  { %5647 = vmatmul.mubr.msk.bf16.vlgmr.msra.gmra.mrb[8].mxu0 %vm191_vm1, %v543_v38 }
 0x5aa   :  { %5659 = vmatpush3.bf16.msra.mxu0 %v725_v19  ;;  %v727_v42 = vpop.permute.xlu1 %726 }
 0x5ab   :  { %5660 = vmatprep.subr.bf16.mxu0 %v727_v42 }
 0x5ae   :  { %5661 = vmatpush3.bf16.msra.mxu0 %v727_v42  ;;  %v792_v60 = vpop.permute.xlu1 %791 }
 0x5af   :  { %v803_v61 = vsel %vm430_vm2, %v792_v60, 0 }
 0x5b2   :  { %v788_v2 = vpop.permute.xlu1 %787 }
 0x5c9   :  { %v710_v43 = vpop.xlane.xlu0 %709 }
 0x5ca   :  { %6229 = vrcp.f32 %v710_v43 }
 0x5cb   :  { %6231 = vrcp.f32 %v707_v25 }
 0x5cc   :  { %6233 = vrcp.f32 %v713_v22 }
 0x5cd   :  { %v704_v45 = vpop.xlane.xlu0 %703 }
 0x5ce   :  { %6235 = vrcp.f32 %v704_v45 }
 0x5d1   :  { %v790_v46 = vpop.permute.xlu0 %789 }
 0x5d2   :  { %5994 = vmatprep.subr.msk.bf16.mxu0 %vm430_vm2, %v790_v46  ;;  %v800_v32 = vsel %vm430_vm2, %v790_v46, 0 }
 0x5d4   :  { %v6230_v47 = vpop.eup %6229 }
 0x5d5   :  { %v6232_v48 = vpop.eup %6231  ;;  %v720_v53 = vmul.f32 %v6230_v47, %v6218_v10  ;;  %v786_v59 = vpop.permute.xlu0 %785 }
 0x5d6   :  { %v6234_v49 = vpop.eup %6233  ;;  %v719_v55 = vmul.f32 %v6232_v48, %v6892_v40 }
 0x5d7   :  { %v721_v57 = vmul.f32 %v6234_v49, %v6888_v0 }
 0x5d8   :  { %v6236_v50 = vpop.eup %6235 }
 0x5d9   :  { %v718_v54 = vmul.f32 %v6236_v50, %v6220_v13  ;;  %v723_v58 = vpack.c.bf16 %v721_v57, %v720_v53 }
 0x5db   :  { %v722_v41 = vpack.c.bf16 %v719_v55, %v718_v54 }
 0x5dd   :  { %5662 = vmatprep.mubr.msk.bf16.mxu0 %vm191_vm1, %v722_v41 }
 0x5de   :  { %5663 = vmatmul.mubr.msk.bf16.vlgmr.msra.gmra.mrb[12].mxu0 %vm191_vm1, %v723_v58 }
 0x5df   :  { %5667 = vmatpush3.bf16.xpose.msra.mxu0 %v800_v32  ;;  %5670 = vmatprep.mubr.msk.bf16.mxu0 %vm430_vm2, %v786_v59 }
 0x5e0   :  { %5995 = vmatprep.subr.msk.bf16.mxu0 %vm430_vm2, %v792_v60 }
 0x5e7   :  { %5669 = vmatpush3.bf16.xpose.msra.mxu0 %v803_v61 }
 0x5ee   :  { %5671 = vmatmul.mubr.msk.bf16.vlgmr.msra.gmra.mrb[16].mxu0 %vm430_vm2, %v788_v2 }
 0x67c   :  { %v6925_v0 = vpop.f32.mrb[8].mxu0 }
 0x67d   :  { %v6927_v40 = vpop.f32.mrb[9].mxu0 }
 0x67e   :  { %v6929_v3 = vpop.f32.mrb[10].mxu0 }
 0x67f   :  { %v6931_v4 = vpop.f32.mrb[11].mxu0 }
 0x6b1   :  { %v6933_v5 = vpop.f32.mrb[12].mxu0 }
 0x6b2   :  { %v6935_v6 = vpop.f32.mrb[13].mxu0 }
 0x6b3   :  { %v6937_v7 = vpop.f32.mrb[14].mxu0 }
 0x6b4   :  { %v6044_v8 = vpack.i.bf16 %v6937_v7, %v6933_v5  ;;  %v6941_v9 = vpop.f32.mrb[15].mxu0 }
 0x6b5   :  { %v6039_v10 = vpack.i.bf16 %v6941_v9, %v6935_v6 }
 0x6c1   :  { %v5672_v11 = vpop.f32.mrb[16].mxu0 }
 0x6c2   :  { %v839_v13 = vpop.f32.mrb[17].mxu0  ;;  %v856_v24 = vsel %vm182_vm3, %v5672_v11, -1e+30 }
 0x6c3   :  { %v854_v14 = vsel %vm182_vm3, %v839_v13, -1e+30  ;;  %v5673_v18 = vpop.f32.mrb[18].mxu0  ;;  %v864_v28 = vsel %vm191_vm1, %v856_v24, -inf }
 0x6c4   :  { %v842_v19 = vpop.f32.mrb[19].mxu0  ;;  %v858_v21 = vsel %vm191_vm1, %v854_v14, -inf  ;;  %v857_v29 = vsel %vm182_vm3, %v5673_v18, -1e+30 }
 0x6c5   :  { %v855_v26 = vsel %vm182_vm3, %v842_v19, -1e+30  ;;  %859 = vmax.xlane.f32.xlu0 %v858_v21  ;;  %v867_v30 = vsel %vm191_vm1, %v857_v29, -inf }
 0x6c6   :  { %v861_v27 = vsel %vm191_vm1, %v855_v26, -inf }
 0x6c7   :  { %862 = vmax.xlane.f32.xlu1 %v861_v27 }
 0x6c9   :  { %865 = vmax.xlane.f32.xlu0 %v864_v28 }
 0x6cd   :  { %868 = vmax.xlane.f32.xlu0 %v867_v30 }
 0x6d8   :  { %906 = vrot.lane.b32.xlu1 %v6810_v39, %s6606_s11 }
 0x752   :  { %v860_v31 = vpop.xlane.xlu0 %859 }
 0x753   :  { %v870_v22 = vsub.f32 %v854_v14, %v860_v31 }
 0x754   :  { %v863_v23 = vpop.xlane.xlu1 %862 }
 0x755   :  { %v874_v35 = vmul.f32 1.442695, %v870_v22  ;;  %v871_v36 = vsub.f32 %v855_v26, %v863_v23 }
 0x756   :  { %v866_v34 = vpop.xlane.xlu0 %865 }
 0x757   :  { %v872_v16 = vsub.f32 %v856_v24, %v866_v34  ;;  %v876_v42 = vmul.f32 1.442695, %v871_v36 }
 0x758   :  { %v907_v55 = vpop.permute.xlu1 %906 }
 0x759   :  { %v878_v25 = vmul.f32 1.442695, %v872_v16 }
 0x75a   :  { %v869_v37 = vpop.xlane.xlu0 %868 }
 0x75b   :  { %6237 = vpow2.f32 %v878_v25  ;;  %v873_v38 = vsub.f32 %v857_v29, %v869_v37 }
 0x75c   :  { %6239 = vpow2.f32 %v874_v35 }
 0x75d   :  { %v880_v43 = vmul.f32 1.442695, %v873_v38 }
 0x75f   :  { %6241 = vpow2.f32 %v880_v43 }
 0x760   :  { %6243 = vpow2.f32 %v876_v42 }
 0x765   :  { %v6238_v45 = vpop.eup %6237 }
 0x766   :  { %v888_v46 = vsel %vm191_vm1, %v6238_v45, 0.0  ;;  %v6240_v47 = vpop.eup %6239 }
 0x767   :  { %889 = vadd.xlane.f32.xlu0 %v888_v46  ;;  %v882_v49 = vsel %vm191_vm1, %v6240_v47, 0.0 }
 0x769   :  { %v6242_v48 = vpop.eup %6241 }
 0x76a   :  { %v891_v50 = vsel %vm191_vm1, %v6242_v48, 0.0  ;;  %v6244_v53 = vpop.eup %6243 }
 0x76b   :  { %883 = vadd.xlane.f32.xlu0 %v882_v49  ;;  %892 = vadd.xlane.f32.xlu1 %v891_v50  ;;  %v885_v54 = vsel %vm191_vm1, %v6244_v53, 0.0 }
 0x76f   :  { %886 = vadd.xlane.f32.xlu1 %v885_v54 }
 0x780   :  { %969 = vrot.lane.b32.xlu1 %v6812_v33, %s6607_s12 }
 0x781   :  { %904 = vrot.lane.b32.xlu0 %v6812_v33, %s6606_s11 }
 0x784   :  { %971 = vrot.lane.b32.xlu1 %v6810_v39, %s6607_s12 }
 0x785   :  { %965 = vrot.lane.b32.xlu0 %v6812_v33, %s6608_s13 }
 0x788   :  { %967 = vrot.lane.b32.xlu1 %v6810_v39, %s6608_s13 }
 0x7f4   :  { %v890_v57 = vpop.xlane.xlu0 %889 }
 0x7f8   :  { %v884_v41 = vpop.xlane.xlu0 %883  ;;  %v893_v58 = vpop.xlane.xlu1 %892 }
 0x7f9   :  { %6245 = vrcp.f32 %v893_v58 }
 0x7fa   :  { %6247 = vrcp.f32 %v884_v41 }
 0x7fb   :  { %6249 = vrcp.f32 %v890_v57 }
 0x7fc   :  { %v905_v59 = vpop.permute.xlu0 %904  ;;  %v887_v32 = vpop.xlane.xlu1 %886 }
 0x7fd   :  { %6251 = vrcp.f32 %v887_v32  ;;  %5674 = vmatprep.subr.bf16.mxu1 %v905_v59 }
 0x7fe   :  { %5675 = vmatpush3.bf16.msra.mxu1 %v905_v59 }
 0x7ff   :  { %5676 = vmatprep.subr.bf16.mxu1 %v907_v55 }
 0x800   :  { %v970_v60 = vpop.permute.xlu1 %969  ;;  %v966_v27 = vpop.permute.xlu0 %965 }
 0x801   :  { %v980_v28 = vsel %vm430_vm2, %v970_v60, 0 }
 0x802   :  { %5677 = vmatpush3.bf16.msra.mxu1 %v907_v55 }
 0x803   :  { %5996 = vmatprep.subr.msk.bf16.mxu1 %vm430_vm2, %v970_v60  ;;  %v6246_v61 = vpop.eup %6245 }
 0x804   :  { %v6248_v2 = vpop.eup %6247  ;;  %v901_v14 = vmul.f32 %v6246_v61, %v6242_v48  ;;  %v972_v29 = vpop.permute.xlu1 %971 }
 0x805   :  { %v6250_v11 = vpop.eup %6249  ;;  %v898_v18 = vmul.f32 %v6248_v2, %v6240_v47  ;;  %v983_v30 = vsel %vm430_vm2, %v972_v29, 0 }
 0x806   :  { %v900_v21 = vmul.f32 %v6250_v11, %v6238_v45 }
 0x807   :  { %v6252_v13 = vpop.eup %6251 }
 0x808   :  { %v899_v19 = vmul.f32 %v6252_v13, %v6244_v53  ;;  %v903_v26 = vpack.c.bf16 %v901_v14, %v900_v21  ;;  %v968_v31 = vpop.permute.xlu1 %967 }
 0x80a   :  { %v902_v24 = vpack.c.bf16 %v899_v19, %v898_v18 }
 0x80c   :  { %5678 = vmatprep.mubr.msk.bf16.mxu1 %vm191_vm1, %v902_v24 }
 0x80d   :  { %5679 = vmatmul.mubr.msk.bf16.vlgmr.msra.gmra.mrb[16].mxu1 %vm191_vm1, %v903_v26 }
 0x80e   :  { %5683 = vmatpush3.bf16.xpose.msra.mxu1 %v980_v28  ;;  %5686 = vmatprep.mubr.msk.bf16.mxu1 %vm430_vm2, %v966_v27 }
 0x80f   :  { %5997 = vmatprep.subr.msk.bf16.mxu1 %vm430_vm2, %v972_v29 }
 0x816   :  { %5685 = vmatpush3.bf16.xpose.msra.mxu1 %v983_v30 }
 0x81d   :  { %5687 = vmatmul.mubr.msk.bf16.vlgmr.msra.gmra.mrb[20].mxu1 %vm430_vm2, %v968_v31 }
 0x8e0   :  { %v6981_v22 = vpop.f32.mrb[16].mxu1 }
 0x8e1   :  { %v6983_v23 = vpop.f32.mrb[17].mxu1 }
 0x8e2   :  { %v6985_v34 = vpop.f32.mrb[18].mxu1 }
 0x8e3   :  { %v6054_v16 = vpack.i.bf16 %v6985_v34, %v6981_v22  ;;  %v6989_v35 = vpop.f32.mrb[19].mxu1 }
 0x8e4   :  { %v6049_v36 = vpack.i.bf16 %v6989_v35, %v6983_v23 }
 0x8f0   :  { %v5688_v25 = vpop.f32.mrb[20].mxu1 }
 0x8f1   :  { %v1019_v37 = vpop.f32.mrb[21].mxu1  ;;  %v1036_v46 = vsel %vm182_vm3, %v5688_v25, -1e+30 }
 0x8f2   :  { %v1034_v38 = vsel %vm182_vm3, %v1019_v37, -1e+30  ;;  %v5689_v42 = vpop.f32.mrb[22].mxu1  ;;  %v1044_v49 = vsel %vm191_vm1, %v1036_v46, -inf }
 0x8f3   :  { %v1022_v43 = vpop.f32.mrb[23].mxu1  ;;  %v1038_v45 = vsel %vm191_vm1, %v1034_v38, -inf  ;;  %v1037_v50 = vsel %vm182_vm3, %v5689_v42, -1e+30 }
 0x8f4   :  { %v1035_v47 = vsel %vm182_vm3, %v1022_v43, -1e+30  ;;  %1039 = vmax.xlane.f32.xlu0 %v1038_v45  ;;  %v1047_v53 = vsel %vm191_vm1, %v1037_v50, -inf }
 0x8f5   :  { %v1041_v48 = vsel %vm191_vm1, %v1035_v47, -inf }
 0x8f6   :  { %1042 = vmax.xlane.f32.xlu1 %v1041_v48 }
 0x8f8   :  { %1045 = vmax.xlane.f32.xlu0 %v1044_v49 }
 0x8fc   :  { %1048 = vmax.xlane.f32.xlu0 %v1047_v53 }
 0x907   :  { %1086 = vrot.lane.b32.xlu1 %v6810_v39, %s6609_s14 }
 0x981   :  { %v1040_v54 = vpop.xlane.xlu0 %1039 }
 0x982   :  { %v1050_v55 = vsub.f32 %v1034_v38, %v1040_v54 }
 0x983   :  { %v1043_v57 = vpop.xlane.xlu1 %1042 }
 0x984   :  { %v1054_v59 = vmul.f32 1.442695, %v1050_v55  ;;  %v1051_v32 = vsub.f32 %v1035_v47, %v1043_v57 }
 0x985   :  { %v1046_v41 = vpop.xlane.xlu0 %1045 }
 0x986   :  { %v1052_v58 = vsub.f32 %v1036_v46, %v1046_v41  ;;  %v1056_v11 = vmul.f32 1.442695, %v1051_v32 }
 0x987   :  { %v1087_v28 = vpop.permute.xlu1 %1086 }
 0x988   :  { %v1058_v60 = vmul.f32 1.442695, %v1052_v58 }
 0x989   :  { %v1049_v61 = vpop.xlane.xlu0 %1048 }
 0x98a   :  { %6253 = vpow2.f32 %v1058_v60  ;;  %v1053_v2 = vsub.f32 %v1037_v50, %v1049_v61 }
 0x98b   :  { %6255 = vpow2.f32 %v1054_v59 }
 0x98c   :  { %v1060_v13 = vmul.f32 1.442695, %v1053_v2 }
 0x98e   :  { %6257 = vpow2.f32 %v1060_v13 }
 0x98f   :  { %6259 = vpow2.f32 %v1056_v11 }
 0x994   :  { %v6254_v14 = vpop.eup %6253 }
 0x995   :  { %v1068_v18 = vsel %vm191_vm1, %v6254_v14, 0.0  ;;  %v6256_v39 = vpop.eup %6255 }
 0x996   :  { %1069 = vadd.xlane.f32.xlu0 %v1068_v18  ;;  %v1062_v21 = vsel %vm191_vm1, %v6256_v39, 0.0 }
 0x998   :  { %v6258_v19 = vpop.eup %6257 }
 0x999   :  { %v1071_v24 = vsel %vm191_vm1, %v6258_v19, 0.0  ;;  %v6260_v26 = vpop.eup %6259 }
 0x99a   :  { %1063 = vadd.xlane.f32.xlu0 %v1062_v21  ;;  %1072 = vadd.xlane.f32.xlu1 %v1071_v24  ;;  %v1065_v27 = vsel %vm191_vm1, %v6260_v26, 0.0 }
 0x99e   :  { %1066 = vadd.xlane.f32.xlu1 %v1065_v27 }
 0x9af   :  { %1211 = vrot.lane.b32.xlu1 %v6842_v63, %s6599_s26 }
 0x9b0   :  { %1084 = vrot.lane.b32.xlu0 %v6812_v33, %s6609_s14 }
 0x9b3   :  { %1213 = vrot.lane.b32.xlu1 %v6840_v62, %s6599_s26 }
 0xa23   :  { %v1070_v29 = vpop.xlane.xlu0 %1069 }
 0xa27   :  { %v1064_v30 = vpop.xlane.xlu0 %1063  ;;  %v1073_v31 = vpop.xlane.xlu1 %1072 }
 0xa28   :  { %6261 = vrcp.f32 %v1073_v31 }
 0xa29   :  { %6263 = vrcp.f32 %v1064_v30 }
 0xa2a   :  { %6265 = vrcp.f32 %v1070_v29 }
 0xa2b   :  { %v1085_v25 = vpop.permute.xlu0 %1084  ;;  %v1067_v37 = vpop.xlane.xlu1 %1066 }
 0xa2c   :  { %6267 = vrcp.f32 %v1067_v37  ;;  %5690 = vmatprep.subr.bf16.mxu0 %v1085_v25 }
 0xa2d   :  { %5691 = vmatpush3.bf16.msra.mxu0 %v1085_v25 }
 0xa2e   :  { %5692 = vmatprep.subr.bf16.mxu0 %v1087_v28 }
 0xa2f   :  { %v1212_v38 = vpop.permute.xlu1 %1211 }
 0xa30   :  { %v1222_v54 = vsel %vm430_vm2, %v1212_v38, 0 }
 0xa31   :  { %5693 = vmatpush3.bf16.msra.mxu0 %v1087_v28 }
 0xa32   :  { %5998 = vmatprep.subr.msk.bf16.mxu0 %vm430_vm2, %v1212_v38  ;;  %v6262_v33 = vpop.eup %6261 }
 0xa33   :  { %v6264_v42 = vpop.eup %6263  ;;  %v1081_v46 = vmul.f32 %v6262_v33, %v6258_v19  ;;  %v1214_v55 = vpop.permute.xlu1 %1213 }
 0xa34   :  { %v6266_v43 = vpop.eup %6265  ;;  %v1078_v47 = vmul.f32 %v6264_v42, %v6256_v39  ;;  %v1225_v57 = vsel %vm430_vm2, %v1214_v55, 0 }
 0xa35   :  { %v1080_v49 = vmul.f32 %v6266_v43, %v6254_v14 }
 0xa36   :  { %v6268_v45 = vpop.eup %6267 }
 0xa37   :  { %v1079_v48 = vmul.f32 %v6268_v45, %v6260_v26  ;;  %v1083_v53 = vpack.c.bf16 %v1081_v46, %v1080_v49 }
 0xa39   :  { %v1082_v50 = vpack.c.bf16 %v1079_v48, %v1078_v47 }
 0xa3b   :  { %5694 = vmatprep.mubr.msk.bf16.mxu0 %vm191_vm1, %v1082_v50 }
 0xa3c   :  { %5695 = vmatmul.mubr.msk.bf16.vlgmr.msra.gmra.mrb[20].mxu0 %vm191_vm1, %v1083_v53 }
 0xa3d   :  { %5699 = vmatpush3.bf16.xpose.msra.mxu0 %v1222_v54  ;;  %5702 = vmatprep.mubr.msk.bf16.mxu0 %vm430_vm2, %v6842_v63 }
 0xa3e   :  { %5999 = vmatprep.subr.msk.bf16.mxu0 %vm430_vm2, %v1214_v55 }
 0xa45   :  { %5701 = vmatpush3.bf16.xpose.msra.mxu0 %v1225_v57 }
 0xa4c   :  { %5703 = vmatmul.mubr.msk.bf16.vlgmr.msra.gmra.mrb[24].mxu0 %vm430_vm2, %v6840_v62 }
 0xb0f   :  { %v7027_v41 = vpop.f32.mrb[20].mxu0 }
 0xb10   :  { %v7029_v58 = vpop.f32.mrb[21].mxu0 }
 0xb11   :  { %v7031_v59 = vpop.f32.mrb[22].mxu0 }
 0xb12   :  { %v6064_v32 = vpack.i.bf16 %v7031_v59, %v7027_v41  ;;  %v7035_v60 = vpop.f32.mrb[23].mxu0 }
 0xb13   :  { %v6059_v61 = vpack.i.bf16 %v7035_v60, %v7029_v58 }
 0xb1f   :  { %v5704_v2 = vpop.f32.mrb[24].mxu0 }
 0xb20   :  { %v1261_v11 = vpop.f32.mrb[25].mxu0  ;;  %v1278_v19 = vsel %vm182_vm3, %v5704_v2, -1e+30 }
 0xb21   :  { %v1276_v13 = vsel %vm182_vm3, %v1261_v11, -1e+30  ;;  %v5705_v14 = vpop.f32.mrb[26].mxu0  ;;  %v1286_v26 = vsel %vm191_vm1, %v1278_v19, -inf }
 0xb22   :  { %v1264_v18 = vpop.f32.mrb[27].mxu0  ;;  %v1280_v39 = vsel %vm191_vm1, %v1276_v13, -inf  ;;  %v1279_v27 = vsel %vm182_vm3, %v5705_v14, -1e+30 }
 0xb23   :  { %v1277_v21 = vsel %vm182_vm3, %v1264_v18, -1e+30  ;;  %1281 = vmax.xlane.f32.xlu0 %v1280_v39  ;;  %v1289_v28 = vsel %vm191_vm1, %v1279_v27, -inf }
 0xb24   :  { %v1283_v24 = vsel %vm191_vm1, %v1277_v21, -inf }
 0xb25   :  { %1284 = vmax.xlane.f32.xlu1 %v1283_v24 }
 0xb27   :  { %1287 = vmax.xlane.f32.xlu0 %v1286_v26 }
 0xb2b   :  { %1290 = vmax.xlane.f32.xlu0 %v1289_v28 }
 0xb36   :  { %1328 = vrot.lane.b32.xlu1 %v6840_v62, %s6602_s29 }
 0xbb0   :  { %v1282_v29 = vpop.xlane.xlu0 %1281 }
 0xbb1   :  { %v1292_v30 = vsub.f32 %v1276_v13, %v1282_v29 }
 0xbb2   :  { %v1285_v31 = vpop.xlane.xlu1 %1284 }
 0xbb3   :  { %v1296_v38 = vmul.f32 1.442695, %v1292_v30  ;;  %v1293_v33 = vsub.f32 %v1277_v21, %v1285_v31 }
 0xbb4   :  { %v1288_v25 = vpop.xlane.xlu0 %1287 }
 0xbb5   :  { %v1294_v37 = vsub.f32 %v1278_v19, %v1288_v25  ;;  %v1298_v46 = vmul.f32 1.442695, %v1293_v33 }
 0xbb6   :  { %v1329_v11 = vpop.permute.xlu1 %1328 }
 0xbb7   :  { %v1300_v42 = vmul.f32 1.442695, %v1294_v37 }
 0xbb8   :  { %v1291_v43 = vpop.xlane.xlu0 %1290 }
 0xbb9   :  { %6269 = vpow2.f32 %v1300_v42  ;;  %v1295_v45 = vsub.f32 %v1279_v27, %v1291_v43 }
 0xbba   :  { %6271 = vpow2.f32 %v1296_v38 }
 0xbbb   :  { %v1302_v47 = vmul.f32 1.442695, %v1295_v45 }
 0xbbd   :  { %6273 = vpow2.f32 %v1302_v47 }
 0xbbe   :  { %6275 = vpow2.f32 %v1298_v46 }
 0xbc3   :  { %v6270_v48 = vpop.eup %6269 }
 0xbc4   :  { %v1310_v49 = vsel %vm191_vm1, %v6270_v48, 0.0  ;;  %v6272_v50 = vpop.eup %6271 }
 0xbc5   :  { %1311 = vadd.xlane.f32.xlu0 %v1310_v49  ;;  %v1304_v54 = vsel %vm191_vm1, %v6272_v50, 0.0 }
 0xbc7   :  { %v6274_v53 = vpop.eup %6273 }
 0xbc8   :  { %v1313_v55 = vsel %vm191_vm1, %v6274_v53, 0.0  ;;  %v6276_v57 = vpop.eup %6275 }
 0xbc9   :  { %1305 = vadd.xlane.f32.xlu0 %v1304_v54  ;;  %1314 = vadd.xlane.f32.xlu1 %v1313_v55  ;;  %v1307_v2 = vsel %vm191_vm1, %v6276_v57, 0.0 }
 0xbcd   :  { %1308 = vadd.xlane.f32.xlu1 %v1307_v2 }
 0xbde   :  { %1391 = vrot.lane.b32.xlu1 %v6842_v63, %s6600_s27 }
 0xbdf   :  { %1326 = vrot.lane.b32.xlu0 %v6842_v63, %s6602_s29 }
 0xbe2   :  { %1393 = vrot.lane.b32.xlu1 %v6840_v62, %s6600_s27 }
 0xbe3   :  { %1387 = vrot.lane.b32.xlu0 %v6842_v63, %s6601_s28 }
 0xbe6   :  { %1389 = vrot.lane.b32.xlu1 %v6840_v62, %s6601_s28 }
 0xc52   :  { %v1312_v13 = vpop.xlane.xlu0 %1311 }
 0xc56   :  { %v1306_v14 = vpop.xlane.xlu0 %1305  ;;  %v1315_v18 = vpop.xlane.xlu1 %1314 }
 0xc57   :  { %6277 = vrcp.f32 %v1315_v18 }
 0xc58   :  { %6279 = vrcp.f32 %v1306_v14 }
 0xc59   :  { %6281 = vrcp.f32 %v1312_v13 }
 0xc5a   :  { %v1327_v39 = vpop.permute.xlu0 %1326  ;;  %v1309_v19 = vpop.xlane.xlu1 %1308 }
 0xc5b   :  { %6283 = vrcp.f32 %v1309_v19  ;;  %5706 = vmatprep.subr.bf16.mxu1 %v1327_v39 }
 0xc5c   :  { %5707 = vmatpush3.bf16.msra.mxu1 %v1327_v39 }
 0xc5d   :  { %5708 = vmatprep.subr.bf16.mxu1 %v1329_v11 }
 0xc5e   :  { %v1392_v21 = vpop.permute.xlu1 %1391  ;;  %v1388_v33 = vpop.permute.xlu0 %1387 }
 0xc5f   :  { %v1402_v42 = vsel %vm430_vm2, %v1392_v21, 0 }
 0xc60   :  { %5709 = vmatpush3.bf16.msra.mxu1 %v1329_v11 }
 0xc61   :  { %6000 = vmatprep.subr.msk.bf16.mxu1 %vm430_vm2, %v1392_v21  ;;  %v6278_v24 = vpop.eup %6277 }
 0xc62   :  { %v6280_v26 = vpop.eup %6279  ;;  %v1323_v29 = vmul.f32 %v6278_v24, %v6274_v53  ;;  %v1394_v43 = vpop.permute.xlu1 %1393 }
 0xc63   :  { %v6282_v27 = vpop.eup %6281  ;;  %v1320_v30 = vmul.f32 %v6280_v26, %v6272_v50  ;;  %v1405_v45 = vsel %vm430_vm2, %v1394_v43, 0 }
 0xc64   :  { %v1322_v25 = vmul.f32 %v6282_v27, %v6270_v48 }
 0xc65   :  { %v6284_v28 = vpop.eup %6283 }
 0xc66   :  { %v1321_v31 = vmul.f32 %v6284_v28, %v6276_v57  ;;  %v1325_v38 = vpack.c.bf16 %v1323_v29, %v1322_v25  ;;  %v1390_v46 = vpop.permute.xlu1 %1389 }
 0xc68   :  { %v1324_v37 = vpack.c.bf16 %v1321_v31, %v1320_v30 }
 0xc6a   :  { %5710 = vmatprep.mubr.msk.bf16.mxu1 %vm191_vm1, %v1324_v37 }
 0xc6b   :  { %5711 = vmatmul.mubr.msk.bf16.vlgmr.msra.gmra.mrb[24].mxu1 %vm191_vm1, %v1325_v38 }
 0xc6c   :  { %5715 = vmatpush3.bf16.xpose.msra.mxu1 %v1402_v42  ;;  %5718 = vmatprep.mubr.msk.bf16.mxu1 %vm430_vm2, %v1388_v33 }
 0xc6d   :  { %6001 = vmatprep.subr.msk.bf16.mxu1 %vm430_vm2, %v1394_v43 }
 0xc74   :  { %5717 = vmatpush3.bf16.xpose.msra.mxu1 %v1405_v45 }
 0xc7b   :  { %5719 = vmatmul.mubr.msk.bf16.vlgmr.msra.gmra.mrb[28].mxu1 %vm430_vm2, %v1390_v46 }
 0xd3e   :  { %v7075_v47 = vpop.f32.mrb[24].mxu1 }
 0xd3f   :  { %v7077_v48 = vpop.f32.mrb[25].mxu1 }
 0xd40   :  { %v7079_v49 = vpop.f32.mrb[26].mxu1 }
 0xd41   :  { %v7081_v50 = vpop.f32.mrb[27].mxu1 }
 0xd4e   :  { %v5720_v53 = vpop.f32.mrb[28].mxu1 }
 0xd4f   :  { %v1441_v54 = vpop.f32.mrb[29].mxu1  ;;  %v1458_v13 = vsel %vm182_vm3, %v5720_v53, -1e+30 }
 0xd50   :  { %v1456_v55 = vsel %vm182_vm3, %v1441_v54, -1e+30  ;;  %v5721_v57 = vpop.f32.mrb[30].mxu1  ;;  %v1466_v39 = vsel %vm191_vm1, %v1458_v13, -inf }
 0xd51   :  { %v1444_v2 = vpop.f32.mrb[31].mxu1  ;;  %v1460_v11 = vsel %vm191_vm1, %v1456_v55, -inf  ;;  %v1459_v19 = vsel %vm182_vm3, %v5721_v57, -1e+30 }
 0xd52   :  { %v1457_v14 = vsel %vm182_vm3, %v1444_v2, -1e+30  ;;  %1461 = vmax.xlane.f32.xlu0 %v1460_v11  ;;  %v1469_v21 = vsel %vm191_vm1, %v1459_v19, -inf }
 0xd53   :  { %v1463_v18 = vsel %vm191_vm1, %v1457_v14, -inf }
 0xd54   :  { %1464 = vmax.xlane.f32.xlu1 %v1463_v18 }
 0xd56   :  { %1467 = vmax.xlane.f32.xlu0 %v1466_v39 }
 0xd5a   :  { %1470 = vmax.xlane.f32.xlu0 %v1469_v21 }
 0xd65   :  { %1508 = vrot.lane.b32.xlu1 %v6840_v62, %s6603_s0 }
 0xddf   :  { %v1462_v24 = vpop.xlane.xlu0 %1461 }
 0xde0   :  { %v1472_v26 = vsub.f32 %v1456_v55, %v1462_v24 }
 0xde1   :  { %v1465_v27 = vpop.xlane.xlu1 %1464 }
 0xde2   :  { %v1476_v30 = vmul.f32 1.442695, %v1472_v26  ;;  %v1473_v31 = vsub.f32 %v1457_v14, %v1465_v27 }
 0xde3   :  { %v1468_v28 = vpop.xlane.xlu0 %1467 }
 0xde4   :  { %v1474_v29 = vsub.f32 %v1458_v13, %v1468_v28  ;;  %v1478_v33 = vmul.f32 1.442695, %v1473_v31 }
 0xde5   :  { %v1509_v11 = vpop.permute.xlu1 %1508 }
 0xde6   :  { %v1480_v25 = vmul.f32 1.442695, %v1474_v29 }
 0xde7   :  { %v1471_v37 = vpop.xlane.xlu0 %1470 }
 0xde8   :  { %6285 = vpow2.f32 %v1480_v25  ;;  %v1475_v38 = vsub.f32 %v1459_v19, %v1471_v37 }
 0xde9   :  { %6287 = vpow2.f32 %v1476_v30 }
 0xdea   :  { %v1482_v42 = vmul.f32 1.442695, %v1475_v38 }
 0xdec   :  { %6289 = vpow2.f32 %v1482_v42 }
 0xded   :  { %6291 = vpow2.f32 %v1478_v33 }
 0xdf2   :  { %v6286_v43 = vpop.eup %6285 }
 0xdf3   :  { %v1490_v45 = vsel %vm191_vm1, %v6286_v43, 0.0  ;;  %v6288_v46 = vpop.eup %6287 }
 0xdf4   :  { %1491 = vadd.xlane.f32.xlu0 %v1490_v45  ;;  %v1484_v54 = vsel %vm191_vm1, %v6288_v46, 0.0 }
 0xdf6   :  { %v6290_v53 = vpop.eup %6289 }
 0xdf7   :  { %v1493_v55 = vsel %vm191_vm1, %v6290_v53, 0.0  ;;  %v6292_v57 = vpop.eup %6291 }
 0xdf8   :  { %1485 = vadd.xlane.f32.xlu0 %v1484_v54  ;;  %1494 = vadd.xlane.f32.xlu1 %v1493_v55  ;;  %v1487_v2 = vsel %vm191_vm1, %v6292_v57, 0.0 }
 0xdfc   :  { %1488 = vadd.xlane.f32.xlu1 %v1487_v2 }
 0xe0d   :  { %1571 = vrot.lane.b32.xlu1 %v6842_v63, %s6604_s30 }
 0xe0e   :  { %1506 = vrot.lane.b32.xlu0 %v6842_v63, %s6603_s0 }
 0xe11   :  { %1573 = vrot.lane.b32.xlu1 %v6840_v62, %s6604_s30 }
 0xe12   :  { %1567 = vrot.lane.b32.xlu0 %v6842_v63, %s6605_s10 }
 0xe15   :  { %1569 = vrot.lane.b32.xlu1 %v6840_v62, %s6605_s10 }
 0xe81   :  { %v1492_v13 = vpop.xlane.xlu0 %1491 }
 0xe85   :  { %v1486_v14 = vpop.xlane.xlu0 %1485  ;;  %v1495_v18 = vpop.xlane.xlu1 %1494 }
 0xe86   :  { %6293 = vrcp.f32 %v1495_v18 }
 0xe87   :  { %6295 = vrcp.f32 %v1486_v14 }
 0xe88   :  { %6297 = vrcp.f32 %v1492_v13 }
 0xe89   :  { %v1507_v39 = vpop.permute.xlu0 %1506  ;;  %v1489_v19 = vpop.xlane.xlu1 %1488 }
 0xe8a   :  { %6299 = vrcp.f32 %v1489_v19  ;;  %5722 = vmatprep.subr.bf16.mxu0 %v1507_v39 }
 0xe8b   :  { %5723 = vmatpush3.bf16.msra.mxu0 %v1507_v39 }
 0xe8c   :  { %5724 = vmatprep.subr.bf16.mxu0 %v1509_v11 }
 0xe8d   :  { %v1572_v21 = vpop.permute.xlu1 %1571  ;;  %v1568_v33 = vpop.permute.xlu0 %1567 }
 0xe8e   :  { %v1582_v42 = vsel %vm430_vm2, %v1572_v21, 0 }
 0xe8f   :  { %5725 = vmatpush3.bf16.msra.mxu0 %v1509_v11 }
 0xe90   :  { %6002 = vmatprep.subr.msk.bf16.mxu0 %vm430_vm2, %v1572_v21  ;;  %v6294_v24 = vpop.eup %6293 }
 0xe91   :  { %v6296_v26 = vpop.eup %6295  ;;  %v1503_v29 = vmul.f32 %v6294_v24, %v6290_v53  ;;  %v1574_v45 = vpop.permute.xlu1 %1573 }
 0xe92   :  { %v6298_v27 = vpop.eup %6297  ;;  %v1500_v30 = vmul.f32 %v6296_v26, %v6288_v46  ;;  %v1585_v53 = vsel %vm430_vm2, %v1574_v45, 0 }
 0xe93   :  { %v1502_v25 = vmul.f32 %v6298_v27, %v6286_v43 }
 0xe94   :  { %v6300_v28 = vpop.eup %6299 }
 0xe95   :  { %v1501_v31 = vmul.f32 %v6300_v28, %v6292_v57  ;;  %v1505_v38 = vpack.c.bf16 %v1503_v29, %v1502_v25  ;;  %v1570_v46 = vpop.permute.xlu1 %1569 }
 0xe97   :  { %v1504_v37 = vpack.c.bf16 %v1501_v31, %v1500_v30 }
 0xe99   :  { %5726 = vmatprep.mubr.msk.bf16.mxu0 %vm191_vm1, %v1504_v37 }
 0xe9a   :  { %5727 = vmatmul.mubr.msk.bf16.vlgmr.msra.gmra.mrb[28].mxu0 %vm191_vm1, %v1505_v38 }
 0xe9b   :  { %5731 = vmatpush3.bf16.xpose.msra.mxu0 %v1582_v42  ;;  %5734 = vmatprep.mubr.msk.bf16.mxu0 %vm430_vm2, %v1568_v33 }
 0xe9c   :  { %6003 = vmatprep.subr.msk.bf16.mxu0 %vm430_vm2, %v1574_v45 }
 0xea3   :  { %5733 = vmatpush3.bf16.xpose.msra.mxu0 %v1585_v53 }
 0xeaa   :  { %5735 = vmatmul.mubr.msk.bf16.vlgmr.msra.gmra.mrb[32].mxu0 %vm430_vm2, %v1570_v46 }
 0xf6d   :  { %v7119_v43 = vpop.f32.mrb[28].mxu0 }
 0xf6e   :  { %v7121_v54 = vpop.f32.mrb[29].mxu0 }
 0xf6f   :  { %v7123_v55 = vpop.f32.mrb[30].mxu0 }
 0xf70   :  { %v6074_v57 = vpack.i.bf16 %v7123_v55, %v7119_v43  ;;  %v7127_v2 = vpop.f32.mrb[31].mxu0  ;;  %v6171_v43 = vld [vmem:[%s8396_s5] sm:$0xff]  }
 0xf71   :  { %v6069_v11 = vpack.i.bf16 %v7127_v2, %v7121_v54  ;;  %v6172_v54 = vld [vmem:[%s8396_s5 + $0x8] sm:$0xff]  }
 0xf7d   :  { %v5736_v13 = vpop.f32.mrb[32].mxu0 }
 0xf7e   :  { %v1621_v14 = vpop.f32.mrb[33].mxu0  ;;  %v1638_v24 = vsel %vm182_vm3, %v5736_v13, -1e+30 }
 0xf7f   :  { %v1636_v18 = vsel %vm182_vm3, %v1621_v14, -1e+30  ;;  %v5737_v39 = vpop.f32.mrb[34].mxu0  ;;  %v1646_v28 = vsel %vm191_vm1, %v1638_v24, -inf }
 0xf80   :  { %v1640_v19 = vsel %vm191_vm1, %v1636_v18, -inf  ;;  %v1624_v21 = vpop.f32.mrb[35].mxu0  ;;  %v1639_v29 = vsel %vm182_vm3, %v5737_v39, -1e+30 }
 0xf81   :  { %v1637_v26 = vsel %vm182_vm3, %v1624_v21, -1e+30  ;;  %1641 = vmax.xlane.f32.xlu0 %v1640_v19  ;;  %v1649_v30 = vsel %vm191_vm1, %v1639_v29, -inf }
 0xf82   :  { %v1643_v27 = vsel %vm191_vm1, %v1637_v26, -inf }
 0xf83   :  { %1644 = vmax.xlane.f32.xlu1 %v1643_v27 }
 0xf85   :  { %1647 = vmax.xlane.f32.xlu0 %v1646_v28 }
 0xf89   :  { %1650 = vmax.xlane.f32.xlu0 %v1649_v30 }
 0xf94   :  { %1688 = vrot.lane.b32.xlu1 %v6840_v62, %s6606_s11 }
0x100e   :  { %v1642_v31 = vpop.xlane.xlu0 %1641 }
0x100f   :  { %v1652_v25 = vsub.f32 %v1636_v18, %v1642_v31 }
0x1010   :  { %v1645_v37 = vpop.xlane.xlu1 %1644 }
0x1011   :  { %v1656_v42 = vmul.f32 1.442695, %v1652_v25  ;;  %v1653_v45 = vsub.f32 %v1637_v26, %v1645_v37 }
0x1012   :  { %v1648_v38 = vpop.xlane.xlu0 %1647 }
0x1013   :  { %v1654_v33 = vsub.f32 %v1638_v24, %v1648_v38  ;;  %v1658_v14 = vmul.f32 1.442695, %v1653_v45 }
0x1014   :  { %v1689_v30 = vpop.permute.xlu1 %1688 }
0x1015   :  { %v1660_v53 = vmul.f32 1.442695, %v1654_v33 }
0x1016   :  { %v1651_v46 = vpop.xlane.xlu0 %1650 }
0x1017   :  { %6301 = vpow2.f32 %v1660_v53  ;;  %v1655_v13 = vsub.f32 %v1639_v29, %v1651_v46 }
0x1018   :  { %6303 = vpow2.f32 %v1656_v42 }
0x1019   :  { %v1662_v39 = vmul.f32 1.442695, %v1655_v13 }
0x101b   :  { %6305 = vpow2.f32 %v1662_v39 }
0x101c   :  { %6307 = vpow2.f32 %v1658_v14 }
0x1021   :  { %v6302_v19 = vpop.eup %6301 }
0x1022   :  { %v1670_v21 = vsel %vm191_vm1, %v6302_v19, 0.0  ;;  %v6304_v27 = vpop.eup %6303 }
0x1023   :  { %1671 = vadd.xlane.f32.xlu0 %v1670_v21  ;;  %v1664_v28 = vsel %vm191_vm1, %v6304_v27, 0.0 }
0x1025   :  { %v6306_v18 = vpop.eup %6305 }
0x1026   :  { %v1673_v24 = vsel %vm191_vm1, %v6306_v18, 0.0  ;;  %v6308_v26 = vpop.eup %6307 }
0x1027   :  { %1665 = vadd.xlane.f32.xlu0 %v1664_v28  ;;  %1674 = vadd.xlane.f32.xlu1 %v1673_v24  ;;  %v1667_v29 = vsel %vm191_vm1, %v6308_v26, 0.0 }
0x102b   :  { %1668 = vadd.xlane.f32.xlu1 %v1667_v29 }
0x103c   :  { %1751 = vrot.lane.b32.xlu1 %v6842_v63, %s6607_s12 }
0x103d   :  { %1686 = vrot.lane.b32.xlu0 %v6842_v63, %s6606_s11 }
0x1040   :  { %1753 = vrot.lane.b32.xlu1 %v6840_v62, %s6607_s12 }
0x1041   :  { %1747 = vrot.lane.b32.xlu0 %v6842_v63, %s6608_s13 }
0x1044   :  { %1749 = vrot.lane.b32.xlu1 %v6840_v62, %s6608_s13 }
0x10b0   :  { %v1672_v31 = vpop.xlane.xlu0 %1671 }
0x10b4   :  { %v1666_v25 = vpop.xlane.xlu0 %1665  ;;  %v1675_v37 = vpop.xlane.xlu1 %1674 }
0x10b5   :  { %6309 = vrcp.f32 %v1675_v37 }
0x10b6   :  { %6311 = vrcp.f32 %v1666_v25 }
0x10b7   :  { %6313 = vrcp.f32 %v1672_v31 }
0x10b8   :  { %v1687_v38 = vpop.permute.xlu0 %1686  ;;  %v1669_v33 = vpop.xlane.xlu1 %1668 }
0x10b9   :  { %6315 = vrcp.f32 %v1669_v33  ;;  %5738 = vmatprep.subr.bf16.mxu1 %v1687_v38 }
0x10ba   :  { %5739 = vmatpush3.bf16.msra.mxu1 %v1687_v38 }
0x10bb   :  { %5740 = vmatprep.subr.bf16.mxu1 %v1689_v30 }
0x10bc   :  { %v1752_v42 = vpop.permute.xlu1 %1751  ;;  %v1748_v31 = vpop.permute.xlu0 %1747 }
0x10bd   :  { %v1762_v25 = vsel %vm430_vm2, %v1752_v42, 0 }
0x10be   :  { %5741 = vmatpush3.bf16.msra.mxu1 %v1689_v30 }
0x10bf   :  { %6004 = vmatprep.subr.msk.bf16.mxu1 %vm430_vm2, %v1752_v42  ;;  %v6310_v45 = vpop.eup %6309 }
0x10c0   :  { %v6312_v53 = vpop.eup %6311  ;;  %v1683_v14 = vmul.f32 %v6310_v45, %v6306_v18  ;;  %v1754_v30 = vpop.permute.xlu1 %1753 }
0x10c1   :  { %v6314_v46 = vpop.eup %6313  ;;  %v1680_v39 = vmul.f32 %v6312_v53, %v6304_v27  ;;  %v1765_v18 = vsel %vm430_vm2, %v1754_v30, 0 }
0x10c2   :  { %v1682_v28 = vmul.f32 %v6314_v46, %v6302_v19 }
0x10c3   :  { %v6316_v13 = vpop.eup %6315 }
0x10c4   :  { %v1681_v21 = vmul.f32 %v6316_v13, %v6308_v26  ;;  %v1685_v29 = vpack.c.bf16 %v1683_v14, %v1682_v28  ;;  %v1750_v27 = vpop.permute.xlu1 %1749 }
0x10c6   :  { %v1684_v24 = vpack.c.bf16 %v1681_v21, %v1680_v39 }
0x10c8   :  { %5742 = vmatprep.mubr.msk.bf16.mxu1 %vm191_vm1, %v1684_v24 }
0x10c9   :  { %5743 = vmatmul.mubr.msk.bf16.vlgmr.msra.gmra.mrb[32].mxu1 %vm191_vm1, %v1685_v29 }
0x10ca   :  { %5747 = vmatpush3.bf16.xpose.msra.mxu1 %v1762_v25  ;;  %5750 = vmatprep.mubr.msk.bf16.mxu1 %vm430_vm2, %v1748_v31 }
0x10cb   :  { %6005 = vmatprep.subr.msk.bf16.mxu1 %vm430_vm2, %v1754_v30 }
0x10d2   :  { %5749 = vmatpush3.bf16.xpose.msra.mxu1 %v1765_v18 }
0x10d3   :  { %5774 = vmatprep.subr.bf16.mxu1 %v6171_v43 }
0x10d9   :  { %5751 = vmatmul.mubr.msk.bf16.vlgmr.msra.gmra.mrb[36].mxu1 %vm430_vm2, %v1750_v27 }
0x10da   :  { %5775 = vmatpush3.bf16.msra.mxu1 %v6171_v43 }
0x10db   :  { %5776 = vmatprep.subr.bf16.mxu1 %v6172_v54 }
0x10de   :  { %5777 = vmatpush3.bf16.msra.mxu1 %v6172_v54 }
0x119c   :  { %v7167_v19 = vpop.f32.mrb[32].mxu1 }
0x119d   :  { %v7169_v26 = vpop.f32.mrb[33].mxu1 }
0x119e   :  { %v7171_v37 = vpop.f32.mrb[34].mxu1 }
0x119f   :  { %v6084_v38 = vpack.i.bf16 %v7171_v37, %v7167_v19  ;;  %v7175_v33 = vpop.f32.mrb[35].mxu1 }
0x11a0   :  { %v6079_v42 = vpack.i.bf16 %v7175_v33, %v7169_v26 }
0x11ac   :  { %v5752_v45 = vpop.f32.mrb[36].mxu1 }
0x11ad   :  { %v1801_v53 = vpop.f32.mrb[37].mxu1  ;;  %v1818_v21 = vsel %vm182_vm3, %v5752_v45, -1e+30 }
0x11ae   :  { %v1816_v46 = vsel %vm182_vm3, %v1801_v53, -1e+30  ;;  %v5753_v13 = vpop.f32.mrb[38].mxu1  ;;  %v1826_v29 = vsel %vm191_vm1, %v1818_v21, -inf }
0x11af   :  { %v1820_v14 = vsel %vm191_vm1, %v1816_v46, -inf  ;;  %v1804_v39 = vpop.f32.mrb[39].mxu1  ;;  %v1819_v31 = vsel %vm182_vm3, %v5753_v13, -1e+30 }
0x11b0   :  { %v1817_v28 = vsel %vm182_vm3, %v1804_v39, -1e+30  ;;  %1821 = vmax.xlane.f32.xlu0 %v1820_v14  ;;  %v1829_v25 = vsel %vm191_vm1, %v1819_v31, -inf }
0x11b1   :  { %v1823_v24 = vsel %vm191_vm1, %v1817_v28, -inf }
0x11b2   :  { %1824 = vmax.xlane.f32.xlu1 %v1823_v24  ;;  %v6169_v24 = vld [vmem:[%s8395_s4] sm:$0xff]  }
0x11b4   :  { %1827 = vmax.xlane.f32.xlu0 %v1826_v29 }
0x11b8   :  { %1830 = vmax.xlane.f32.xlu0 %v1829_v25 }
0x11c3   :  { %1868 = vrot.lane.b32.xlu1 %v6840_v62, %s6609_s14 }
0x11c7   :  { %6040 = vrot.lane.b32.xlu1 %v6039_v10, %s6610_s15 }
0x11cb   :  { %6045 = vrot.lane.b32.xlu1 %v6044_v8, %s6610_s15 }
0x11ce   :  { %1866 = vrot.lane.b32.xlu0 %v6842_v63, %s6609_s14 }
0x11cf   :  { %6055 = vrot.lane.b32.xlu1 %v6054_v16, %s6611_s16 }
0x123d   :  { %v1822_v62 = vpop.xlane.xlu0 %1821 }
0x123e   :  { %v1832_v30 = vsub.f32 %v1816_v46, %v1822_v62 }
0x123f   :  { %v1825_v18 = vpop.xlane.xlu1 %1824 }
0x1240   :  { %v1836_v9 = vmul.f32 1.442695, %v1832_v30  ;;  %v1833_v10 = vsub.f32 %v1817_v28, %v1825_v18 }
0x1241   :  { %v1828_v27 = vpop.xlane.xlu0 %1827 }
0x1242   :  { %v1834_v6 = vsub.f32 %v1818_v21, %v1828_v27  ;;  %v1838_v7 = vmul.f32 1.442695, %v1833_v10 }
0x1243   :  { %v1869_v13 = vpop.permute.xlu1 %1868 }
0x1244   :  { %v1840_v45 = vmul.f32 1.442695, %v1834_v6 }
0x1245   :  { %v1831_v53 = vpop.xlane.xlu0 %1830 }
0x1246   :  { %6317 = vpow2.f32 %v1840_v45  ;;  %v1835_v5 = vsub.f32 %v1819_v31, %v1831_v53 }
0x1247   :  { %6319 = vpow2.f32 %v1836_v9  ;;  %v6041_v29 = vpop.permute.xlu1 %6040 }
0x1248   :  { %v1842_v63 = vmul.f32 1.442695, %v1835_v5  ;;  %v6043_v62 = vunpack.i.h.bf16 %v6041_v29  ;;  %v6042_v23 = vunpack.i.l.bf16 %v6041_v29 }
0x1249   :  { %v1867_v8 = vpop.permute.xlu0 %1866 }
0x124a   :  { %6321 = vpow2.f32 %v1842_v63  ;;  %5754 = vmatprep.subr.bf16.mxu0 %v1867_v8  ;;  %v1194_v6 = vsel %vm430_vm2, %v6931_v4, %v6043_v62  ;;  %v1193_v9 = vsel %vm430_vm2, %v6927_v40, %v6042_v23 }
0x124b   :  { %5755 = vmatpush3.bf16.msra.mxu0 %v1867_v8  ;;  %6323 = vpow2.f32 %v1838_v7  ;;  %v6046_v31 = vpop.permute.xlu1 %6045 }
0x124c   :  { %5756 = vmatprep.subr.bf16.mxu0 %v1869_v13  ;;  %v6048_v35 = vunpack.i.h.bf16 %v6046_v31 }
0x124e   :  { %v1196_v10 = vsel %vm430_vm2, %v6929_v3, %v6048_v35 }
0x124f   :  { %5757 = vmatpush3.bf16.msra.mxu0 %v1869_v13  ;;  %v6056_v25 = vpop.permute.xlu1 %6055 }
0x1250   :  { %v7207_v22 = vpop.eup %6317  ;;  %5762 = vmatprep.subr.bf16.mxu0 %v6169_v24  ;;  %v6057_v30 = vunpack.i.l.bf16 %v6056_v25 }
0x1251   :  { %v1850_v34 = vsel %vm191_vm1, %v7207_v22, 0.0  ;;  %v7211_v16 = vpop.eup %6319 }
0x1252   :  { %1851 = vadd.xlane.f32.xlu0 %v1850_v34  ;;  %v1844_v14 = vsel %vm191_vm1, %v7211_v16, 0.0 }
0x1254   :  { %v6322_v46 = vpop.eup %6321 }
0x1255   :  { %v1853_v39 = vsel %vm191_vm1, %v6322_v46, 0.0  ;;  %v6324_v21 = vpop.eup %6323 }
0x1256   :  { %1845 = vadd.xlane.f32.xlu0 %v1844_v14  ;;  %1854 = vadd.xlane.f32.xlu1 %v1853_v39  ;;  %v1847_v28 = vsel %vm191_vm1, %v6324_v21, 0.0 }
0x125a   :  { %1848 = vadd.xlane.f32.xlu1 %v1847_v28 }
0x126b   :  { %6065 = vrot.lane.b32.xlu1 %v6064_v32, %s6612_s17 }
0x126c   :  { %6050 = vrot.lane.b32.xlu0 %v6049_v36, %s6611_s16  ;;  %v6047_v36 = vunpack.i.l.bf16 %v6046_v31 }
0x126e   :  { %v1195_v45 = vsel %vm430_vm2, %v6925_v0, %v6047_v36 }
0x126f   :  { %v1200_v34 = vsel %vm1197_vm4, %v1195_v45, %v6057_v30 }
0x1270   :  { %6060 = vrot.lane.b32.xlu0 %v6059_v61, %s6612_s17  ;;  %v6058_v61 = vunpack.i.h.bf16 %v6056_v25 }
0x1272   :  { %v1201_v4 = vsel %vm1197_vm4, %v1196_v10, %v6058_v61  ;;  %v6170_v61 = vld [vmem:[%s8395_s4 + $0x8] sm:$0xff]  }
0x12df   :  { %v1852_v41 = vpop.xlane.xlu0 %1851 }
0x12e3   :  { %v1846_v59 = vpop.xlane.xlu0 %1845  ;;  %v1855_v32 = vpop.xlane.xlu1 %1854 }
0x12e4   :  { %6325 = vrcp.f32 %v1855_v32 }
0x12e5   :  { %6327 = vrcp.f32 %v1846_v59 }
0x12e6   :  { %6329 = vrcp.f32 %v1852_v41 }
0x12e7   :  { %v6051_v58 = vpop.permute.xlu0 %6050  ;;  %v1849_v60 = vpop.xlane.xlu1 %1848 }
0x12e8   :  { %6331 = vrcp.f32 %v1849_v60  ;;  %v6053_v18 = vunpack.i.h.bf16 %v6051_v58  ;;  %v6052_v27 = vunpack.i.l.bf16 %v6051_v58 }
0x12ea   :  { %v1198_v14 = vsel %vm1197_vm4, %v1193_v9, %v6052_v27  ;;  %v1199_v40 = vsel %vm1197_vm4, %v1194_v6, %v6053_v18  ;;  %v7260_v6 = vld [vmem:[%s8398_s7 + $0x4] ss:$0 sm:$0xff] }
0x12eb   :  { %v6061_v53 = vpop.permute.xlu0 %6060  ;;  %v6066_v5 = vpop.permute.xlu1 %6065 }
0x12ec   :  { %v6063_v7 = vunpack.i.h.bf16 %v6061_v53  ;;  %v6062_v63 = vunpack.i.l.bf16 %v6061_v53  ;;  %v6068_v8 = vunpack.i.h.bf16 %v6066_v5  ;;  %v6067_v13 = vunpack.i.l.bf16 %v6066_v5 }
0x12ee   :  { %v1203_v3 = vsel %vm1202_vm5, %v1198_v14, %v6062_v63  ;;  %v1204_v39 = vsel %vm1202_vm5, %v1199_v40, %v6063_v7  ;;  %v1205_v0 = vsel %vm1202_vm5, %v1200_v34, %v6067_v13  ;;  %v1206_v28 = vsel %vm1202_vm5, %v1201_v4, %v6068_v8  ;;  %v6326_v29 = vpop.eup %6325 }
0x12ef   :  { %v1988_v31 = vpack.c.bf16 %v1206_v28, %v1205_v0  ;;  %v1987_v25 = vpack.c.bf16 %v1204_v39, %v1203_v3  ;;  %v6328_v41 = vpop.eup %6327  ;;  %v1863_v62 = vmul.f32 %v6326_v29, %v6322_v46 }
0x12f0   :  { %v6330_v59 = vpop.eup %6329  ;;  %v1860_v23 = vmul.f32 %v6328_v41, %v7211_v16 }
0x12f1   :  { %v1862_v36 = vmul.f32 %v6330_v59, %v7207_v22 }
0x12f2   :  { %v6332_v32 = vpop.eup %6331 }
0x12f3   :  { %v1861_v35 = vmul.f32 %v6332_v32, %v6324_v21  ;;  %v1865_v60 = vpack.c.bf16 %v1863_v62, %v1862_v36 }
0x12f5   :  { %v1864_v58 = vpack.c.bf16 %v1861_v35, %v1860_v23 }
0x12f7   :  { %5758 = vmatprep.mubr.msk.bf16.mxu0 %vm191_vm1, %v1864_v58 }
0x12f8   :  { %5759 = vmatmul.mubr.msk.bf16.vlgmr.msra.gmra.mrb[36].mxu0 %vm191_vm1, %v1865_v60 }
0x12f9   :  { %5763 = vmatpush3.bf16.msra.mxu0 %v6169_v24  ;;  %5766 = vmatprep.mubr.msk.bf16.mxu0 %vm191_vm1, %v1987_v25 }
0x12fa   :  { %5764 = vmatprep.subr.bf16.mxu0 %v6170_v61 }
0x12fd   :  { %5765 = vmatpush3.bf16.msra.mxu0 %v6170_v61 }
0x1300   :  { %5767 = vmatmul.mubr.msk.bf16.vlgmr.msra.gmra.mrb[40].mxu0 %vm191_vm1, %v1988_v31 }
0x13cb   :  { %v5760_v16 = vpop.f32.mrb[36].mxu0 }
0x13cc   :  { %v1912_v46 = vpop.f32.mrb[37].mxu0 }
0x13cd   :  { %v5761_v22 = vpop.f32.mrb[38].mxu0 }
0x13ce   :  { %v6094_v21 = vpack.i.bf16 %v5761_v22, %v5760_v16  ;;  %v1915_v30 = vpop.f32.mrb[39].mxu0 }
0x13cf   :  { %v6089_v18 = vpack.i.bf16 %v1915_v30, %v1912_v46 }
0x13d3   :  { %v5768_v27 = vpop.f32.mrb[40].mxu0 }
0x13d4   :  { %v2053_v9 = vpop.f32.mrb[41].mxu0  ;;  %v2086_v24 = vadd.f32 %v5768_v27, %v6703_v12 }
0x13d5   :  { %v2084_v10 = vadd.f32 %v2053_v9, %v6708_v15  ;;  %v5769_v45 = vpop.f32.mrb[42].mxu0  ;;  %v7329_v9 = vld [vmem:[%s8398_s7 + $0x2] ss:$0 sm:$0xff] }
0x13d6   :  { %v2056_v53 = vpop.f32.mrb[43].mxu0  ;;  %v7269_v63 = vadd.f32 %v7260_v6, %v2086_v24  ;;  %v2087_v8 = vadd.f32 %v5769_v45, %v6710_v17 }
0x13d7   :  { %v7265_v5 = vadd.f32 %v7260_v6, %v2084_v10  ;;  %v2085_v7 = vadd.f32 %v2056_v53, %v6714_v20 }
0x13d8   :  { %v7280_v34 = vadd.f32 %v7260_v6, %v2087_v8  ;;  %v2110_v20 = vsel %vm191_vm1, %v7269_v63, 0.0 }
0x13d9   :  { %v7273_v13 = vadd.f32 %v7260_v6, %v2085_v7  ;;  %v2104_v12 = vsel %vm191_vm1, %v7265_v5, 0.0 }
0x13da   :  { %2105 = vadd.xlane.f32.xlu0 %v2104_v12  ;;  %v2113_v17 = vsel %vm191_vm1, %v7280_v34, 0.0 }
0x13db   :  { %v2107_v15 = vsel %vm191_vm1, %v7273_v13, 0.0 }
0x13dc   :  { %2108 = vadd.xlane.f32.xlu1 %v2107_v15 }
0x13de   :  { %2111 = vadd.xlane.f32.xlu0 %v2110_v20 }
0x13e2   :  { %2114 = vadd.xlane.f32.xlu0 %v2113_v17 }
0x1467   :  { %v2106_v4 = vpop.xlane.xlu0 %2105 }
0x1468   :  { %v2128_v14 = vmul.f32 0.03125, %v2106_v4 }
0x1469   :  { %v2109_v40 = vpop.xlane.xlu1 %2108 }
0x146a   :  { %v2136_v3 = vsub.f32 %v7265_v5, %v2128_v14  ;;  %v2129_v39 = vmul.f32 0.03125, %v2109_v40 }
0x146b   :  { %v2112_v0 = vpop.xlane.xlu0 %2111 }
0x146c   :  { %v2137_v28 = vsub.f32 %v7273_v13, %v2129_v39  ;;  %v2130_v29 = vmul.f32 0.03125, %v2112_v0  ;;  %v2144_v31 = vmul.f32 %v2136_v3, %v2136_v3 }
0x146e   :  { %v7289_v25 = vsub.f32 %v7269_v63, %v2130_v29  ;;  %v2152_v41 = vsel %vm191_vm1, %v2144_v31, 0.0  ;;  %v2145_v59 = vmul.f32 %v2137_v28, %v2137_v28 }
0x146f   :  { %2153 = vadd.xlane.f32.xlu0 %v2152_v41  ;;  %v2115_v32 = vpop.xlane.xlu0 %2114 }
0x1470   :  { %v2131_v62 = vmul.f32 0.03125, %v2115_v32  ;;  %v2155_v23 = vsel %vm191_vm1, %v2145_v59, 0.0  ;;  %v2146_v35 = vmul.f32 %v7289_v25, %v7289_v25 }
0x1471   :  { %2156 = vadd.xlane.f32.xlu1 %v2155_v23 }
0x1472   :  { %v7296_v36 = vsub.f32 %v7280_v34, %v2131_v62  ;;  %v2158_v58 = vsel %vm191_vm1, %v2146_v35, 0.0 }
0x1473   :  { %2159 = vadd.xlane.f32.xlu0 %v2158_v58 }
0x1474   :  { %v2147_v60 = vmul.f32 %v7296_v36, %v7296_v36 }
0x1476   :  { %v2161_v61 = vsel %vm191_vm1, %v2147_v60, 0.0 }
0x1477   :  { %2162 = vadd.xlane.f32.xlu1 %v2161_v61 }
0x1488   :  { %6075 = vrot.lane.b32.xlu1 %v6074_v57, %s6610_s15 }
0x1489   :  { %6070 = vrot.lane.b32.xlu0 %v6069_v11, %s6610_s15 }
0x148c   :  { %6080 = vrot.lane.b32.xlu1 %v6079_v42, %s6611_s16 }
0x148d   :  { %6090 = vrot.lane.b32.xlu0 %v6089_v18, %s6612_s17 }
0x1490   :  { %6085 = vrot.lane.b32.xlu1 %v6084_v38, %s6611_s16 }
0x1494   :  { %6095 = vrot.lane.b32.xlu1 %v6094_v21, %s6612_s17 }
0x14fc   :  { %v2154_v55 = vpop.xlane.xlu0 %2153 }
0x14fd   :  { %v2176_v57 = vmul.f32 0.03125, %v2154_v55 }
0x14fe   :  { %v2157_v2 = vpop.xlane.xlu1 %2156 }
0x14ff   :  { %v2184_v11 = vadd.f32 1e-05, %v2176_v57  ;;  %v2177_v19 = vmul.f32 0.03125, %v2157_v2 }
0x1500   :  { %v2160_v26 = vpop.xlane.xlu0 %2159 }
0x1501   :  { %6333 = vrsqrt.f32 %v2184_v11  ;;  %v2185_v37 = vadd.f32 1e-05, %v2177_v19  ;;  %v2178_v38 = vmul.f32 0.03125, %v2160_v26 }
0x1503   :  { %6335 = vrsqrt.f32 %v2185_v37  ;;  %v2186_v33 = vadd.f32 1e-05, %v2178_v38 }
0x1504   :  { %v2163_v42 = vpop.xlane.xlu1 %2162  ;;  %v6071_v16 = vpop.permute.xlu0 %6070 }
0x1505   :  { %6337 = vrsqrt.f32 %v2186_v33  ;;  %v2179_v46 = vmul.f32 0.03125, %v2163_v42  ;;  %v6073_v30 = vunpack.i.h.bf16 %v6071_v16  ;;  %v6072_v18 = vunpack.i.l.bf16 %v6071_v16  ;;  %v6173_v16 = vld [vmem:[%s8397_s6] sm:$0xff]  }
0x1506   :  { %5786 = vmatprep.subr.bf16.mxu0 %v6173_v16 }
0x1507   :  { %v2187_v22 = vadd.f32 1e-05, %v2179_v46  ;;  %v1976_v7 = vsel %vm430_vm2, %v7081_v50, %v6073_v30  ;;  %v1975_v8 = vsel %vm430_vm2, %v7077_v48, %v6072_v18  ;;  %5787 = vmatpush3.bf16.msra.mxu0 %v6173_v16  ;;  %v6174_v46 = vld [vmem:[%s8397_s6 + $0x8] sm:$0xff]   ;;  %v7381_v18 = vld [vmem:[%s8398_s7 + $0x6] ss:$0 sm:$0xff] }
0x1508   :  { %v6076_v21 = vpop.permute.xlu1 %6075  ;;  %v6091_v24 = vpop.permute.xlu0 %6090  ;;  %5788 = vmatprep.subr.bf16.mxu0 %v6174_v46 }
0x1509   :  { %6339 = vrsqrt.f32 %v2187_v22  ;;  %v6093_v20 = vunpack.i.h.bf16 %v6091_v24  ;;  %v6092_v17 = vunpack.i.l.bf16 %v6091_v24  ;;  %v6078_v41 = vunpack.i.h.bf16 %v6076_v21  ;;  %v6175_v22 = vld [vmem:[%s8397_s6 + $0x10] sm:$0xff]  }
0x150a   :  { %v6077_v59 = vunpack.i.l.bf16 %v6076_v21  ;;  %v6176_v21 = vld [vmem:[%s8397_s6 + $0x18] sm:$0xff]  }
0x150b   :  { %v6334_v27 = vpop.eup %6333  ;;  %v1978_v55 = vsel %vm430_vm2, %v7079_v49, %v6078_v41  ;;  %5789 = vmatpush3.bf16.msra.mxu0 %v6174_v46 }
0x150c   :  { %v6081_v10 = vpop.permute.xlu1 %6080  ;;  %v2200_v45 = vmul.f32 %v6334_v27, %v2136_v3  ;;  %v7341_v3 = vld [vmem:[%s8398_s7 + $0x3] ss:$0 sm:$0xff]  ;;  %v1977_v57 = vsel %vm430_vm2, %v7075_v47, %v6077_v59  ;;  %5790 = vmatprep.subr.bf16.mxu0 %v6175_v22 }
0x150d   :  { %v6336_v53 = vpop.eup %6335  ;;  %v6083_v12 = vunpack.i.h.bf16 %v6081_v10  ;;  %v6082_v15 = vunpack.i.l.bf16 %v6081_v10 }
0x150e   :  { %v2201_v4 = vmul.f32 %v6336_v53, %v2137_v28  ;;  %v2212_v14 = vmul.f32 %v7329_v9, %v2200_v45 }
0x150f   :  { %v6338_v40 = vpop.eup %6337  ;;  %v1980_v39 = vsel %vm1197_vm4, %v1976_v7, %v6083_v12  ;;  %v1979_v0 = vsel %vm1197_vm4, %v1975_v8, %v6082_v15  ;;  %5791 = vmatpush3.bf16.msra.mxu0 %v6175_v22 }
0x1510   :  { %v2202_v50 = vmul.f32 %v6338_v40, %v7289_v25  ;;  %v6086_v48 = vpop.permute.xlu1 %6085  ;;  %v1983_v29 = vsel %vm1202_vm5, %v1979_v0, %v6092_v17  ;;  %v1984_v31 = vsel %vm1202_vm5, %v1980_v39, %v6093_v20  ;;  %v2213_v28 = vmul.f32 %v7329_v9, %v2201_v4  ;;  %5792 = vmatprep.subr.bf16.mxu0 %v6176_v21 }
0x1511   :  { %v1989_v32 = vpack.c.bf16 %v1984_v31, %v1983_v29  ;;  %v6088_v62 = vunpack.i.h.bf16 %v6086_v48  ;;  %v6087_v23 = vunpack.i.l.bf16 %v6086_v48  ;;  %v2224_v35 = vadd.f32 %v7341_v3, %v2212_v14 }
0x1512   :  { %v2225_v58 = vadd.f32 %v7341_v3, %v2213_v28  ;;  %v2214_v25 = vmul.f32 %v7329_v9, %v2202_v50 }
0x1513   :  { %v6340_v60 = vpop.eup %6339  ;;  %5770 = vmatprep.mubr.msk.bf16.mxu0 %vm191_vm1, %v1989_v32  ;;  %v1981_v26 = vsel %vm1197_vm4, %v1977_v57, %v6087_v23  ;;  %v1982_v37 = vsel %vm1197_vm4, %v1978_v55, %v6088_v62  ;;  %5793 = vmatpush3.bf16.msra.mxu0 %v6176_v21 }
0x1514   :  { %v2203_v61 = vmul.f32 %v6340_v60, %v7296_v36  ;;  %v6096_v43 = vpop.permute.xlu1 %6095  ;;  %v2232_v54 = vpack.c.bf16 %v2225_v58, %v2224_v35  ;;  %v2226_v49 = vadd.f32 %v7341_v3, %v2214_v25 }
0x1515   :  { %v6098_v2 = vunpack.i.h.bf16 %v6096_v43  ;;  %v6097_v11 = vunpack.i.l.bf16 %v6096_v43 }
0x1516   :  { %v2215_v19 = vmul.f32 %v7329_v9, %v2203_v61  ;;  %5778 = vmatprep.mubr.msk.bf16.mxu1 %vm191_vm1, %v2232_v54 }
0x1517   :  { %v1985_v36 = vsel %vm1202_vm5, %v1981_v26, %v6097_v11  ;;  %v1986_v38 = vsel %vm1202_vm5, %v1982_v37, %v6098_v2 }
0x1518   :  { %v1990_v33 = vpack.c.bf16 %v1986_v38, %v1985_v36  ;;  %v2227_v42 = vadd.f32 %v7341_v3, %v2215_v19 }
0x151a   :  { %5771 = vmatmul.mubr.msk.bf16.gmra.mrb[44].mxu0 %vm191_vm1, %v1990_v33  ;;  %v2233_v47 = vpack.c.bf16 %v2227_v42, %v2226_v49 }
0x151c   :  { %5779 = vmatmul.mubr.msk.bf16.vlgmr.msra.gmra.mrb[40].mxu1 %vm191_vm1, %v2233_v47 }
0x15ed   :  { %v5772_v30 = vpop.f32.mrb[44].mxu0 }
0x15ee   :  { %v2069_v27 = vpop.f32.mrb[45].mxu0  ;;  %v2090_v41 = vadd.f32 %v5772_v30, %v6756_v51 }
0x15ef   :  { %v5773_v24 = vpop.f32.mrb[46].mxu0  ;;  %v5780_v10 = vpop.f32.mrb[40].mxu1  ;;  %v2088_v40 = vadd.f32 %v2069_v27, %v6742_v44 }
0x15f0   :  { %v7384_v45 = vadd.f32 %v5780_v10, %v7381_v18  ;;  %v2072_v53 = vpop.f32.mrb[47].mxu0  ;;  %v2302_v7 = vpop.f32.mrb[41].mxu1  ;;  %v7421_v25 = vadd.f32 %v7260_v6, %v2090_v41  ;;  %v2091_v51 = vadd.f32 %v5773_v24, %v6766_v56 }
0x15f1   :  { %v7387_v8 = vadd.f32 %v7381_v18, %v2302_v7  ;;  %v5781_v12 = vpop.f32.mrb[42].mxu1  ;;  %v2089_v0 = vadd.f32 %v2072_v53, %v6758_v52  ;;  %v7415_v32 = vadd.f32 %v7260_v6, %v2088_v40 }
0x15f2   :  { %v7390_v15 = vmul.f32 0.70710677, %v7384_v45  ;;  %v7393_v20 = vadd.f32 %v5781_v12, %v7381_v18  ;;  %v2305_v17 = vpop.f32.mrb[43].mxu1  ;;  %v7429_v55 = vadd.f32 %v7260_v6, %v2091_v51  ;;  %v2122_v2 = vsel %vm191_vm1, %v7421_v25, 0.0 }
0x15f3   :  { %v7396_v4 = vmul.f32 0.70710677, %v7387_v8  ;;  %v7399_v14 = vadd.f32 %v7381_v18, %v2305_v17  ;;  %v7418_v62 = vadd.f32 %v7260_v6, %v2089_v0  ;;  %v2116_v43 = vsel %vm191_vm1, %v7415_v32, 0.0 }
0x15f4   :  { %v2351_v39 = vand.u32 2147483647, %v7390_v15  ;;  %v7405_v50 = vmul.f32 0.70710677, %v7393_v20  ;;  %2117 = vadd.xlane.f32.xlu0 %v2116_v43  ;;  %v2125_v37 = vsel %vm191_vm1, %v7429_v55, 0.0  ;;  %vm2503_vm6 = vcmp.ge.f32.partialorder %v7390_v15, 0.0 }
0x15f5   :  { %v2349_v48 = vand.u32 2147483647, %v7396_v4  ;;  %v7409_v29 = vmul.f32 0.70710677, %v7399_v14  ;;  %v2119_v54 = vsel %vm191_vm1, %v7418_v62, 0.0  ;;  %vm2501_vm7 = vcmp.ge.f32.partialorder %v7396_v4, 0.0 }
0x15f6   :  { %v2359_v31 = vmul.f32 0.3275911, %v2351_v39  ;;  %v2352_v28 = vand.u32 2147483647, %v7405_v50  ;;  %2120 = vadd.xlane.f32.xlu1 %v2119_v54  ;;  %v2455_v57 = vsub.f32 0.0, %v2351_v39  ;;  %vm2504_vm8 = vcmp.ge.f32.partialorder %v7405_v50, 0.0 }
0x15f7   :  { %v2357_v59 = vmul.f32 0.3275911, %v2349_v48  ;;  %v2350_v44 = vand.u32 2147483647, %v7409_v29  ;;  %v2453_v11 = vsub.f32 0.0, %v2349_v48  ;;  %vm2502_vm9 = vcmp.ge.f32.partialorder %v7409_v29, 0.0 }
0x15f8   :  { %v2367_v52 = vadd.f32 1.0, %v2359_v31  ;;  %v2360_v23 = vmul.f32 0.3275911, %v2352_v28  ;;  %2123 = vadd.xlane.f32.xlu0 %v2122_v2  ;;  %v2463_v19 = vmul.f32 %v2455_v57, %v2351_v39  ;;  %v2456_v26 = vsub.f32 0.0, %v2352_v28 }
0x15f9   :  { %v2365_v35 = vadd.f32 1.0, %v2357_v59  ;;  %v2358_v58 = vmul.f32 0.3275911, %v2350_v44  ;;  %v2461_v33 = vmul.f32 %v2453_v11, %v2349_v48  ;;  %v2454_v6 = vsub.f32 0.0, %v2350_v44 }
0x15fa   :  { %6341 = vrcp.f32 %v2367_v52  ;;  %v2368_v60 = vadd.f32 1.0, %v2360_v23  ;;  %v2473_v16 = vmul.f32 1.442695, %v2463_v19  ;;  %v2464_v22 = vmul.f32 %v2456_v26, %v2352_v28 }
0x15fb   :  { %6343 = vrcp.f32 %v2365_v35  ;;  %v2366_v61 = vadd.f32 1.0, %v2358_v58  ;;  %v2469_v30 = vmul.f32 1.442695, %v2461_v33  ;;  %v2462_v53 = vmul.f32 %v2454_v6, %v2350_v44 }
0x15fc   :  { %6345 = vrcp.f32 %v2368_v60  ;;  %2126 = vadd.xlane.f32.xlu0 %v2125_v37  ;;  %v2475_v39 = vmul.f32 1.442695, %v2464_v22 }
0x15fd   :  { %6347 = vrcp.f32 %v2366_v61  ;;  %v2471_v59 = vmul.f32 1.442695, %v2462_v53 }
0x15fe   :  { %6349 = vpow2.f32 %v2473_v16 }
0x15ff   :  { %6351 = vpow2.f32 %v2469_v30 }
0x1600   :  { %6353 = vpow2.f32 %v2475_v39 }
0x1601   :  { %6355 = vpow2.f32 %v2471_v59  ;;  %v2336_v59 = vmul.f32 0.5, %v7393_v20 }
0x1604   :  { %v6342_v56 = vpop.eup %6341 }
0x1605   :  { %v6344_v36 = vpop.eup %6343  ;;  %v2383_v38 = vmul.f32 1.0614054, %v6342_v56 }
0x1606   :  { %v2381_v49 = vmul.f32 1.0614054, %v6344_v36  ;;  %v6346_v47 = vpop.eup %6345 }
0x1607   :  { %v2391_v42 = vadd.f32 -1.4531521, %v2383_v38  ;;  %v2384_v27 = vmul.f32 1.0614054, %v6346_v47  ;;  %v6348_v24 = vpop.eup %6347 }
0x1608   :  { %v2389_v46 = vadd.f32 -1.4531521, %v2381_v49  ;;  %v2382_v17 = vmul.f32 1.0614054, %v6348_v24  ;;  %v6350_v26 = vpop.eup %6349 }
0x1609   :  { %v2399_v21 = vmul.f32 %v6342_v56, %v2391_v42  ;;  %v2392_v12 = vadd.f32 -1.4531521, %v2384_v27  ;;  %v6352_v38 = vpop.eup %6351 }
0x160a   :  { %v2397_v10 = vmul.f32 %v6344_v36, %v2389_v46  ;;  %v2390_v31 = vadd.f32 -1.4531521, %v2382_v17 }
0x160b   :  { %v2407_v7 = vadd.f32 1.4214138, %v2399_v21  ;;  %v2400_v48 = vmul.f32 %v6346_v47, %v2392_v12  ;;  %v6354_v21 = vpop.eup %6353 }
0x160c   :  { %v2405_v40 = vadd.f32 1.4214138, %v2397_v10  ;;  %v2398_v23 = vmul.f32 %v6348_v24, %v2390_v31 }
0x160d   :  { %v2415_v0 = vmul.f32 %v6342_v56, %v2407_v7  ;;  %v2408_v28 = vadd.f32 1.4214138, %v2400_v48  ;;  %v6356_v7 = vpop.eup %6355 }
0x160e   :  { %v2413_v41 = vmul.f32 %v6344_v36, %v2405_v40  ;;  %v2406_v44 = vadd.f32 1.4214138, %v2398_v23 }
0x160f   :  { %v2423_v52 = vadd.f32 -0.28449672, %v2415_v0  ;;  %v2416_v60 = vmul.f32 %v6346_v47, %v2408_v28 }
0x1610   :  { %v2421_v35 = vadd.f32 -0.28449672, %v2413_v41  ;;  %v2414_v54 = vmul.f32 %v6348_v24, %v2406_v44 }
0x1611   :  { %v2431_v58 = vmul.f32 %v6342_v56, %v2423_v52  ;;  %v2424_v43 = vadd.f32 -0.28449672, %v2416_v60  ;;  %v2333_v52 = vmul.f32 0.5, %v7387_v8  ;;  %v7448_v8 = vld [vmem:[%s8398_s7 + $0x5] ss:$0 sm:$0xff] }
0x1612   :  { %v2429_v51 = vmul.f32 %v6344_v36, %v2421_v35  ;;  %v2422_v19 = vadd.f32 -0.28449672, %v2414_v54  ;;  %v2334_v35 = vmul.f32 0.5, %v7399_v14 }
0x1613   :  { %v2439_v61 = vadd.f32 0.2548296, %v2431_v58  ;;  %v2432_v11 = vmul.f32 %v6346_v47, %v2424_v43 }
0x1614   :  { %v2437_v57 = vadd.f32 0.2548296, %v2429_v51  ;;  %v2430_v6 = vmul.f32 %v6348_v24, %v2422_v19 }
0x1615   :  { %v2447_v2 = vmul.f32 %v6342_v56, %v2439_v61  ;;  %v2440_v49 = vadd.f32 0.2548296, %v2432_v11 }
0x1616   :  { %v2445_v37 = vmul.f32 %v6344_v36, %v2437_v57  ;;  %v2438_v22 = vadd.f32 0.2548296, %v2430_v6 }
0x1617   :  { %v2487_v33 = vmul.f32 %v6350_v26, %v2447_v2  ;;  %v2448_v46 = vmul.f32 %v6346_v47, %v2440_v49  ;;  %v2335_v47 = vmul.f32 0.5, %v7384_v45 }
0x1618   :  { %v2485_v42 = vmul.f32 %v6352_v38, %v2445_v37  ;;  %v2446_v53 = vmul.f32 %v6348_v24, %v2438_v22 }
0x1619   :  { %v2495_v16 = vsub.f32 1.0, %v2487_v33  ;;  %v2488_v10 = vmul.f32 %v6354_v21, %v2448_v46 }
0x161a   :  { %v2493_v30 = vsub.f32 1.0, %v2485_v42  ;;  %v2486_v36 = vmul.f32 %v6356_v7, %v2446_v53 }
0x161b   :  { %v2511_v27 = vsub.f32 0.0, %v2495_v16  ;;  %v2496_v17 = vsub.f32 1.0, %v2488_v10 }
0x161c   :  { %v2509_v56 = vsub.f32 0.0, %v2493_v30  ;;  %v2494_v0 = vsub.f32 1.0, %v2486_v36 }
0x161d   :  { %v2519_v12 = vsel %vm2503_vm6, %v2495_v16, %v2511_v27  ;;  %v2512_v39 = vsub.f32 0.0, %v2496_v17 }
0x161e   :  { %v2517_v40 = vsel %vm2501_vm7, %v2493_v30, %v2509_v56  ;;  %v2527_v48 = vadd.f32 1.0, %v2519_v12  ;;  %v2510_v41 = vsub.f32 0.0, %v2494_v0 }
0x161f   :  { %v2520_v31 = vsel %vm2504_vm8, %v2496_v17, %v2512_v39  ;;  %v2525_v24 = vadd.f32 1.0, %v2517_v40  ;;  %vm5140_vm8 = vcmask 1040384  }
0x1620   :  { %v2528_v15 = vadd.f32 1.0, %v2520_v31  ;;  %v2518_v28 = vsel %vm2502_vm9, %v2494_v0, %v2510_v41  ;;  %v2535_v4 = vmul.f32 %v2527_v48, %v2335_v47  ;;  %vm6614_vm9 = vmmov 0  }
0x1621   :  { %v2526_v58 = vadd.f32 1.0, %v2518_v28  ;;  %v2533_v60 = vmul.f32 %v2525_v24, %v2333_v52 }
0x1622   :  { %v2536_v23 = vmul.f32 %v2528_v15, %v2336_v59 }
0x1623   :  { %v2534_v44 = vmul.f32 %v2526_v58, %v2334_v35 }
0x1624   :  { %v2542_v50 = vpack.c.bf16 %v2536_v23, %v2535_v4 }
0x1625   :  { %v2541_v45 = vpack.c.bf16 %v2534_v44, %v2533_v60 }
0x1627   :  { %5794 = vmatprep.mubr.msk.bf16.mxu0 %vm102_vm0, %v2541_v45 }
0x1628   :  { %5795 = vmatmul.mubr.msk.bf16.vlgmr.msra.gmra.mrb[48].mxu0 %vm102_vm0, %v2542_v50 }
0x1681   :  { %v2118_v20 = vpop.xlane.xlu0 %2117 }
0x1682   :  { %v2132_v61 = vmul.f32 0.03125, %v2118_v20 }
0x1683   :  { %v2121_v43 = vpop.xlane.xlu1 %2120 }
0x1684   :  { %v2133_v19 = vmul.f32 0.03125, %v2121_v43  ;;  %v7458_v33 = vsub.f32 %v7415_v32, %v2132_v61 }
0x1685   :  { %v2124_v51 = vpop.xlane.xlu0 %2123 }
0x1686   :  { %v2134_v6 = vmul.f32 0.03125, %v2124_v51  ;;  %v2148_v27 = vmul.f32 %v7458_v33, %v7458_v33 }
0x1688   :  { %v2164_v7 = vsel %vm191_vm1, %v2148_v27, 0.0 }
0x1689   :  { %v2127_v49 = vpop.xlane.xlu0 %2126 }
0x168a   :  { %v2135_v22 = vmul.f32 0.03125, %v2127_v49 }
0x168c   :  { %v7484_v10 = vsub.f32 %v7429_v55, %v2135_v22 }
0x168e   :  { %v2151_v17 = vmul.f32 %v7484_v10, %v7484_v10 }
0x1690   :  { %v2173_v40 = vsel %vm191_vm1, %v2151_v17, 0.0 }
0x16fb   :  { %v5796_v29 = vpop.f32.mrb[48].mxu0 }
0x16fc   :  { %v2627_v14 = vpop.f32.mrb[49].mxu0  ;;  %v2636_v54 = vadd.f32 %v5796_v29, %v7448_v8 }
0x16fd   :  { %v2628_v57 = vadd.f32 %v7448_v8, %v2627_v14  ;;  %v5797_v2 = vpop.f32.mrb[50].mxu0 }
0x16fe   :  { %v2630_v11 = vpop.f32.mrb[51].mxu0  ;;  %v2639_v37 = vadd.f32 %v5797_v2, %v7448_v8  ;;  %v7461_v42 = vadd.f32 %v2636_v54, %v7269_v63  ;;  %v7477_v63 = vsub.f32 %v7421_v25, %v2134_v6 }
0x16ff   :  { %v7453_v26 = vadd.f32 %v2628_v57, %v7265_v5  ;;  %v2631_v38 = vadd.f32 %v7448_v8, %v2630_v11  ;;  %v7469_v5 = vsub.f32 %v7418_v62, %v2133_v19 }
0x1700   :  { %v7472_v21 = vadd.f32 %v2639_v37, %v7280_v34  ;;  %v2150_v56 = vmul.f32 %v7477_v63, %v7477_v63 }
0x1701   :  { %v7464_v16 = vadd.f32 %v2631_v38, %v7273_v13  ;;  %v2674_v46 = vsel %vm191_vm1, %v7453_v26, 0.0  ;;  %v2680_v13 = vsel %vm191_vm1, %v7461_v42, 0.0  ;;  %v2149_v53 = vmul.f32 %v7469_v5, %v7469_v5 }
0x1702   :  { %2675 = vadd.xlane.f32.xlu0 %v2674_v46  ;;  %v2683_v34 = vsel %vm191_vm1, %v7472_v21, 0.0  ;;  %v2170_v36 = vsel %vm191_vm1, %v2150_v56, 0.0 }
0x1703   :  { %v2677_v30 = vsel %vm191_vm1, %v7464_v16, 0.0  ;;  %v2167_v12 = vsel %vm191_vm1, %v2149_v53, 0.0 }
0x1704   :  { %2678 = vadd.xlane.f32.xlu1 %v2677_v30 }
0x1706   :  { %2681 = vadd.xlane.f32.xlu0 %v2680_v13 }
0x1708   :  { %2684 = vadd.xlane.f32.xlu1 %v2683_v34 }
0x170a   :  { %2165 = vadd.xlane.f32.xlu0 %v2164_v7 }
0x170c   :  { %2168 = vadd.xlane.f32.xlu1 %v2167_v12 }
0x170e   :  { %2171 = vadd.xlane.f32.xlu0 %v2170_v36 }
0x1710   :  { %2174 = vadd.xlane.f32.xlu1 %v2173_v40 }
0x178f   :  { %v2676_v39 = vpop.xlane.xlu0 %2675 }
0x1790   :  { %v2698_v0 = vmul.f32 0.03125, %v2676_v39 }
0x1791   :  { %v2679_v48 = vpop.xlane.xlu1 %2678 }
0x1792   :  { %v7499_v47 = vsub.f32 %v7453_v26, %v2698_v0  ;;  %v2699_v31 = vmul.f32 0.03125, %v2679_v48 }
0x1793   :  { %v2682_v41 = vpop.xlane.xlu0 %2681 }
0x1794   :  { %v7502_v24 = vsub.f32 %v7464_v16, %v2699_v31  ;;  %v2700_v59 = vmul.f32 0.03125, %v2682_v41  ;;  %v2714_v15 = vmul.f32 %v7499_v47, %v7499_v47 }
0x1795   :  { %v2685_v52 = vpop.xlane.xlu1 %2684 }
0x1796   :  { %v7507_v28 = vsub.f32 %v7461_v42, %v2700_v59  ;;  %v2701_v4 = vmul.f32 0.03125, %v2685_v52  ;;  %v2722_v23 = vsel %vm191_vm1, %v2714_v15, 0.0  ;;  %v2715_v35 = vmul.f32 %v7502_v24, %v7502_v24 }
0x1797   :  { %2723 = vadd.xlane.f32.xlu0 %v2722_v23  ;;  %v2166_v58 = vpop.xlane.xlu0 %2165 }
0x1798   :  { %v7513_v60 = vsub.f32 %v7472_v21, %v2701_v4  ;;  %v2180_v50 = vmul.f32 0.03125, %v2166_v58  ;;  %v2725_v44 = vsel %vm191_vm1, %v2715_v35, 0.0  ;;  %v2716_v45 = vmul.f32 %v7507_v28, %v7507_v28 }
0x1799   :  { %2726 = vadd.xlane.f32.xlu1 %v2725_v44  ;;  %v2169_v20 = vpop.xlane.xlu1 %2168 }
0x179a   :  { %v2188_v51 = vadd.f32 1e-05, %v2180_v50  ;;  %v2181_v29 = vmul.f32 0.03125, %v2169_v20  ;;  %v2728_v61 = vsel %vm191_vm1, %v2716_v45, 0.0  ;;  %v2717_v43 = vmul.f32 %v7513_v60, %v7513_v60  ;;  %v7545_v50 = vld [vmem:[%s8398_s7 + $0x8] ss:$0 sm:$0xff] }
0x179b   :  { %2729 = vadd.xlane.f32.xlu0 %v2728_v61  ;;  %v2172_v14 = vpop.xlane.xlu0 %2171  ;;  %v7553_v61 = vld [vmem:[%s8398_s7 + $0x9] ss:$0 sm:$0xff] }
0x179c   :  { %6357 = vrsqrt.f32 %v2188_v51  ;;  %v2189_v54 = vadd.f32 1e-05, %v2181_v29  ;;  %v2182_v57 = vmul.f32 0.03125, %v2172_v14  ;;  %v2731_v2 = vsel %vm191_vm1, %v2717_v43, 0.0 }
0x179d   :  { %2732 = vadd.xlane.f32.xlu1 %v2731_v2  ;;  %v2175_v11 = vpop.xlane.xlu1 %2174 }
0x179e   :  { %6359 = vrsqrt.f32 %v2189_v54  ;;  %v2190_v19 = vadd.f32 1e-05, %v2182_v57  ;;  %v2183_v37 = vmul.f32 0.03125, %v2175_v11 }
0x17a0   :  { %6361 = vrsqrt.f32 %v2190_v19  ;;  %v2191_v38 = vadd.f32 1e-05, %v2183_v37 }
0x17a2   :  { %6363 = vrsqrt.f32 %v2191_v38 }
0x17a6   :  { %v6358_v49 = vpop.eup %6357 }
0x17a7   :  { %v2204_v6 = vmul.f32 %v6358_v49, %v7458_v33 }
0x17a8   :  { %v6360_v46 = vpop.eup %6359 }
0x17a9   :  { %v2205_v22 = vmul.f32 %v6360_v46, %v7469_v5  ;;  %v2216_v30 = vmul.f32 %v7329_v9, %v2204_v6 }
0x17aa   :  { %v6362_v13 = vpop.eup %6361 }
0x17ab   :  { %v2217_v27 = vmul.f32 %v7329_v9, %v2205_v22  ;;  %v2206_v34 = vmul.f32 %v6362_v13, %v7477_v63  ;;  %v2228_v7 = vadd.f32 %v7341_v3, %v2216_v30  ;;  %v6177_v63 = vld [vmem:[%s8394_s3 + $0x10] sm:$0xff]  }
0x17ac   :  { %v6364_v53 = vpop.eup %6363  ;;  %5802 = vmatprep.subr.bf16.mxu1 %v6177_v63 }
0x17ad   :  { %v2229_v56 = vadd.f32 %v7341_v3, %v2217_v27  ;;  %v2207_v12 = vmul.f32 %v6364_v53, %v7484_v10  ;;  %v2218_v17 = vmul.f32 %v7329_v9, %v2206_v34  ;;  %v6178_v10 = vld [vmem:[%s8394_s3 + $0x18] sm:$0xff]   ;;  %5803 = vmatpush3.bf16.msra.mxu1 %v6177_v63 }
0x17ae   :  { %5804 = vmatprep.subr.bf16.mxu1 %v6178_v10 }
0x17af   :  { %v2234_v33 = vpack.c.bf16 %v2229_v56, %v2228_v7  ;;  %v2219_v36 = vmul.f32 %v7329_v9, %v2207_v12  ;;  %v2230_v5 = vadd.f32 %v7341_v3, %v2218_v17 }
0x17b1   :  { %5782 = vmatprep.mubr.msk.bf16.mxu1 %vm191_vm1, %v2234_v33  ;;  %v2231_v40 = vadd.f32 %v7341_v3, %v2219_v36  ;;  %5805 = vmatpush3.bf16.msra.mxu1 %v6178_v10 }
0x17b3   :  { %v2235_v39 = vpack.c.bf16 %v2231_v40, %v2230_v5 }
0x17b5   :  { %5783 = vmatmul.mubr.msk.bf16.gmra.mrb[44].mxu1 %vm191_vm1, %v2235_v39 }
0x1824   :  { %v2724_v9 = vpop.xlane.xlu0 %2723 }
0x1825   :  { %v2746_v0 = vmul.f32 0.03125, %v2724_v9 }
0x1826   :  { %v2727_v48 = vpop.xlane.xlu1 %2726 }
0x1827   :  { %v2754_v31 = vadd.f32 1e-05, %v2746_v0  ;;  %v2747_v3 = vmul.f32 0.03125, %v2727_v48 }
0x1828   :  { %v2730_v41 = vpop.xlane.xlu0 %2729 }
0x1829   :  { %6365 = vrsqrt.f32 %v2754_v31  ;;  %v2755_v59 = vadd.f32 1e-05, %v2747_v3  ;;  %v2748_v15 = vmul.f32 0.03125, %v2730_v41 }
0x182a   :  { %v2733_v52 = vpop.xlane.xlu1 %2732 }
0x182b   :  { %6367 = vrsqrt.f32 %v2755_v59  ;;  %v2756_v4 = vadd.f32 1e-05, %v2748_v15  ;;  %v2749_v23 = vmul.f32 0.03125, %v2733_v52 }
0x182d   :  { %6369 = vrsqrt.f32 %v2756_v4  ;;  %v2757_v35 = vadd.f32 1e-05, %v2749_v23 }
0x182f   :  { %6371 = vrsqrt.f32 %v2757_v35 }
0x1833   :  { %v6366_v58 = vpop.eup %6365 }
0x1834   :  { %v2770_v44 = vmul.f32 %v6366_v58, %v7499_v47 }
0x1835   :  { %v6368_v45 = vpop.eup %6367 }
0x1836   :  { %v2771_v20 = vmul.f32 %v6368_v45, %v7502_v24  ;;  %v2782_v51 = vmul.f32 %v7545_v50, %v2770_v44 }
0x1837   :  { %v6370_v29 = vpop.eup %6369 }
0x1838   :  { %v2772_v43 = vmul.f32 %v6370_v29, %v7507_v28  ;;  %v2783_v14 = vmul.f32 %v7545_v50, %v2771_v20  ;;  %v2794_v2 = vadd.f32 %v7553_v61, %v2782_v51 }
0x1839   :  { %v6372_v54 = vpop.eup %6371 }
0x183a   :  { %v2784_v57 = vmul.f32 %v7545_v50, %v2772_v43  ;;  %v2773_v47 = vmul.f32 %v6372_v54, %v7513_v60  ;;  %v2795_v24 = vadd.f32 %v7553_v61, %v2783_v14 }
0x183c   :  { %v2785_v11 = vmul.f32 %v7545_v50, %v2773_v47  ;;  %v2802_v19 = vpack.c.bf16 %v2795_v24, %v2794_v2  ;;  %v2796_v37 = vadd.f32 %v7553_v61, %v2784_v57 }
0x183e   :  { %v2797_v38 = vadd.f32 %v7553_v61, %v2785_v11  ;;  %5806 = vmatprep.mubr.msk.bf16.mxu1 %vm191_vm1, %v2802_v19 }
0x1840   :  { %v2803_v28 = vpack.c.bf16 %v2797_v38, %v2796_v37 }
0x1842   :  { %5807 = vmatmul.mubr.msk.bf16.vlgmr.msra.gmra.mrb[48].mxu1 %vm191_vm1, %v2803_v28 }
0x1888   :  { %v5784_v49 = vpop.f32.mrb[44].mxu1 }
0x1889   :  { %v7567_v6 = vadd.f32 %v5784_v49, %v7381_v18  ;;  %v2318_v60 = vpop.f32.mrb[45].mxu1 }
0x188a   :  { %v7570_v46 = vadd.f32 %v7381_v18, %v2318_v60  ;;  %v5785_v22 = vpop.f32.mrb[46].mxu1 }
0x188b   :  { %v7573_v30 = vmul.f32 0.70710677, %v7567_v6  ;;  %v7576_v13 = vadd.f32 %v5785_v22, %v7381_v18  ;;  %v2321_v27 = vpop.f32.mrb[47].mxu1 }
0x188c   :  { %v7579_v34 = vmul.f32 0.70710677, %v7570_v46  ;;  %v7582_v53 = vadd.f32 %v7381_v18, %v2321_v27 }
0x188d   :  { %v2355_v7 = vand.u32 2147483647, %v7573_v30  ;;  %v7586_v56 = vmul.f32 0.70710677, %v7576_v13  ;;  %vm2507_vm10 = vcmp.ge.f32.partialorder %v7573_v30, 0.0 }
0x188e   :  { %v2353_v12 = vand.u32 2147483647, %v7579_v34  ;;  %v7590_v17 = vmul.f32 0.70710677, %v7582_v53  ;;  %vm2505_vm11 = vcmp.ge.f32.partialorder %v7579_v34, 0.0 }
0x188f   :  { %v2363_v33 = vmul.f32 0.3275911, %v2355_v7  ;;  %v2356_v36 = vand.u32 2147483647, %v7586_v56  ;;  %v2459_v48 = vsub.f32 0.0, %v2355_v7  ;;  %vm2508_vm12 = vcmp.ge.f32.partialorder %v7586_v56, 0.0 }
0x1890   :  { %v2361_v5 = vmul.f32 0.3275911, %v2353_v12  ;;  %v2354_v40 = vand.u32 2147483647, %v7590_v17  ;;  %v2457_v31 = vsub.f32 0.0, %v2353_v12  ;;  %vm2506_vm13 = vcmp.ge.f32.partialorder %v7590_v17, 0.0 }
0x1891   :  { %v2371_v39 = vadd.f32 1.0, %v2363_v33  ;;  %v2364_v63 = vmul.f32 0.3275911, %v2356_v36  ;;  %v2467_v41 = vmul.f32 %v2459_v48, %v2355_v7  ;;  %v2460_v59 = vsub.f32 0.0, %v2356_v36  ;;  %v7607_v17 = vld [vmem:[%s8398_s7 + $0xf] ss:$0 sm:$0xff] }
0x1892   :  { %v2369_v18 = vadd.f32 1.0, %v2361_v5  ;;  %v2362_v10 = vmul.f32 0.3275911, %v2354_v40  ;;  %v2465_v4 = vmul.f32 %v2457_v31, %v2353_v12  ;;  %v2458_v35 = vsub.f32 0.0, %v2354_v40 }
0x1893   :  { %6373 = vrcp.f32 %v2371_v39  ;;  %v2372_v9 = vadd.f32 1.0, %v2364_v63  ;;  %v2481_v45 = vmul.f32 1.442695, %v2467_v41  ;;  %v2468_v51 = vmul.f32 %v2460_v59, %v2356_v36 }
0x1894   :  { %6375 = vrcp.f32 %v2369_v18  ;;  %v2370_v0 = vadd.f32 1.0, %v2362_v10  ;;  %v2477_v43 = vmul.f32 1.442695, %v2465_v4  ;;  %v2466_v47 = vmul.f32 %v2458_v35, %v2354_v40 }
0x1895   :  { %6377 = vrcp.f32 %v2372_v9  ;;  %v2483_v37 = vmul.f32 1.442695, %v2468_v51 }
0x1896   :  { %6379 = vrcp.f32 %v2370_v0  ;;  %v2479_v22 = vmul.f32 1.442695, %v2466_v47 }
0x1897   :  { %6381 = vpow2.f32 %v2481_v45 }
0x1898   :  { %6383 = vpow2.f32 %v2477_v43 }
0x1899   :  { %6385 = vpow2.f32 %v2483_v37 }
0x189a   :  { %6387 = vpow2.f32 %v2479_v22  ;;  %v2340_v22 = vmul.f32 0.5, %v7576_v13 }
0x189d   :  { %v6374_v3 = vpop.eup %6373 }
0x189e   :  { %v6376_v15 = vpop.eup %6375  ;;  %v2387_v52 = vmul.f32 1.0614054, %v6374_v3 }
0x189f   :  { %v2385_v23 = vmul.f32 1.0614054, %v6376_v15  ;;  %v6378_v44 = vpop.eup %6377 }
0x18a0   :  { %v2395_v58 = vadd.f32 -1.4531521, %v2387_v52  ;;  %v2388_v14 = vmul.f32 1.0614054, %v6378_v44  ;;  %v6380_v54 = vpop.eup %6379 }
0x18a1   :  { %v2393_v20 = vadd.f32 -1.4531521, %v2385_v23  ;;  %v2386_v11 = vmul.f32 1.0614054, %v6380_v54  ;;  %v6382_v41 = vpop.eup %6381 }
0x18a2   :  { %v2403_v29 = vmul.f32 %v6374_v3, %v2395_v58  ;;  %v2396_v24 = vadd.f32 -1.4531521, %v2388_v14  ;;  %v6384_v52 = vpop.eup %6383 }
0x18a3   :  { %v2401_v57 = vmul.f32 %v6376_v15, %v2393_v20  ;;  %v2394_v49 = vadd.f32 -1.4531521, %v2386_v11 }
0x18a4   :  { %v2411_v2 = vadd.f32 1.4214138, %v2403_v29  ;;  %v2404_v28 = vmul.f32 %v6378_v44, %v2396_v24  ;;  %v6386_v29 = vpop.eup %6385 }
0x18a5   :  { %v2409_v19 = vadd.f32 1.4214138, %v2401_v57  ;;  %v2402_v12 = vmul.f32 %v6380_v54, %v2394_v49 }
0x18a6   :  { %v2419_v38 = vmul.f32 %v6374_v3, %v2411_v2  ;;  %v2412_v7 = vadd.f32 1.4214138, %v2404_v28  ;;  %v6388_v2 = vpop.eup %6387 }
0x18a7   :  { %v2417_v60 = vmul.f32 %v6376_v15, %v2409_v19  ;;  %v2410_v40 = vadd.f32 1.4214138, %v2402_v12 }
0x18a8   :  { %v2427_v27 = vadd.f32 -0.28449672, %v2419_v38  ;;  %v2420_v5 = vmul.f32 %v6378_v44, %v2412_v7 }
0x18a9   :  { %v2425_v33 = vadd.f32 -0.28449672, %v2417_v60  ;;  %v2418_v10 = vmul.f32 %v6380_v54, %v2410_v40 }
0x18aa   :  { %v2435_v36 = vmul.f32 %v6374_v3, %v2427_v27  ;;  %v2428_v18 = vadd.f32 -0.28449672, %v2420_v5  ;;  %v2337_v27 = vmul.f32 0.5, %v7570_v46 }
0x18ab   :  { %v2433_v39 = vmul.f32 %v6376_v15, %v2425_v33  ;;  %v2426_v31 = vadd.f32 -0.28449672, %v2418_v10  ;;  %v2338_v33 = vmul.f32 0.5, %v7582_v53 }
0x18ac   :  { %v2443_v63 = vadd.f32 0.2548296, %v2435_v36  ;;  %v2436_v48 = vmul.f32 %v6378_v44, %v2428_v18 }
0x18ad   :  { %v2441_v9 = vadd.f32 0.2548296, %v2433_v39  ;;  %v2434_v35 = vmul.f32 %v6380_v54, %v2426_v31 }
0x18ae   :  { %v2451_v0 = vmul.f32 %v6374_v3, %v2443_v63  ;;  %v2444_v23 = vadd.f32 0.2548296, %v2436_v48 }
0x18af   :  { %v2449_v59 = vmul.f32 %v6376_v15, %v2441_v9  ;;  %v2442_v51 = vadd.f32 0.2548296, %v2434_v35 }
0x18b0   :  { %v2491_v4 = vmul.f32 %v6382_v41, %v2451_v0  ;;  %v2452_v20 = vmul.f32 %v6378_v44, %v2444_v23  ;;  %v2339_v44 = vmul.f32 0.5, %v7567_v6 }
0x18b1   :  { %v2489_v58 = vmul.f32 %v6384_v52, %v2449_v59  ;;  %v2450_v47 = vmul.f32 %v6380_v54, %v2442_v51 }
0x18b2   :  { %v2499_v45 = vsub.f32 1.0, %v2491_v4  ;;  %v2492_v57 = vmul.f32 %v6386_v29, %v2452_v20 }
0x18b3   :  { %v2497_v43 = vsub.f32 1.0, %v2489_v58  ;;  %v2490_v15 = vmul.f32 %v6388_v2, %v2450_v47 }
0x18b4   :  { %v2515_v14 = vsub.f32 0.0, %v2499_v45  ;;  %v2500_v11 = vsub.f32 1.0, %v2492_v57 }
0x18b5   :  { %v2513_v3 = vsub.f32 0.0, %v2497_v43  ;;  %v2498_v38 = vsub.f32 1.0, %v2490_v15 }
0x18b6   :  { %v2523_v24 = vsel %vm2507_vm10, %v2499_v45, %v2515_v14  ;;  %v2516_v37 = vsub.f32 0.0, %v2500_v11 }
0x18b7   :  { %v2521_v19 = vsel %vm2505_vm11, %v2497_v43, %v2513_v3  ;;  %v2531_v28 = vadd.f32 1.0, %v2523_v24  ;;  %v2514_v60 = vsub.f32 0.0, %v2498_v38 }
0x18b8   :  { %v2524_v49 = vsel %vm2508_vm12, %v2500_v11, %v2516_v37  ;;  %v2529_v54 = vadd.f32 1.0, %v2521_v19 }
0x18b9   :  { %v2532_v30 = vadd.f32 1.0, %v2524_v49  ;;  %v2522_v7 = vsel %vm2506_vm13, %v2498_v38, %v2514_v60  ;;  %v2539_v34 = vmul.f32 %v2531_v28, %v2339_v44 }
0x18ba   :  { %v2530_v36 = vadd.f32 1.0, %v2522_v7  ;;  %v2537_v5 = vmul.f32 %v2529_v54, %v2337_v27 }
0x18bb   :  { %v2540_v12 = vmul.f32 %v2532_v30, %v2340_v22 }
0x18bc   :  { %v2538_v40 = vmul.f32 %v2530_v36, %v2338_v33 }
0x18bd   :  { %v2544_v56 = vpack.c.bf16 %v2540_v12, %v2539_v34 }
0x18be   :  { %v2543_v6 = vpack.c.bf16 %v2538_v40, %v2537_v5 }
0x18c0   :  { %5798 = vmatprep.mubr.msk.bf16.mxu0 %vm102_vm0, %v2543_v6 }
0x18c1   :  { %5799 = vmatmul.mubr.msk.bf16.gmra.mrb[52].mxu0 %vm102_vm0, %v2544_v56 }
0x1915   :  { %v5808_v13 = vpop.f32.mrb[48].mxu1 }
0x1916   :  { %v2873_v46 = vpop.f32.mrb[49].mxu1  ;;  %v2882_v63 = vadd.f32 %v5808_v13, %v7607_v17 }
0x1917   :  { %v5809_v39 = vpop.f32.mrb[50].mxu1  ;;  %v2874_v10 = vadd.f32 %v7607_v17, %v2873_v46 }
0x1918   :  { %v2885_v53 = vadd.f32 %v5809_v39, %v7607_v17  ;;  %v2876_v18 = vpop.f32.mrb[51].mxu1 }
0x1919   :  { %v2877_v9 = vadd.f32 %v7607_v17, %v2876_v18 }
0x191a   :  { %v7613_v0 = vpack.c.bf16 %v2885_v53, %v2882_v63 }
0x191b   :  { %v7615_v48 = vpack.c.bf16 %v2877_v9, %v2874_v10 }
0x191c   :  { %2910 = vrot.lane.b32.xlu1 %v7613_v0, %s6599_s26 }
0x191d   :  { %2908 = vrot.lane.b32.xlu0 %v7615_v48, %s6599_s26  ;;  %5818 = vmatprep.mubr.msk.bf16.mxu0 %vm430_vm2, %v7615_v48 }
0x1920   :  { %3088 = vrot.lane.b32.xlu1 %v7615_v48, %s6600_s27 }
0x1921   :  { %3084 = vrot.lane.b32.xlu0 %v7615_v48, %s6601_s28 }
0x1924   :  { %3090 = vrot.lane.b32.xlu1 %v7613_v0, %s6600_s27 }
0x1928   :  { %3086 = vrot.lane.b32.xlu1 %v7613_v0, %s6601_s28 }
0x198e   :  { %v2911_v59 = vpop.permute.xlu1 %2910 }
0x198f   :  { %v2909_v31 = vpop.permute.xlu0 %2908  ;;  %v2922_v23 = vsel %vm430_vm2, %v2911_v59, 0 }
0x1990   :  { %6006 = vmatprep.subr.msk.bf16.mxu0 %vm430_vm2, %v2909_v31  ;;  %v2919_v41 = vsel %vm430_vm2, %v2909_v31, 0 }
0x1991   :  { %5815 = vmatpush3.bf16.xpose.msra.mxu0 %v2919_v41 }
0x1992   :  { %6007 = vmatprep.subr.msk.bf16.mxu0 %vm430_vm2, %v2911_v59  ;;  %v3089_v35 = vpop.permute.xlu1 %3088 }
0x1993   :  { %v3085_v24 = vpop.permute.xlu0 %3084 }
0x1994   :  { %v5800_v52 = vpop.f32.mrb[52].mxu0 }
0x1995   :  { %v2643_v4 = vpop.f32.mrb[53].mxu0  ;;  %v2652_v58 = vadd.f32 %v5800_v52, %v7448_v8 }
0x1996   :  { %v2644_v45 = vadd.f32 %v7448_v8, %v2643_v4  ;;  %v5801_v20 = vpop.f32.mrb[54].mxu0 }
0x1997   :  { %v2646_v51 = vpop.f32.mrb[55].mxu0  ;;  %v7643_v14 = vadd.f32 %v2652_v58, %v7421_v25  ;;  %v2655_v57 = vadd.f32 %v5801_v20, %v7448_v8 }
0x1998   :  { %v7639_v29 = vadd.f32 %v2644_v45, %v7415_v32  ;;  %v2647_v43 = vadd.f32 %v7448_v8, %v2646_v51  ;;  %v3099_v32 = vsel %vm430_vm2, %v3089_v35, 0  ;;  %v3091_v8 = vpop.permute.xlu1 %3090 }
0x1999   :  { %5817 = vmatpush3.bf16.xpose.msra.mxu0 %v2922_v23  ;;  %v7657_v25 = vadd.f32 %v2655_v57, %v7429_v55  ;;  %v3102_v15 = vsel %vm430_vm2, %v3091_v8, 0 }
0x199a   :  { %6008 = vmatprep.subr.msk.bf16.mxu0 %vm430_vm2, %v3089_v35  ;;  %v7647_v47 = vadd.f32 %v2647_v43, %v7418_v62  ;;  %v2686_v2 = vsel %vm191_vm1, %v7639_v29, 0.0  ;;  %v2692_v62 = vsel %vm191_vm1, %v7643_v14, 0.0 }
0x199b   :  { %2687 = vadd.xlane.f32.xlu0 %v2686_v2  ;;  %v2695_v11 = vsel %vm191_vm1, %v7657_v25, 0.0 }
0x199c   :  { %v2689_v3 = vsel %vm191_vm1, %v7647_v47, 0.0  ;;  %v3087_v19 = vpop.permute.xlu1 %3086 }
0x199d   :  { %2690 = vadd.xlane.f32.xlu1 %v2689_v3 }
0x199f   :  { %2693 = vadd.xlane.f32.xlu0 %v2692_v62 }
0x19a0   :  { %5819 = vmatmul.mubr.msk.bf16.vlgmr.msra.gmra.mrb[56].mxu0 %vm430_vm2, %v7613_v0 }
0x19a1   :  { %5831 = vmatpush3.bf16.xpose.msra.mxu0 %v3099_v32  ;;  %5834 = vmatprep.mubr.msk.bf16.mxu0 %vm430_vm2, %v3085_v24 }
0x19a2   :  { %6009 = vmatprep.subr.msk.bf16.mxu0 %vm430_vm2, %v3091_v8 }
0x19a3   :  { %2696 = vadd.xlane.f32.xlu0 %v2695_v11 }
0x19a9   :  { %5833 = vmatpush3.bf16.xpose.msra.mxu0 %v3102_v15 }
0x19b0   :  { %5835 = vmatmul.mubr.msk.bf16.vlgmr.msra.gmra.mrb[60].mxu0 %vm430_vm2, %v3087_v19 }
0x1a28   :  { %v2688_v28 = vpop.xlane.xlu0 %2687 }
0x1a29   :  { %v2702_v13 = vmul.f32 0.03125, %v2688_v28 }
0x1a2a   :  { %v2691_v55 = vpop.xlane.xlu1 %2690 }
0x1a2b   :  { %v2703_v37 = vmul.f32 0.03125, %v2691_v55  ;;  %v7693_v10 = vsub.f32 %v7639_v29, %v2702_v13 }
0x1a2c   :  { %v2694_v33 = vpop.xlane.xlu0 %2693 }
0x1a2d   :  { %v7676_v27 = vsub.f32 %v7647_v47, %v2703_v37  ;;  %v2704_v9 = vmul.f32 0.03125, %v2694_v33  ;;  %v2718_v20 = vmul.f32 %v7693_v10, %v7693_v10 }
0x1a2f   :  { %v2719_v56 = vmul.f32 %v7676_v27, %v7676_v27  ;;  %v7710_v58 = vsub.f32 %v7643_v14, %v2704_v9  ;;  %v2734_v57 = vsel %vm191_vm1, %v2718_v20, 0.0 }
0x1a30   :  { %v2697_v6 = vpop.xlane.xlu0 %2696 }
0x1a31   :  { %v2737_v40 = vsel %vm191_vm1, %v2719_v56, 0.0  ;;  %v2705_v46 = vmul.f32 0.03125, %v2697_v6  ;;  %v2720_v2 = vmul.f32 %v7710_v58, %v7710_v58 }
0x1a33   :  { %v7700_v52 = vsub.f32 %v7657_v25, %v2705_v46  ;;  %v2740_v24 = vsel %vm191_vm1, %v2720_v2, 0.0 }
0x1a35   :  { %v2721_v43 = vmul.f32 %v7700_v52, %v7700_v52 }
0x1a37   :  { %v2743_v3 = vsel %vm191_vm1, %v2721_v43, 0.0 }
0x1a73   :  { %v5820_v38 = vpop.f32.mrb[56].mxu0 }
0x1a74   :  { %v2958_v44 = vpop.f32.mrb[57].mxu0  ;;  %v2975_v7 = vsel %vm182_vm3, %v5820_v38, -1e+30 }
0x1a75   :  { %v7669_v49 = vsel %vm182_vm3, %v2958_v44, -1e+30  ;;  %v5821_v60 = vpop.f32.mrb[58].mxu0  ;;  %v2983_v36 = vsel %vm191_vm1, %v2975_v7, -inf }
0x1a76   :  { %v2977_v54 = vsel %vm191_vm1, %v7669_v49, -inf  ;;  %v2976_v22 = vsel %vm182_vm3, %v5821_v60, -1e+30  ;;  %v2961_v30 = vpop.f32.mrb[59].mxu0 }
0x1a77   :  { %v2986_v34 = vsel %vm191_vm1, %v2976_v22, -inf  ;;  %2978 = vmax.xlane.f32.xlu0 %v2977_v54  ;;  %v2974_v12 = vsel %vm182_vm3, %v2961_v30, -1e+30 }
0x1a78   :  { %2987 = vmax.xlane.f32.xlu1 %v2986_v34  ;;  %v2980_v5 = vsel %vm191_vm1, %v2974_v12, -inf }
0x1a7b   :  { %2984 = vmax.xlane.f32.xlu0 %v2983_v36 }
0x1a7c   :  { %2981 = vmax.xlane.f32.xlu1 %v2980_v5 }
0x1a80   :  { %2738 = vadd.xlane.f32.xlu1 %v2737_v40 }
0x1a83   :  { %v5836_v39 = vpop.f32.mrb[60].mxu0 }
0x1a84   :  { %v3138_v63 = vpop.f32.mrb[61].mxu0  ;;  %v7704_v4 = vsel %vm182_vm3, %v5836_v39, -1e+30 }
0x1a85   :  { %v7690_v53 = vsel %vm182_vm3, %v3138_v63, -1e+30  ;;  %v5837_v18 = vpop.f32.mrb[62].mxu0  ;;  %v3163_v45 = vsel %vm191_vm1, %v7704_v4, -inf }
0x1a86   :  { %v3157_v31 = vsel %vm191_vm1, %v7690_v53, -inf  ;;  %v3156_v41 = vsel %vm182_vm3, %v5837_v18, -1e+30  ;;  %v3141_v59 = vpop.f32.mrb[63].mxu0 }
0x1a87   :  { %v3166_v23 = vsel %vm191_vm1, %v3156_v41, -inf  ;;  %3158 = vmax.xlane.f32.xlu0 %v3157_v31  ;;  %v3154_v35 = vsel %vm182_vm3, %v3141_v59, -1e+30 }
0x1a88   :  { %3167 = vmax.xlane.f32.xlu1 %v3166_v23  ;;  %v3160_v51 = vsel %vm191_vm1, %v3154_v35, -inf }
0x1a8b   :  { %3164 = vmax.xlane.f32.xlu0 %v3163_v45 }
0x1a8c   :  { %3161 = vmax.xlane.f32.xlu1 %v3160_v51 }
0x1a8f   :  { %2735 = vadd.xlane.f32.xlu0 %v2734_v57 }
0x1a90   :  { %2744 = vadd.xlane.f32.xlu1 %v2743_v3 }
0x1a93   :  { %2741 = vadd.xlane.f32.xlu0 %v2740_v24 }
0x1aa1   :  { %3025 = vrot.lane.b32.xlu1 %v7613_v0, %s6602_s29 }
0x1aa5   :  { %3203 = vrot.lane.b32.xlu1 %v7615_v48, %s6603_s0 }
0x1b04   :  { %v2979_v32 = vpop.xlane.xlu0 %2978 }
0x1b05   :  { %v2988_v8 = vpop.xlane.xlu1 %2987  ;;  %v2989_v11 = vsub.f32 %v7669_v49, %v2979_v32 }
0x1b06   :  { %v2992_v62 = vsub.f32 %v2976_v22, %v2988_v8 }
0x1b07   :  { %v2993_v28 = vmul.f32 1.442695, %v2989_v11 }
0x1b08   :  { %v2999_v15 = vmul.f32 1.442695, %v2992_v62  ;;  %v2985_v19 = vpop.xlane.xlu0 %2984 }
0x1b09   :  { %v2991_v55 = vsub.f32 %v2975_v7, %v2985_v19  ;;  %v2982_v37 = vpop.xlane.xlu1 %2981 }
0x1b0a   :  { %6389 = vpow2.f32 %v2999_v15  ;;  %v2990_v38 = vsub.f32 %v2974_v12, %v2982_v37 }
0x1b0b   :  { %v2997_v44 = vmul.f32 1.442695, %v2991_v55 }
0x1b0c   :  { %v2995_v60 = vmul.f32 1.442695, %v2990_v38 }
0x1b0d   :  { %6391 = vpow2.f32 %v2997_v44  ;;  %v2739_v54 = vpop.xlane.xlu1 %2738 }
0x1b0e   :  { %6393 = vpow2.f32 %v2995_v60  ;;  %v2751_v30 = vmul.f32 0.03125, %v2739_v54 }
0x1b0f   :  { %6395 = vpow2.f32 %v2993_v28 }
0x1b10   :  { %v2759_v12 = vadd.f32 1e-05, %v2751_v30 }
0x1b14   :  { %v7729_v34 = vpop.eup %6389  ;;  %v7731_v33 = vpop.xlane.xlu0 %3158 }
0x1b15   :  { %v3168_v22 = vpop.xlane.xlu1 %3167  ;;  %v3010_v49 = vsel %vm191_vm1, %v7729_v34, 0.0 }
0x1b16   :  { %v3172_v7 = vsub.f32 %v3156_v41, %v3168_v22  ;;  %3011 = vadd.xlane.f32.xlu1 %v3010_v49 }
0x1b17   :  { %v7735_v36 = vpop.eup %6391 }
0x1b18   :  { %v7737_v5 = vpop.eup %6393  ;;  %v3179_v56 = vmul.f32 1.442695, %v3172_v7  ;;  %v3165_v40 = vpop.xlane.xlu0 %3164  ;;  %v3007_v6 = vsel %vm191_vm1, %v7735_v36, 0.0 }
0x1b19   :  { %v7741_v13 = vpop.eup %6395  ;;  %3008 = vadd.xlane.f32.xlu0 %v3007_v6  ;;  %v3162_v46 = vpop.xlane.xlu1 %3161  ;;  %v3004_v39 = vsel %vm191_vm1, %v7737_v5, 0.0 }
0x1b1a   :  { %6397 = vpow2.f32 %v3179_v56  ;;  %v3170_v63 = vsub.f32 %v3154_v35, %v3162_v46  ;;  %3005 = vadd.xlane.f32.xlu1 %v3004_v39  ;;  %v3001_v31 = vsel %vm191_vm1, %v7741_v13, 0.0 }
0x1b1b   :  { %6399 = vrsqrt.f32 %v2759_v12 }
0x1b1c   :  { %v3175_v18 = vmul.f32 1.442695, %v3170_v63  ;;  %v2736_v9 = vpop.xlane.xlu0 %2735 }
0x1b1d   :  { %v2750_v41 = vmul.f32 0.03125, %v2736_v9  ;;  %3002 = vadd.xlane.f32.xlu0 %v3001_v31  ;;  %v2745_v59 = vpop.xlane.xlu1 %2744 }
0x1b1e   :  { %6401 = vpow2.f32 %v3175_v18  ;;  %v2753_v23 = vmul.f32 0.03125, %v2745_v59 }
0x1b1f   :  { %v2758_v45 = vadd.f32 1e-05, %v2750_v41 }
0x1b20   :  { %v2761_v20 = vadd.f32 1e-05, %v2753_v23  ;;  %v2742_v51 = vpop.xlane.xlu0 %2741 }
0x1b21   :  { %6403 = vrsqrt.f32 %v2758_v45  ;;  %v2752_v43 = vmul.f32 0.03125, %v2742_v51 }
0x1b22   :  { %6405 = vrsqrt.f32 %v2761_v20 }
0x1b23   :  { %v2760_v57 = vadd.f32 1e-05, %v2752_v43 }
0x1b24   :  { %v7747_v35 = vpop.eup %6397 }
0x1b25   :  { %v6400_v2 = vpop.eup %6399  ;;  %6407 = vrsqrt.f32 %v2760_v57  ;;  %v3190_v3 = vsel %vm191_vm1, %v7747_v35, 0.0 }
0x1b26   :  { %3191 = vadd.xlane.f32.xlu1 %v3190_v3  ;;  %v2775_v32 = vmul.f32 %v6400_v2, %v7676_v27 }
0x1b28   :  { %v7751_v24 = vpop.eup %6401  ;;  %v2787_v19 = vmul.f32 %v7545_v50, %v2775_v32 }
0x1b29   :  { %v3184_v8 = vsel %vm191_vm1, %v7751_v24, 0.0 }
0x1b2a   :  { %3185 = vadd.xlane.f32.xlu1 %v3184_v8  ;;  %v2799_v44 = vadd.f32 %v7553_v61, %v2787_v19 }
0x1b2b   :  { %v6404_v62 = vpop.eup %6403 }
0x1b2c   :  { %v6406_v11 = vpop.eup %6405  ;;  %v2774_v15 = vmul.f32 %v6404_v62, %v7693_v10 }
0x1b2d   :  { %v2777_v55 = vmul.f32 %v6406_v11, %v7700_v52 }
0x1b2e   :  { %v2786_v37 = vmul.f32 %v7545_v50, %v2774_v15 }
0x1b2f   :  { %v6408_v38 = vpop.eup %6407  ;;  %v2789_v60 = vmul.f32 %v7545_v50, %v2777_v55 }
0x1b30   :  { %v2798_v28 = vadd.f32 %v7553_v61, %v2786_v37  ;;  %v2776_v27 = vmul.f32 %v6408_v38, %v7710_v58  ;;  %v3171_v58 = vsub.f32 %v7704_v4, %v3165_v40 }
0x1b31   :  { %v2801_v52 = vadd.f32 %v7553_v61, %v2789_v60 }
0x1b32   :  { %v2804_v54 = vpack.c.bf16 %v2799_v44, %v2798_v28  ;;  %v2788_v30 = vmul.f32 %v7545_v50, %v2776_v27  ;;  %v3169_v50 = vsub.f32 %v7690_v53, %v7731_v33  ;;  %v3177_v49 = vmul.f32 1.442695, %v3171_v58  ;;  %v3026_v53 = vpop.permute.xlu1 %3025 }
0x1b33   :  { %3023 = vrot.lane.b32.xlu0 %v7615_v48, %s6602_s29 }
0x1b34   :  { %5810 = vmatprep.mubr.msk.bf16.mxu1 %vm191_vm1, %v2804_v54  ;;  %v2800_v10 = vadd.f32 %v7553_v61, %v2788_v30  ;;  %v3173_v7 = vmul.f32 1.442695, %v3169_v50  ;;  %6409 = vpow2.f32 %v3177_v49 }
0x1b36   :  { %v2805_v22 = vpack.c.bf16 %v2801_v52, %v2800_v10  ;;  %6411 = vpow2.f32 %v3173_v7  ;;  %v3204_v33 = vpop.permute.xlu1 %3203 }
0x1b38   :  { %5811 = vmatmul.mubr.msk.bf16.gmra.mrb[52].mxu1 %vm191_vm1, %v2805_v22 }
0x1b3b   :  { %3205 = vrot.lane.b32.xlu1 %v7613_v0, %s6603_s0 }
0x1b3e   :  { %v6410_v61 = vpop.eup %6409 }
0x1b3f   :  { %3270 = vrot.lane.b32.xlu1 %v7613_v0, %s6604_s30  ;;  %v3187_v12 = vsel %vm191_vm1, %v6410_v61, 0.0 }
0x1b40   :  { %v6412_v56 = vpop.eup %6411 }
0x1b41   :  { %v3181_v4 = vsel %vm191_vm1, %v6412_v56, 0.0 }
0x1b43   :  { %3266 = vrot.lane.b32.xlu1 %v7613_v0, %s6605_s10 }
0x1b52   :  { %3188 = vadd.xlane.f32.xlu0 %v3187_v12 }
0x1b56   :  { %3182 = vadd.xlane.f32.xlu0 %v3181_v4 }
0x1b6c   :  { %3268 = vrot.lane.b32.xlu0 %v7615_v48, %s6604_s30 }
0x1b70   :  { %3264 = vrot.lane.b32.xlu0 %v7615_v48, %s6605_s10 }
0x1ba3   :  { %v3012_v40 = vpop.xlane.xlu1 %3011 }
0x1ba6   :  { %v3009_v6 = vpop.xlane.xlu0 %3008 }
0x1ba7   :  { %v3006_v46 = vpop.xlane.xlu1 %3005  ;;  %6413 = vrcp.f32 %v3009_v6 }
0x1ba8   :  { %6415 = vrcp.f32 %v3006_v46 }
0x1ba9   :  { %6417 = vrcp.f32 %v3012_v40 }
0x1baa   :  { %v3003_v39 = vpop.xlane.xlu0 %3002 }
0x1bab   :  { %6419 = vrcp.f32 %v3003_v39 }
0x1bae   :  { %v3024_v63 = vpop.permute.xlu0 %3023 }
0x1baf   :  { %5822 = vmatprep.subr.bf16.mxu1 %v3024_v63 }
0x1bb0   :  { %5823 = vmatpush3.bf16.msra.mxu1 %v3024_v63 }
0x1bb1   :  { %5824 = vmatprep.subr.bf16.mxu1 %v3026_v53  ;;  %v6414_v18 = vpop.eup %6413 }
0x1bb2   :  { %v6416_v9 = vpop.eup %6415  ;;  %v3019_v23 = vmul.f32 %v6414_v18, %v7735_v36 }
0x1bb3   :  { %v3192_v31 = vpop.xlane.xlu1 %3191  ;;  %v6418_v41 = vpop.eup %6417  ;;  %v3018_v20 = vmul.f32 %v6416_v9, %v7737_v5 }
0x1bb4   :  { %5825 = vmatpush3.bf16.msra.mxu1 %v3026_v53  ;;  %v3020_v51 = vmul.f32 %v6418_v41, %v7729_v34 }
0x1bb5   :  { %v6420_v59 = vpop.eup %6419  ;;  %5838 = vmatprep.subr.bf16.mxu1 %v3204_v33 }
0x1bb6   :  { %v3017_v45 = vmul.f32 %v6420_v59, %v7741_v13  ;;  %v3022_v2 = vpack.c.bf16 %v3020_v51, %v3019_v23 }
0x1bb7   :  { %v3186_v43 = vpop.xlane.xlu1 %3185 }
0x1bb8   :  { %v3021_v57 = vpack.c.bf16 %v3018_v20, %v3017_v45 }
0x1bba   :  { %5826 = vmatprep.mubr.msk.bf16.mxu1 %vm191_vm1, %v3021_v57 }
0x1bbb   :  { %5827 = vmatmul.mubr.msk.bf16.vlgmr.msra.gmra.mrb[56].mxu1 %vm191_vm1, %v3022_v2  ;;  %v3206_v3 = vpop.permute.xlu1 %3205 }
0x1bbc   :  { %5839 = vmatpush3.bf16.msra.mxu1 %v3204_v33 }
0x1bbd   :  { %5840 = vmatprep.subr.bf16.mxu1 %v3206_v3 }
0x1bbf   :  { %v3271_v27 = vpop.permute.xlu1 %3270 }
0x1bc0   :  { %5841 = vmatpush3.bf16.msra.mxu1 %v3206_v3  ;;  %v3282_v60 = vsel %vm430_vm2, %v3271_v27, 0 }
0x1bdf   :  { %v3189_v32 = vpop.xlane.xlu0 %3188 }
0x1be0   :  { %6421 = vrcp.f32 %v3189_v32 }
0x1be1   :  { %6423 = vrcp.f32 %v3186_v43 }
0x1be2   :  { %6425 = vrcp.f32 %v3192_v31 }
0x1be3   :  { %v3183_v36 = vpop.xlane.xlu0 %3182 }
0x1be4   :  { %6427 = vrcp.f32 %v3183_v36 }
0x1be7   :  { %v3269_v5 = vpop.permute.xlu0 %3268 }
0x1be8   :  { %6010 = vmatprep.subr.msk.bf16.mxu1 %vm430_vm2, %v3269_v5  ;;  %v3279_v44 = vsel %vm430_vm2, %v3269_v5, 0 }
0x1bea   :  { %v6422_v34 = vpop.eup %6421 }
0x1beb   :  { %v6424_v13 = vpop.eup %6423  ;;  %v3199_v11 = vmul.f32 %v6422_v34, %v6410_v61  ;;  %v3265_v28 = vpop.permute.xlu0 %3264 }
0x1bec   :  { %v6426_v8 = vpop.eup %6425  ;;  %v3198_v19 = vmul.f32 %v6424_v13, %v7751_v24  ;;  %v3267_v24 = vpop.permute.xlu1 %3266 }
0x1bed   :  { %v3200_v55 = vmul.f32 %v6426_v8, %v7747_v35 }
0x1bee   :  { %v6428_v62 = vpop.eup %6427 }
0x1bef   :  { %v3197_v15 = vmul.f32 %v6428_v62, %v6412_v56  ;;  %v3202_v38 = vpack.c.bf16 %v3200_v55, %v3199_v11 }
0x1bf1   :  { %v3201_v37 = vpack.c.bf16 %v3198_v19, %v3197_v15 }
0x1bf3   :  { %5842 = vmatprep.mubr.msk.bf16.mxu1 %vm191_vm1, %v3201_v37 }
0x1bf4   :  { %5843 = vmatmul.mubr.msk.bf16.vlgmr.msra.gmra.mrb[60].mxu1 %vm191_vm1, %v3202_v38 }
0x1bf5   :  { %5847 = vmatpush3.bf16.xpose.msra.mxu1 %v3279_v44  ;;  %5850 = vmatprep.mubr.msk.bf16.mxu1 %vm430_vm2, %v3265_v28 }
0x1bf6   :  { %6011 = vmatprep.subr.msk.bf16.mxu1 %vm430_vm2, %v3271_v27 }
0x1bfd   :  { %5849 = vmatpush3.bf16.xpose.msra.mxu1 %v3282_v60 }
0x1c04   :  { %5851 = vmatmul.mubr.msk.bf16.vlgmr.msra.gmra.mrb[64].mxu1 %vm430_vm2, %v3267_v24 }
0x1c0b   :  { %v5812_v35 = vpop.f32.mrb[52].mxu1 }
0x1c0c   :  { %v2889_v54 = vpop.f32.mrb[53].mxu1  ;;  %v2898_v10 = vadd.f32 %v5812_v35, %v7607_v17 }
0x1c0d   :  { %v5813_v30 = vpop.f32.mrb[54].mxu1  ;;  %v2890_v58 = vadd.f32 %v7607_v17, %v2889_v54 }
0x1c0e   :  { %v2901_v52 = vadd.f32 %v5813_v30, %v7607_v17  ;;  %v2892_v22 = vpop.f32.mrb[55].mxu1 }
0x1c0f   :  { %v2893_v50 = vadd.f32 %v7607_v17, %v2892_v22 }
0x1c10   :  { %v7806_v49 = vpack.c.bf16 %v2901_v52, %v2898_v10 }
0x1c11   :  { %v7808_v7 = vpack.c.bf16 %v2893_v50, %v2890_v58 }
0x1c8e   :  { %v7810_v61 = vpop.f32.mrb[56].mxu1 }
0x1c8f   :  { %v7812_v12 = vpop.f32.mrb[57].mxu1 }
0x1c90   :  { %v7814_v56 = vpop.f32.mrb[58].mxu1 }
0x1c91   :  { %v7816_v4 = vpop.f32.mrb[59].mxu1 }
0x1cc7   :  { %v7818_v53 = vpop.f32.mrb[60].mxu1 }
0x1cc8   :  { %v7820_v33 = vpop.f32.mrb[61].mxu1 }
0x1cc9   :  { %v7822_v40 = vpop.f32.mrb[62].mxu1 }
0x1cca   :  { %v6104_v17 = vpack.i.bf16 %v7822_v40, %v7818_v53  ;;  %v7826_v6 = vpop.f32.mrb[63].mxu1 }
0x1ccb   :  { %v6099_v46 = vpack.i.bf16 %v7826_v6, %v7820_v33 }
0x1cd7   :  { %v5852_v39 = vpop.f32.mrb[64].mxu1 }
0x1cd8   :  { %v3318_v63 = vpop.f32.mrb[65].mxu1  ;;  %v3335_v59 = vsel %vm182_vm3, %v5852_v39, -1e+30 }
0x1cd9   :  { %v3333_v18 = vsel %vm182_vm3, %v3318_v63, -1e+30  ;;  %v5853_v9 = vpop.f32.mrb[66].mxu1  ;;  %v3343_v20 = vsel %vm191_vm1, %v3335_v59, -inf }
0x1cda   :  { %v3337_v31 = vsel %vm191_vm1, %v3333_v18, -inf  ;;  %v3321_v41 = vpop.f32.mrb[67].mxu1  ;;  %v3336_v51 = vsel %vm182_vm3, %v5853_v9, -1e+30 }
0x1cdb   :  { %v3334_v23 = vsel %vm182_vm3, %v3321_v41, -1e+30  ;;  %3338 = vmax.xlane.f32.xlu0 %v3337_v31  ;;  %v3346_v43 = vsel %vm191_vm1, %v3336_v51, -inf }
0x1cdc   :  { %v3340_v45 = vsel %vm191_vm1, %v3334_v23, -inf }
0x1cdd   :  { %3341 = vmax.xlane.f32.xlu1 %v3340_v45 }
0x1cdf   :  { %3344 = vmax.xlane.f32.xlu0 %v3343_v20 }
0x1ce3   :  { %3347 = vmax.xlane.f32.xlu0 %v3346_v43 }
0x1cee   :  { %3385 = vrot.lane.b32.xlu1 %v7613_v0, %s6606_s11 }
0x1d68   :  { %v3339_v57 = vpop.xlane.xlu0 %3338 }
0x1d69   :  { %v3349_v2 = vsub.f32 %v3333_v18, %v3339_v57 }
0x1d6a   :  { %v3342_v3 = vpop.xlane.xlu1 %3341 }
0x1d6b   :  { %v3353_v5 = vmul.f32 1.442695, %v3349_v2  ;;  %v3350_v34 = vsub.f32 %v3334_v23, %v3342_v3 }
0x1d6c   :  { %v3345_v32 = vpop.xlane.xlu0 %3344 }
0x1d6d   :  { %v3351_v36 = vsub.f32 %v3335_v59, %v3345_v32  ;;  %v3355_v11 = vmul.f32 1.442695, %v3350_v34 }
0x1d6e   :  { %v3386_v24 = vpop.permute.xlu1 %3385 }
0x1d6f   :  { %v3357_v13 = vmul.f32 1.442695, %v3351_v36 }
0x1d70   :  { %v3348_v8 = vpop.xlane.xlu0 %3347 }
0x1d71   :  { %6429 = vpow2.f32 %v3357_v13  ;;  %v3352_v62 = vsub.f32 %v3336_v51, %v3348_v8 }
0x1d72   :  { %6431 = vpow2.f32 %v3353_v5 }
0x1d73   :  { %v3359_v15 = vmul.f32 1.442695, %v3352_v62 }
0x1d75   :  { %6433 = vpow2.f32 %v3359_v15 }
0x1d76   :  { %6435 = vpow2.f32 %v3355_v11 }
0x1d7b   :  { %v6430_v19 = vpop.eup %6429 }
0x1d7c   :  { %v3367_v55 = vsel %vm191_vm1, %v6430_v19, 0.0  ;;  %v6432_v37 = vpop.eup %6431 }
0x1d7d   :  { %3368 = vadd.xlane.f32.xlu0 %v3367_v55  ;;  %v3361_v28 = vsel %vm191_vm1, %v6432_v37, 0.0 }
0x1d7f   :  { %v6434_v38 = vpop.eup %6433 }
0x1d80   :  { %v3370_v44 = vsel %vm191_vm1, %v6434_v38, 0.0  ;;  %v6436_v27 = vpop.eup %6435 }
0x1d81   :  { %3362 = vadd.xlane.f32.xlu0 %v3361_v28  ;;  %3371 = vadd.xlane.f32.xlu1 %v3370_v44  ;;  %v3364_v60 = vsel %vm191_vm1, %v6436_v27, 0.0 }
0x1d85   :  { %3365 = vadd.xlane.f32.xlu1 %v3364_v60 }
0x1d96   :  { %3448 = vrot.lane.b32.xlu1 %v7615_v48, %s6607_s12 }
0x1d97   :  { %3383 = vrot.lane.b32.xlu0 %v7615_v48, %s6606_s11 }
0x1d9a   :  { %3450 = vrot.lane.b32.xlu1 %v7613_v0, %s6607_s12 }
0x1d9b   :  { %3444 = vrot.lane.b32.xlu0 %v7615_v48, %s6608_s13 }
0x1d9e   :  { %3446 = vrot.lane.b32.xlu1 %v7613_v0, %s6608_s13 }
0x1e0a   :  { %v3369_v35 = vpop.xlane.xlu0 %3368 }
0x1e0e   :  { %v3363_v54 = vpop.xlane.xlu0 %3362  ;;  %v3372_v30 = vpop.xlane.xlu1 %3371 }
0x1e0f   :  { %6437 = vrcp.f32 %v3372_v30 }
0x1e10   :  { %6439 = vrcp.f32 %v3363_v54 }
0x1e11   :  { %6441 = vrcp.f32 %v3369_v35 }
0x1e12   :  { %v3384_v10 = vpop.permute.xlu0 %3383  ;;  %v3366_v52 = vpop.xlane.xlu1 %3365 }
0x1e13   :  { %6443 = vrcp.f32 %v3366_v52  ;;  %5854 = vmatprep.subr.bf16.mxu0 %v3384_v10 }
0x1e14   :  { %5855 = vmatpush3.bf16.msra.mxu0 %v3384_v10 }
0x1e15   :  { %5856 = vmatprep.subr.bf16.mxu0 %v3386_v24 }
0x1e16   :  { %v3449_v22 = vpop.permute.xlu1 %3448  ;;  %v3445_v45 = vpop.permute.xlu0 %3444 }
0x1e17   :  { %v3459_v20 = vsel %vm430_vm2, %v3449_v22, 0 }
0x1e18   :  { %5857 = vmatpush3.bf16.msra.mxu0 %v3386_v24 }
0x1e19   :  { %6012 = vmatprep.subr.msk.bf16.mxu0 %vm430_vm2, %v3449_v22  ;;  %v6438_v58 = vpop.eup %6437 }
0x1e1a   :  { %v6440_v50 = vpop.eup %6439  ;;  %v3380_v18 = vmul.f32 %v6438_v58, %v6434_v38  ;;  %v3451_v51 = vpop.permute.xlu1 %3450 }
0x1e1b   :  { %v6442_v39 = vpop.eup %6441  ;;  %v3377_v9 = vmul.f32 %v6440_v50, %v6432_v37  ;;  %v3462_v43 = vsel %vm430_vm2, %v3451_v51, 0 }
0x1e1c   :  { %v3379_v41 = vmul.f32 %v6442_v39, %v6430_v19 }
0x1e1d   :  { %v6444_v63 = vpop.eup %6443 }
0x1e1e   :  { %v3378_v31 = vmul.f32 %v6444_v63, %v6436_v27  ;;  %v3382_v23 = vpack.c.bf16 %v3380_v18, %v3379_v41  ;;  %v3447_v57 = vpop.permute.xlu1 %3446 }
0x1e20   :  { %v3381_v59 = vpack.c.bf16 %v3378_v31, %v3377_v9 }
0x1e22   :  { %5858 = vmatprep.mubr.msk.bf16.mxu0 %vm191_vm1, %v3381_v59 }
0x1e23   :  { %5859 = vmatmul.mubr.msk.bf16.vlgmr.msra.gmra.mrb[64].mxu0 %vm191_vm1, %v3382_v23 }
0x1e24   :  { %5863 = vmatpush3.bf16.xpose.msra.mxu0 %v3459_v20  ;;  %5866 = vmatprep.mubr.msk.bf16.mxu0 %vm430_vm2, %v3445_v45 }
0x1e25   :  { %6013 = vmatprep.subr.msk.bf16.mxu0 %vm430_vm2, %v3451_v51 }
0x1e2c   :  { %5865 = vmatpush3.bf16.xpose.msra.mxu0 %v3462_v43 }
0x1e33   :  { %5867 = vmatmul.mubr.msk.bf16.vlgmr.msra.gmra.mrb[68].mxu0 %vm430_vm2, %v3447_v57 }
0x1ef6   :  { %v7866_v2 = vpop.f32.mrb[64].mxu0 }
0x1ef7   :  { %v7868_v3 = vpop.f32.mrb[65].mxu0 }
0x1ef8   :  { %v7870_v32 = vpop.f32.mrb[66].mxu0 }
0x1ef9   :  { %v6114_v36 = vpack.i.bf16 %v7870_v32, %v7866_v2  ;;  %v7874_v5 = vpop.f32.mrb[67].mxu0 }
0x1efa   :  { %v6109_v34 = vpack.i.bf16 %v7874_v5, %v7868_v3 }
0x1f06   :  { %v5868_v13 = vpop.f32.mrb[68].mxu0 }
0x1f07   :  { %v3498_v8 = vpop.f32.mrb[69].mxu0  ;;  %v3515_v55 = vsel %vm182_vm3, %v5868_v13, -1e+30 }
0x1f08   :  { %v3513_v62 = vsel %vm182_vm3, %v3498_v8, -1e+30  ;;  %v5869_v11 = vpop.f32.mrb[70].mxu0  ;;  %v3523_v28 = vsel %vm191_vm1, %v3515_v55, -inf }
0x1f09   :  { %v3517_v15 = vsel %vm191_vm1, %v3513_v62, -inf  ;;  %v3501_v19 = vpop.f32.mrb[71].mxu0  ;;  %v3516_v44 = vsel %vm182_vm3, %v5869_v11, -1e+30 }
0x1f0a   :  { %v3514_v37 = vsel %vm182_vm3, %v3501_v19, -1e+30  ;;  %3518 = vmax.xlane.f32.xlu0 %v3517_v15  ;;  %v3526_v27 = vsel %vm191_vm1, %v3516_v44, -inf }
0x1f0b   :  { %v3520_v38 = vsel %vm191_vm1, %v3514_v37, -inf }
0x1f0c   :  { %3521 = vmax.xlane.f32.xlu1 %v3520_v38 }
0x1f0e   :  { %3524 = vmax.xlane.f32.xlu0 %v3523_v28 }
0x1f12   :  { %3527 = vmax.xlane.f32.xlu0 %v3526_v27 }
0x1f1d   :  { %3565 = vrot.lane.b32.xlu1 %v7613_v0, %s6609_s14 }
0x1f97   :  { %v3519_v60 = vpop.xlane.xlu0 %3518 }
0x1f98   :  { %v3529_v24 = vsub.f32 %v3513_v62, %v3519_v60 }
0x1f99   :  { %v3522_v35 = vpop.xlane.xlu1 %3521 }
0x1f9a   :  { %v3533_v10 = vmul.f32 1.442695, %v3529_v24  ;;  %v3530_v52 = vsub.f32 %v3514_v37, %v3522_v35 }
0x1f9b   :  { %v3525_v54 = vpop.xlane.xlu0 %3524 }
0x1f9c   :  { %v3531_v30 = vsub.f32 %v3515_v55, %v3525_v54  ;;  %v3535_v39 = vmul.f32 1.442695, %v3530_v52 }
0x1f9d   :  { %v3566_v20 = vpop.permute.xlu1 %3565 }
0x1f9e   :  { %v3537_v22 = vmul.f32 1.442695, %v3531_v30 }
0x1f9f   :  { %v3528_v58 = vpop.xlane.xlu0 %3527 }
0x1fa0   :  { %6445 = vpow2.f32 %v3537_v22  ;;  %v3532_v50 = vsub.f32 %v3516_v44, %v3528_v58 }
0x1fa1   :  { %6447 = vpow2.f32 %v3533_v10 }
0x1fa2   :  { %v3539_v63 = vmul.f32 1.442695, %v3532_v50 }
0x1fa4   :  { %6449 = vpow2.f32 %v3539_v63 }
0x1fa5   :  { %6451 = vpow2.f32 %v3535_v39 }
0x1faa   :  { %v6446_v18 = vpop.eup %6445 }
0x1fab   :  { %v3547_v9 = vsel %vm191_vm1, %v6446_v18, 0.0  ;;  %v6448_v0 = vpop.eup %6447 }
0x1fac   :  { %3548 = vadd.xlane.f32.xlu0 %v3547_v9  ;;  %v3541_v41 = vsel %vm191_vm1, %v6448_v0, 0.0 }
0x1fae   :  { %v6450_v31 = vpop.eup %6449 }
0x1faf   :  { %v3550_v59 = vsel %vm191_vm1, %v6450_v31, 0.0  ;;  %v6452_v23 = vpop.eup %6451 }
0x1fb0   :  { %3542 = vadd.xlane.f32.xlu0 %v3541_v41  ;;  %3551 = vadd.xlane.f32.xlu1 %v3550_v59  ;;  %v3544_v45 = vsel %vm191_vm1, %v6452_v23, 0.0 }
0x1fb4   :  { %3545 = vadd.xlane.f32.xlu1 %v3544_v45 }
0x1fc5   :  { %3688 = vrot.lane.b32.xlu1 %v7808_v7, %s6599_s26 }
0x1fc6   :  { %3563 = vrot.lane.b32.xlu0 %v7615_v48, %s6609_s14 }
0x1fc9   :  { %3690 = vrot.lane.b32.xlu1 %v7806_v49, %s6599_s26 }
0x2039   :  { %v3549_v51 = vpop.xlane.xlu0 %3548 }
0x203d   :  { %v3543_v43 = vpop.xlane.xlu0 %3542  ;;  %v3552_v57 = vpop.xlane.xlu1 %3551 }
0x203e   :  { %6453 = vrcp.f32 %v3552_v57 }
0x203f   :  { %6455 = vrcp.f32 %v3543_v43 }
0x2040   :  { %6457 = vrcp.f32 %v3549_v51 }
0x2041   :  { %v3564_v13 = vpop.permute.xlu0 %3563  ;;  %v3546_v8 = vpop.xlane.xlu1 %3545 }
0x2042   :  { %6459 = vrcp.f32 %v3546_v8  ;;  %5870 = vmatprep.subr.bf16.mxu1 %v3564_v13 }
0x2043   :  { %5871 = vmatpush3.bf16.msra.mxu1 %v3564_v13 }
0x2044   :  { %5872 = vmatprep.subr.bf16.mxu1 %v3566_v20 }
0x2045   :  { %v3689_v62 = vpop.permute.xlu1 %3688 }
0x2046   :  { %v3699_v60 = vsel %vm430_vm2, %v3689_v62, 0 }
0x2047   :  { %5873 = vmatpush3.bf16.msra.mxu1 %v3566_v20 }
0x2048   :  { %6014 = vmatprep.subr.msk.bf16.mxu1 %vm430_vm2, %v3689_v62  ;;  %v6454_v48 = vpop.eup %6453 }
0x2049   :  { %v6456_v11 = vpop.eup %6455  ;;  %v3560_v55 = vmul.f32 %v6454_v48, %v6450_v31  ;;  %v3691_v24 = vpop.permute.xlu1 %3690 }
0x204a   :  { %v6458_v15 = vpop.eup %6457  ;;  %v3557_v37 = vmul.f32 %v6456_v11, %v6448_v0  ;;  %v3702_v35 = vsel %vm430_vm2, %v3691_v24, 0 }
0x204b   :  { %v3559_v28 = vmul.f32 %v6458_v15, %v6446_v18 }
0x204c   :  { %v6460_v19 = vpop.eup %6459 }
0x204d   :  { %v3558_v38 = vmul.f32 %v6460_v19, %v6452_v23  ;;  %v3562_v27 = vpack.c.bf16 %v3560_v55, %v3559_v28 }
0x204f   :  { %v3561_v44 = vpack.c.bf16 %v3558_v38, %v3557_v37 }
0x2051   :  { %5874 = vmatprep.mubr.msk.bf16.mxu1 %vm191_vm1, %v3561_v44 }
0x2052   :  { %5875 = vmatmul.mubr.msk.bf16.vlgmr.msra.gmra.mrb[68].mxu1 %vm191_vm1, %v3562_v27 }
0x2053   :  { %5879 = vmatpush3.bf16.xpose.msra.mxu1 %v3699_v60  ;;  %5882 = vmatprep.mubr.msk.bf16.mxu1 %vm430_vm2, %v7808_v7 }
0x2054   :  { %6015 = vmatprep.subr.msk.bf16.mxu1 %vm430_vm2, %v3691_v24 }
0x205b   :  { %5881 = vmatpush3.bf16.xpose.msra.mxu1 %v3702_v35 }
0x2062   :  { %5883 = vmatmul.mubr.msk.bf16.vlgmr.msra.gmra.mrb[72].mxu1 %vm430_vm2, %v7806_v49 }
0x2125   :  { %v7912_v54 = vpop.f32.mrb[68].mxu1 }
0x2126   :  { %v7914_v30 = vpop.f32.mrb[69].mxu1 }
0x2127   :  { %v7916_v10 = vpop.f32.mrb[70].mxu1 }
0x2128   :  { %v6124_v52 = vpack.i.bf16 %v7916_v10, %v7912_v54  ;;  %v7920_v22 = vpop.f32.mrb[71].mxu1 }
0x2129   :  { %v6119_v58 = vpack.i.bf16 %v7920_v22, %v7914_v30 }
0x2135   :  { %v5884_v50 = vpop.f32.mrb[72].mxu1 }
0x2136   :  { %v3738_v39 = vpop.f32.mrb[73].mxu1  ;;  %v3755_v31 = vsel %vm182_vm3, %v5884_v50, -1e+30 }
0x2137   :  { %v3753_v63 = vsel %vm182_vm3, %v3738_v39, -1e+30  ;;  %v5885_v18 = vpop.f32.mrb[74].mxu1  ;;  %v3763_v23 = vsel %vm191_vm1, %v3755_v31, -inf }
0x2138   :  { %v3757_v9 = vsel %vm191_vm1, %v3753_v63, -inf  ;;  %v3741_v0 = vpop.f32.mrb[75].mxu1  ;;  %v3756_v45 = vsel %vm182_vm3, %v5885_v18, -1e+30 }
0x2139   :  { %v3754_v41 = vsel %vm182_vm3, %v3741_v0, -1e+30  ;;  %3758 = vmax.xlane.f32.xlu0 %v3757_v9  ;;  %v3766_v20 = vsel %vm191_vm1, %v3756_v45, -inf }
0x213a   :  { %v3760_v59 = vsel %vm191_vm1, %v3754_v41, -inf }
0x213b   :  { %3761 = vmax.xlane.f32.xlu1 %v3760_v59 }
0x213d   :  { %3764 = vmax.xlane.f32.xlu0 %v3763_v23 }
0x2141   :  { %3767 = vmax.xlane.f32.xlu0 %v3766_v20 }
0x214c   :  { %3805 = vrot.lane.b32.xlu1 %v7806_v49, %s6602_s29 }
0x21c6   :  { %v3759_v51 = vpop.xlane.xlu0 %3758 }
0x21c7   :  { %v3769_v43 = vsub.f32 %v3753_v63, %v3759_v51 }
0x21c8   :  { %v3762_v57 = vpop.xlane.xlu1 %3761 }
0x21c9   :  { %v3773_v62 = vmul.f32 1.442695, %v3769_v43  ;;  %v3770_v48 = vsub.f32 %v3754_v41, %v3762_v57 }
0x21ca   :  { %v3765_v13 = vpop.xlane.xlu0 %3764 }
0x21cb   :  { %v3771_v8 = vsub.f32 %v3755_v31, %v3765_v13  ;;  %v3775_v55 = vmul.f32 1.442695, %v3770_v48 }
0x21cc   :  { %v3806_v39 = vpop.permute.xlu1 %3805 }
0x21cd   :  { %v3777_v11 = vmul.f32 1.442695, %v3771_v8 }
0x21ce   :  { %v3768_v15 = vpop.xlane.xlu0 %3767 }
0x21cf   :  { %6461 = vpow2.f32 %v3777_v11  ;;  %v3772_v19 = vsub.f32 %v3756_v45, %v3768_v15 }
0x21d0   :  { %6463 = vpow2.f32 %v3773_v62 }
0x21d1   :  { %v3779_v37 = vmul.f32 1.442695, %v3772_v19 }
0x21d3   :  { %6465 = vpow2.f32 %v3779_v37 }
0x21d4   :  { %6467 = vpow2.f32 %v3775_v55 }
0x21d9   :  { %v6462_v38 = vpop.eup %6461 }
0x21da   :  { %v3787_v28 = vsel %vm191_vm1, %v6462_v38, 0.0  ;;  %v6464_v44 = vpop.eup %6463 }
0x21db   :  { %3788 = vadd.xlane.f32.xlu0 %v3787_v28  ;;  %v3781_v60 = vsel %vm191_vm1, %v6464_v44, 0.0 }
0x21dd   :  { %v6466_v27 = vpop.eup %6465 }
0x21de   :  { %v3790_v24 = vsel %vm191_vm1, %v6466_v27, 0.0  ;;  %v6468_v35 = vpop.eup %6467 }
0x21df   :  { %3782 = vadd.xlane.f32.xlu0 %v3781_v60  ;;  %3791 = vadd.xlane.f32.xlu1 %v3790_v24  ;;  %v3784_v50 = vsel %vm191_vm1, %v6468_v35, 0.0 }
0x21e3   :  { %3785 = vadd.xlane.f32.xlu1 %v3784_v50 }
0x21f4   :  { %3868 = vrot.lane.b32.xlu1 %v7808_v7, %s6600_s27 }
0x21f5   :  { %3803 = vrot.lane.b32.xlu0 %v7808_v7, %s6602_s29 }
0x21f8   :  { %3870 = vrot.lane.b32.xlu1 %v7806_v49, %s6600_s27 }
0x21f9   :  { %3864 = vrot.lane.b32.xlu0 %v7808_v7, %s6601_s28 }
0x21fc   :  { %3866 = vrot.lane.b32.xlu1 %v7806_v49, %s6601_s28 }
0x2268   :  { %v3789_v63 = vpop.xlane.xlu0 %3788 }
0x226c   :  { %v3783_v18 = vpop.xlane.xlu0 %3782  ;;  %v3792_v9 = vpop.xlane.xlu1 %3791 }
0x226d   :  { %6469 = vrcp.f32 %v3792_v9 }
0x226e   :  { %6471 = vrcp.f32 %v3783_v18 }
0x226f   :  { %6473 = vrcp.f32 %v3789_v63 }
0x2270   :  { %v3804_v0 = vpop.permute.xlu0 %3803  ;;  %v3786_v31 = vpop.xlane.xlu1 %3785 }
0x2271   :  { %6475 = vrcp.f32 %v3786_v31  ;;  %5886 = vmatprep.subr.bf16.mxu0 %v3804_v0 }
0x2272   :  { %5887 = vmatpush3.bf16.msra.mxu0 %v3804_v0 }
0x2273   :  { %5888 = vmatprep.subr.bf16.mxu0 %v3806_v39 }
0x2274   :  { %v3869_v41 = vpop.permute.xlu1 %3868  ;;  %v3865_v48 = vpop.permute.xlu0 %3864 }
0x2275   :  { %v3879_v11 = vsel %vm430_vm2, %v3869_v41, 0 }
0x2276   :  { %5889 = vmatpush3.bf16.msra.mxu0 %v3806_v39 }
0x2277   :  { %6016 = vmatprep.subr.msk.bf16.mxu0 %vm430_vm2, %v3869_v41  ;;  %v6470_v59 = vpop.eup %6469 }
0x2278   :  { %v6472_v23 = vpop.eup %6471  ;;  %v3800_v51 = vmul.f32 %v6470_v59, %v6466_v27  ;;  %v3871_v15 = vpop.permute.xlu1 %3870 }
0x2279   :  { %v6474_v45 = vpop.eup %6473  ;;  %v3797_v43 = vmul.f32 %v6472_v23, %v6464_v44  ;;  %v3882_v19 = vsel %vm430_vm2, %v3871_v15, 0 }
0x227a   :  { %v3799_v13 = vmul.f32 %v6474_v45, %v6462_v38 }
0x227b   :  { %v6476_v20 = vpop.eup %6475 }
0x227c   :  { %v3798_v57 = vmul.f32 %v6476_v20, %v6468_v35  ;;  %v3802_v62 = vpack.c.bf16 %v3800_v51, %v3799_v13  ;;  %v3867_v55 = vpop.permute.xlu1 %3866 }
0x227e   :  { %v3801_v8 = vpack.c.bf16 %v3798_v57, %v3797_v43 }
0x2280   :  { %5890 = vmatprep.mubr.msk.bf16.mxu0 %vm191_vm1, %v3801_v8 }
0x2281   :  { %5891 = vmatmul.mubr.msk.bf16.vlgmr.msra.gmra.mrb[72].mxu0 %vm191_vm1, %v3802_v62 }
0x2282   :  { %5895 = vmatpush3.bf16.xpose.msra.mxu0 %v3879_v11  ;;  %5898 = vmatprep.mubr.msk.bf16.mxu0 %vm430_vm2, %v3865_v48 }
0x2283   :  { %6017 = vmatprep.subr.msk.bf16.mxu0 %vm430_vm2, %v3871_v15 }
0x228a   :  { %5897 = vmatpush3.bf16.xpose.msra.mxu0 %v3882_v19 }
0x2291   :  { %5899 = vmatmul.mubr.msk.bf16.vlgmr.msra.gmra.mrb[76].mxu0 %vm430_vm2, %v3867_v55 }
0x2354   :  { %v7960_v37 = vpop.f32.mrb[72].mxu0 }
0x2355   :  { %v7962_v38 = vpop.f32.mrb[73].mxu0 }
0x2356   :  { %v7964_v28 = vpop.f32.mrb[74].mxu0 }
0x2357   :  { %v7966_v44 = vpop.f32.mrb[75].mxu0 }
0x2364   :  { %v5900_v27 = vpop.f32.mrb[76].mxu0 }
0x2365   :  { %v3918_v60 = vpop.f32.mrb[77].mxu0  ;;  %v3935_v63 = vsel %vm182_vm3, %v5900_v27, -1e+30 }
0x2366   :  { %v3933_v24 = vsel %vm182_vm3, %v3918_v60, -1e+30  ;;  %v5901_v35 = vpop.f32.mrb[78].mxu0  ;;  %v3943_v0 = vsel %vm191_vm1, %v3935_v63, -inf }
0x2367   :  { %v3937_v50 = vsel %vm191_vm1, %v3933_v24, -inf  ;;  %v3921_v39 = vpop.f32.mrb[79].mxu0  ;;  %v3936_v31 = vsel %vm182_vm3, %v5901_v35, -1e+30 }
0x2368   :  { %v3934_v18 = vsel %vm182_vm3, %v3921_v39, -1e+30  ;;  %3938 = vmax.xlane.f32.xlu0 %v3937_v50  ;;  %v3946_v41 = vsel %vm191_vm1, %v3936_v31, -inf }
0x2369   :  { %v3940_v9 = vsel %vm191_vm1, %v3934_v18, -inf }
0x236a   :  { %3941 = vmax.xlane.f32.xlu1 %v3940_v9 }
0x236c   :  { %3944 = vmax.xlane.f32.xlu0 %v3943_v0 }
0x2370   :  { %3947 = vmax.xlane.f32.xlu0 %v3946_v41 }
0x237b   :  { %3985 = vrot.lane.b32.xlu1 %v7806_v49, %s6603_s0 }
0x23f5   :  { %v3939_v59 = vpop.xlane.xlu0 %3938 }
0x23f6   :  { %v3949_v23 = vsub.f32 %v3933_v24, %v3939_v59 }
0x23f7   :  { %v3942_v45 = vpop.xlane.xlu1 %3941 }
0x23f8   :  { %v3953_v43 = vmul.f32 1.442695, %v3949_v23  ;;  %v3950_v57 = vsub.f32 %v3934_v18, %v3942_v45 }
0x23f9   :  { %v3945_v20 = vpop.xlane.xlu0 %3944 }
0x23fa   :  { %v3951_v51 = vsub.f32 %v3935_v63, %v3945_v20  ;;  %v3955_v48 = vmul.f32 1.442695, %v3950_v57 }
0x23fb   :  { %v3986_v39 = vpop.permute.xlu1 %3985 }
0x23fc   :  { %v3957_v13 = vmul.f32 1.442695, %v3951_v51 }
0x23fd   :  { %v3948_v8 = vpop.xlane.xlu0 %3947 }
0x23fe   :  { %6477 = vpow2.f32 %v3957_v13  ;;  %v3952_v62 = vsub.f32 %v3936_v31, %v3948_v8 }
0x23ff   :  { %6479 = vpow2.f32 %v3953_v43 }
0x2400   :  { %v3959_v11 = vmul.f32 1.442695, %v3952_v62 }
0x2402   :  { %6481 = vpow2.f32 %v3959_v11 }
0x2403   :  { %6483 = vpow2.f32 %v3955_v48 }
0x2408   :  { %v6478_v15 = vpop.eup %6477 }
0x2409   :  { %v3967_v19 = vsel %vm191_vm1, %v6478_v15, 0.0  ;;  %v6480_v55 = vpop.eup %6479 }
0x240a   :  { %3968 = vadd.xlane.f32.xlu0 %v3967_v19  ;;  %v3961_v60 = vsel %vm191_vm1, %v6480_v55, 0.0 }
0x240c   :  { %v6482_v27 = vpop.eup %6481 }
0x240d   :  { %v3970_v24 = vsel %vm191_vm1, %v6482_v27, 0.0  ;;  %v6484_v35 = vpop.eup %6483 }
0x240e   :  { %3962 = vadd.xlane.f32.xlu0 %v3961_v60  ;;  %3971 = vadd.xlane.f32.xlu1 %v3970_v24  ;;  %v3964_v50 = vsel %vm191_vm1, %v6484_v35, 0.0 }
0x2412   :  { %3965 = vadd.xlane.f32.xlu1 %v3964_v50 }
0x2423   :  { %4048 = vrot.lane.b32.xlu1 %v7808_v7, %s6604_s30 }
0x2424   :  { %3983 = vrot.lane.b32.xlu0 %v7808_v7, %s6603_s0 }
0x2427   :  { %4050 = vrot.lane.b32.xlu1 %v7806_v49, %s6604_s30 }
0x2428   :  { %4044 = vrot.lane.b32.xlu0 %v7808_v7, %s6605_s10 }
0x242b   :  { %4046 = vrot.lane.b32.xlu1 %v7806_v49, %s6605_s10  ;;  %s6615_s10 = smov [#allocation2]  }
0x2497   :  { %v3969_v63 = vpop.xlane.xlu0 %3968 }
0x249b   :  { %v3963_v18 = vpop.xlane.xlu0 %3962  ;;  %v3972_v9 = vpop.xlane.xlu1 %3971 }
0x249c   :  { %6485 = vrcp.f32 %v3972_v9 }
0x249d   :  { %6487 = vrcp.f32 %v3963_v18 }
0x249e   :  { %6489 = vrcp.f32 %v3969_v63 }
0x249f   :  { %v3984_v0 = vpop.permute.xlu0 %3983  ;;  %v3966_v31 = vpop.xlane.xlu1 %3965 }
0x24a0   :  { %6491 = vrcp.f32 %v3966_v31  ;;  %5902 = vmatprep.subr.bf16.mxu1 %v3984_v0 }
0x24a1   :  { %5903 = vmatpush3.bf16.msra.mxu1 %v3984_v0 }
0x24a2   :  { %5904 = vmatprep.subr.bf16.mxu1 %v3986_v39 }
0x24a3   :  { %v4049_v41 = vpop.permute.xlu1 %4048  ;;  %v4045_v48 = vpop.permute.xlu0 %4044 }
0x24a4   :  { %v4059_v11 = vsel %vm430_vm2, %v4049_v41, 0 }
0x24a5   :  { %5905 = vmatpush3.bf16.msra.mxu1 %v3986_v39 }
0x24a6   :  { %6018 = vmatprep.subr.msk.bf16.mxu1 %vm430_vm2, %v4049_v41  ;;  %v6486_v59 = vpop.eup %6485 }
0x24a7   :  { %v6488_v23 = vpop.eup %6487  ;;  %v3980_v51 = vmul.f32 %v6486_v59, %v6482_v27  ;;  %v4051_v19 = vpop.permute.xlu1 %4050 }
0x24a8   :  { %v6490_v45 = vpop.eup %6489  ;;  %v3977_v43 = vmul.f32 %v6488_v23, %v6480_v55  ;;  %v4062_v27 = vsel %vm430_vm2, %v4051_v19, 0 }
0x24a9   :  { %v3979_v13 = vmul.f32 %v6490_v45, %v6478_v15 }
0x24aa   :  { %v6492_v20 = vpop.eup %6491 }
0x24ab   :  { %v3978_v57 = vmul.f32 %v6492_v20, %v6484_v35  ;;  %v3982_v62 = vpack.c.bf16 %v3980_v51, %v3979_v13  ;;  %v4047_v55 = vpop.permute.xlu1 %4046 }
0x24ad   :  { %v3981_v8 = vpack.c.bf16 %v3978_v57, %v3977_v43 }
0x24af   :  { %5906 = vmatprep.mubr.msk.bf16.mxu1 %vm191_vm1, %v3981_v8 }
0x24b0   :  { %5907 = vmatmul.mubr.msk.bf16.vlgmr.msra.gmra.mrb[76].mxu1 %vm191_vm1, %v3982_v62 }
0x24b1   :  { %5911 = vmatpush3.bf16.xpose.msra.mxu1 %v4059_v11  ;;  %5914 = vmatprep.mubr.msk.bf16.mxu1 %vm430_vm2, %v4045_v48 }
0x24b2   :  { %6019 = vmatprep.subr.msk.bf16.mxu1 %vm430_vm2, %v4051_v19 }
0x24b9   :  { %5913 = vmatpush3.bf16.xpose.msra.mxu1 %v4062_v27 }
0x24c0   :  { %5915 = vmatmul.mubr.msk.bf16.vlgmr.msra.gmra.mrb[80].mxu1 %vm430_vm2, %v4047_v55 }
0x2583   :  { %v8004_v15 = vpop.f32.mrb[76].mxu1 }
0x2584   :  { %v8006_v60 = vpop.f32.mrb[77].mxu1 }
0x2585   :  { %v8008_v24 = vpop.f32.mrb[78].mxu1 }
0x2586   :  { %v6134_v35 = vpack.i.bf16 %v8008_v24, %v8004_v15  ;;  %v8012_v50 = vpop.f32.mrb[79].mxu1 }
0x2587   :  { %v6129_v39 = vpack.i.bf16 %v8012_v50, %v8006_v60 }
0x2593   :  { %v5916_v63 = vpop.f32.mrb[80].mxu1 }
0x2594   :  { %v4098_v18 = vpop.f32.mrb[81].mxu1  ;;  %v4115_v59 = vsel %vm182_vm3, %v5916_v63, -1e+30 }
0x2595   :  { %v4113_v9 = vsel %vm182_vm3, %v4098_v18, -1e+30  ;;  %v5917_v0 = vpop.f32.mrb[82].mxu1  ;;  %v4123_v20 = vsel %vm191_vm1, %v4115_v59, -inf }
0x2596   :  { %v4117_v31 = vsel %vm191_vm1, %v4113_v9, -inf  ;;  %v4101_v41 = vpop.f32.mrb[83].mxu1  ;;  %v4116_v51 = vsel %vm182_vm3, %v5917_v0, -1e+30 }
0x2597   :  { %v4114_v23 = vsel %vm182_vm3, %v4101_v41, -1e+30  ;;  %4118 = vmax.xlane.f32.xlu0 %v4117_v31  ;;  %v4126_v43 = vsel %vm191_vm1, %v4116_v51, -inf }
0x2598   :  { %v4120_v45 = vsel %vm191_vm1, %v4114_v23, -inf }
0x2599   :  { %4121 = vmax.xlane.f32.xlu1 %v4120_v45 }
0x259b   :  { %4124 = vmax.xlane.f32.xlu0 %v4123_v20 }
0x259f   :  { %4127 = vmax.xlane.f32.xlu0 %v4126_v43 }
0x25aa   :  { %4165 = vrot.lane.b32.xlu1 %v7806_v49, %s6606_s11 }
0x2624   :  { %v4119_v57 = vpop.xlane.xlu0 %4118 }
0x2625   :  { %v4129_v13 = vsub.f32 %v4113_v9, %v4119_v57 }
0x2626   :  { %v4122_v8 = vpop.xlane.xlu1 %4121 }
0x2627   :  { %v4133_v11 = vmul.f32 1.442695, %v4129_v13  ;;  %v4130_v19 = vsub.f32 %v4114_v23, %v4122_v8 }
0x2628   :  { %v4125_v62 = vpop.xlane.xlu0 %4124 }
0x2629   :  { %v4131_v48 = vsub.f32 %v4115_v59, %v4125_v62  ;;  %v4135_v18 = vmul.f32 1.442695, %v4130_v19 }
0x262a   :  { %v4166_v43 = vpop.permute.xlu1 %4165 }
0x262b   :  { %v4137_v27 = vmul.f32 1.442695, %v4131_v48 }
0x262c   :  { %v4128_v55 = vpop.xlane.xlu0 %4127 }
0x262d   :  { %6493 = vpow2.f32 %v4137_v27  ;;  %v4132_v63 = vsub.f32 %v4116_v51, %v4128_v55 }
0x262e   :  { %6495 = vpow2.f32 %v4133_v11 }
0x262f   :  { %v4139_v0 = vmul.f32 1.442695, %v4132_v63 }
0x2631   :  { %6497 = vpow2.f32 %v4139_v0 }
0x2632   :  { %6499 = vpow2.f32 %v4135_v18 }
0x2637   :  { %v6494_v31 = vpop.eup %6493 }
0x2638   :  { %v4147_v41 = vsel %vm191_vm1, %v6494_v31, 0.0  ;;  %v6496_v45 = vpop.eup %6495 }
0x2639   :  { %4148 = vadd.xlane.f32.xlu0 %v4147_v41  ;;  %v4141_v20 = vsel %vm191_vm1, %v6496_v45, 0.0 }
0x263b   :  { %v6498_v9 = vpop.eup %6497 }
0x263c   :  { %v4150_v59 = vsel %vm191_vm1, %v6498_v9, 0.0  ;;  %v6500_v23 = vpop.eup %6499 }
0x263d   :  { %4142 = vadd.xlane.f32.xlu0 %v4141_v20  ;;  %4151 = vadd.xlane.f32.xlu1 %v4150_v59  ;;  %v4144_v51 = vsel %vm191_vm1, %v6500_v23, 0.0 }
0x2641   :  { %4145 = vadd.xlane.f32.xlu1 %v4144_v51 }
0x2652   :  { %4228 = vrot.lane.b32.xlu1 %v7808_v7, %s6607_s12 }
0x2653   :  { %4163 = vrot.lane.b32.xlu0 %v7808_v7, %s6606_s11  ;;  %s5237_s11 = sshll.u32 %s6615_s10, 4  ;;  %s5238_s11 = int_to_ptr.vmem [resolvable:$true] %s5237_s11 }
0x2654   :  { %p6580_p1 = scmp.lt.s32.totalorder %s5238_s11, %s5238_s11 }
0x2656   :  { %4230 = vrot.lane.b32.xlu1 %v7806_v49, %s6607_s12  ;;  %s6575_s12 = scalar_lea.vmem %s5238_s11, 32 }
0x2657   :  { %4224 = vrot.lane.b32.xlu0 %v7808_v7, %s6608_s13  ;;  %p6576_p0 = scmp.ne.s32.totalorder %s5238_s11, %s6575_s12  ;;  %p6581_p2 = scmp.lt.s32.totalorder %s6575_s12, %s6575_s12 }
0x2659   :  { %p6582_p3 = por %p6581_p2, %p6580_p1 }
0x265a   :  { %4226 = vrot.lane.b32.xlu1 %v7806_v49, %s6608_s13 }
0x265b   :  { %p6583_p4 = pnand %p6582_p3, %p6576_p0 }
0x26c6   :  { %v4149_v57 = vpop.xlane.xlu0 %4148 }
0x26ca   :  { %v4143_v13 = vpop.xlane.xlu0 %4142  ;;  %v4152_v8 = vpop.xlane.xlu1 %4151 }
0x26cb   :  { %6501 = vrcp.f32 %v4152_v8 }
0x26cc   :  { %6503 = vrcp.f32 %v4143_v13 }
0x26cd   :  { %6505 = vrcp.f32 %v4149_v57 }
0x26ce   :  { %v4164_v62 = vpop.permute.xlu0 %4163  ;;  %v4146_v48 = vpop.xlane.xlu1 %4145 }
0x26cf   :  { %6507 = vrcp.f32 %v4146_v48  ;;  %5918 = vmatprep.subr.bf16.mxu0 %v4164_v62 }
0x26d0   :  { %5919 = vmatpush3.bf16.msra.mxu0 %v4164_v62 }
0x26d1   :  { %5920 = vmatprep.subr.bf16.mxu0 %v4166_v43 }
0x26d2   :  { %v4229_v11 = vpop.permute.xlu1 %4228  ;;  %v4225_v57 = vpop.permute.xlu0 %4224 }
0x26d3   :  { %v4239_v13 = vsel %vm430_vm2, %v4229_v11, 0 }
0x26d4   :  { %5921 = vmatpush3.bf16.msra.mxu0 %v4166_v43 }
0x26d5   :  { %6020 = vmatprep.subr.msk.bf16.mxu0 %vm430_vm2, %v4229_v11  ;;  %v6502_v19 = vpop.eup %6501 }
0x26d6   :  { %v6504_v27 = vpop.eup %6503  ;;  %v4160_v18 = vmul.f32 %v6502_v19, %v6498_v9  ;;  %v4231_v43 = vpop.permute.xlu1 %4230 }
0x26d7   :  { %v6506_v55 = vpop.eup %6505  ;;  %v4157_v0 = vmul.f32 %v6504_v27, %v6496_v45  ;;  %v4242_v9 = vsel %vm430_vm2, %v4231_v43, 0 }
0x26d8   :  { %v4159_v20 = vmul.f32 %v6506_v55, %v6494_v31 }
0x26d9   :  { %v6508_v63 = vpop.eup %6507 }
0x26da   :  { %v4158_v41 = vmul.f32 %v6508_v63, %v6500_v23  ;;  %v4162_v51 = vpack.c.bf16 %v4160_v18, %v4159_v20  ;;  %v4227_v45 = vpop.permute.xlu1 %4226 }
0x26dc   :  { %v4161_v59 = vpack.c.bf16 %v4158_v41, %v4157_v0 }
0x26de   :  { %5922 = vmatprep.mubr.msk.bf16.mxu0 %vm191_vm1, %v4161_v59 }
0x26df   :  { %5923 = vmatmul.mubr.msk.bf16.vlgmr.msra.gmra.mrb[80].mxu0 %vm191_vm1, %v4162_v51 }
0x26e0   :  { %5927 = vmatpush3.bf16.xpose.msra.mxu0 %v4239_v13  ;;  %5930 = vmatprep.mubr.msk.bf16.mxu0 %vm430_vm2, %v4225_v57 }
0x26e1   :  { %6021 = vmatprep.subr.msk.bf16.mxu0 %vm430_vm2, %v4231_v43 }
0x26e8   :  { %5929 = vmatpush3.bf16.xpose.msra.mxu0 %v4242_v9 }
0x26ef   :  { %5931 = vmatmul.mubr.msk.bf16.vlgmr.msra.gmra.mrb[84].mxu0 %vm430_vm2, %v4227_v45 }
0x27b2   :  { %v5924_v31 = vpop.f32.mrb[80].mxu0 }
0x27b3   :  { %v4209_v23 = vpop.f32.mrb[81].mxu0 }
0x27b4   :  { %v5925_v8 = vpop.f32.mrb[82].mxu0 }
0x27b5   :  { %v6144_v62 = vpack.i.bf16 %v5925_v8, %v5924_v31  ;;  %v4212_v48 = vpop.f32.mrb[83].mxu0 }
0x27b6   :  { %v6139_v11 = vpack.i.bf16 %v4212_v48, %v4209_v23 }
0x27c2   :  { %v5932_v19 = vpop.f32.mrb[84].mxu0 }
0x27c3   :  { %v4278_v27 = vpop.f32.mrb[85].mxu0  ;;  %v4295_v41 = vsel %vm182_vm3, %v5932_v19, -1e+30 }
0x27c4   :  { %v4293_v55 = vsel %vm182_vm3, %v4278_v27, -1e+30  ;;  %v5933_v63 = vpop.f32.mrb[86].mxu0  ;;  %v4303_v51 = vsel %vm191_vm1, %v4295_v41, -inf }
0x27c5   :  { %v4297_v18 = vsel %vm191_vm1, %v4293_v55, -inf  ;;  %v4281_v0 = vpop.f32.mrb[87].mxu0  ;;  %v4296_v57 = vsel %vm182_vm3, %v5933_v63, -1e+30 }
0x27c6   :  { %v4294_v20 = vsel %vm182_vm3, %v4281_v0, -1e+30  ;;  %4298 = vmax.xlane.f32.xlu0 %v4297_v18  ;;  %v4306_v13 = vsel %vm191_vm1, %v4296_v57, -inf }
0x27c7   :  { %v4300_v59 = vsel %vm191_vm1, %v4294_v20, -inf }
0x27c8   :  { %4301 = vmax.xlane.f32.xlu1 %v4300_v59 }
0x27ca   :  { %4304 = vmax.xlane.f32.xlu0 %v4303_v51 }
0x27ce   :  { %4307 = vmax.xlane.f32.xlu0 %v4306_v13 }
0x2853   :  { %v4299_v43 = vpop.xlane.xlu0 %4298 }
0x2854   :  { %v4309_v9 = vsub.f32 %v4293_v55, %v4299_v43 }
0x2855   :  { %v4302_v45 = vpop.xlane.xlu1 %4301 }
0x2856   :  { %v4313_v8 = vmul.f32 1.442695, %v4309_v9  ;;  %v4310_v48 = vsub.f32 %v4294_v20, %v4302_v45 }
0x2857   :  { %v4305_v31 = vpop.xlane.xlu0 %4304 }
0x2858   :  { %v4311_v23 = vsub.f32 %v4295_v41, %v4305_v31  ;;  %v4315_v0 = vmul.f32 1.442695, %v4310_v48 }
0x285a   :  { %v4317_v19 = vmul.f32 1.442695, %v4311_v23 }
0x285b   :  { %v4308_v27 = vpop.xlane.xlu0 %4307 }
0x285c   :  { %6509 = vpow2.f32 %v4317_v19  ;;  %v4312_v18 = vsub.f32 %v4296_v57, %v4308_v27 }
0x285d   :  { %6511 = vpow2.f32 %v4313_v8 }
0x285e   :  { %v4319_v59 = vmul.f32 1.442695, %v4312_v18 }
0x2860   :  { %6513 = vpow2.f32 %v4319_v59 }
0x2861   :  { %6515 = vpow2.f32 %v4315_v0 }
0x2866   :  { %v6510_v1 = vpop.eup %6509 }
0x2867   :  { %v4327_v63 = vsel %vm191_vm1, %v6510_v1, 0.0  ;;  %v6512_v51 = vpop.eup %6511 }
0x2868   :  { %4328 = vadd.xlane.f32.xlu0 %v4327_v63  ;;  %v4321_v13 = vsel %vm191_vm1, %v6512_v51, 0.0 }
0x286a   :  { %v6514_v55 = vpop.eup %6513 }
0x286b   :  { %v4330_v41 = vsel %vm191_vm1, %v6514_v55, 0.0  ;;  %v6516_v20 = vpop.eup %6515 }
0x286c   :  { %4322 = vadd.xlane.f32.xlu0 %v4321_v13  ;;  %4331 = vadd.xlane.f32.xlu1 %v4330_v41  ;;  %v4324_v57 = vsel %vm191_vm1, %v6516_v20, 0.0 }
0x2870   :  { %4325 = vadd.xlane.f32.xlu1 %v4324_v57 }
0x2881   :  { %4345 = vrot.lane.b32.xlu1 %v7806_v49, %s6609_s14 }
0x2882   :  { %4343 = vrot.lane.b32.xlu0 %v7808_v7, %s6609_s14 }
0x2885   :  { %6100 = vrot.lane.b32.xlu1 %v6099_v46, %s6610_s15 }
0x2886   :  { %6110 = vrot.lane.b32.xlu0 %v6109_v34, %s6611_s16 }
0x2889   :  { %6105 = vrot.lane.b32.xlu1 %v6104_v17, %s6610_s15  ;;  %v6179_v17 = vld [vmem:[%s8395_s4 + $0x10] sm:$0xff]  }
0x288a   :  { %6120 = vrot.lane.b32.xlu0 %v6119_v58, %s6612_s17 }
0x288d   :  { %6115 = vrot.lane.b32.xlu1 %v6114_v36, %s6611_s16 }
0x288e   :  { %6130 = vrot.lane.b32.xlu0 %v6129_v39, %s6610_s15 }
0x2891   :  { %6125 = vrot.lane.b32.xlu1 %v6124_v52, %s6612_s17 }
0x2892   :  { %6140 = vrot.lane.b32.xlu0 %v6139_v11, %s6611_s16 }
0x2895   :  { %6135 = vrot.lane.b32.xlu1 %v6134_v35, %s6610_s15 }
0x2899   :  { %6145 = vrot.lane.b32.xlu1 %v6144_v62, %s6611_s16 }
0x28f5   :  { %v4329_v49 = vpop.xlane.xlu0 %4328 }
0x28f9   :  { %v4323_v7 = vpop.xlane.xlu0 %4322  ;;  %v4332_v53 = vpop.xlane.xlu1 %4331 }
0x28fa   :  { %6517 = vrcp.f32 %v4323_v7 }
0x28fb   :  { %6519 = vrcp.f32 %v4332_v53 }
0x28fc   :  { %6521 = vrcp.f32 %v4329_v49 }
0x28fd   :  { %v4344_v33 = vpop.permute.xlu0 %4343  ;;  %v4326_v40 = vpop.xlane.xlu1 %4325 }
0x28fe   :  { %6523 = vrcp.f32 %v4326_v40  ;;  %5934 = vmatprep.subr.bf16.mxu1 %v4344_v33 }
0x28ff   :  { %5935 = vmatpush3.bf16.msra.mxu1 %v4344_v33 }
0x2901   :  { %v6111_v6 = vpop.permute.xlu0 %6110  ;;  %v4346_v46 = vpop.permute.xlu1 %4345 }
0x2902   :  { %5936 = vmatprep.subr.bf16.mxu1 %v4346_v46  ;;  %v6113_v54 = vunpack.i.h.bf16 %v6111_v6  ;;  %v6112_v30 = vunpack.i.l.bf16 %v6111_v6 }
0x2903   :  { %5937 = vmatpush3.bf16.msra.mxu1 %v4346_v46 }
0x2904   :  { %v6518_v2 = vpop.eup %6517  ;;  %5942 = vmatprep.subr.bf16.mxu1 %v6179_v17 }
0x2905   :  { %v6520_v3 = vpop.eup %6519  ;;  %v6121_v32 = vpop.permute.xlu0 %6120  ;;  %v4337_v60 = vmul.f32 %v6518_v2, %v6512_v51 }
0x2906   :  { %v6101_v36 = vpop.permute.xlu1 %6100  ;;  %v6522_v34 = vpop.eup %6521  ;;  %v4340_v22 = vmul.f32 %v6520_v3, %v6514_v55  ;;  %v6123_v58 = vunpack.i.h.bf16 %v6121_v32  ;;  %v6122_v24 = vunpack.i.l.bf16 %v6121_v32  ;;  %v8138_v3 = vld [vmem:[%s8398_s7 + $0xc] ss:$0 sm:$0xff] }
0x2907   :  { %v6103_v5 = vunpack.i.h.bf16 %v6101_v36  ;;  %v6102_v10 = vunpack.i.l.bf16 %v6101_v36  ;;  %v4339_v11 = vmul.f32 %v6522_v34, %v6510_v1 }
0x2908   :  { %v6524_v52 = vpop.eup %6523 }
0x2909   :  { %v3673_v15 = vsel %vm430_vm2, %v7816_v4, %v6103_v5  ;;  %v3672_v50 = vsel %vm430_vm2, %v7812_v12, %v6102_v10  ;;  %v4338_v62 = vmul.f32 %v6524_v52, %v6516_v20  ;;  %v4342_v23 = vpack.c.bf16 %v4340_v22, %v4339_v11  ;;  %v6180_v4 = vld [vmem:[%s8395_s4 + $0x18] sm:$0xff]   ;;  %v6131_v22 = vpop.permute.xlu0 %6130 }
0x290a   :  { %v3677_v35 = vsel %vm1197_vm4, %v3673_v15, %v6113_v54  ;;  %v6106_v39 = vpop.permute.xlu1 %6105  ;;  %v3676_v43 = vsel %vm1197_vm4, %v3672_v50, %v6112_v30  ;;  %v6133_v15 = vunpack.i.h.bf16 %v6131_v22 }
0x290b   :  { %v4341_v9 = vpack.c.bf16 %v4338_v62, %v4337_v60  ;;  %v3680_v45 = vsel %vm1202_vm5, %v3676_v43, %v6122_v24  ;;  %v3681_v31 = vsel %vm1202_vm5, %v3677_v35, %v6123_v58  ;;  %v6108_v12 = vunpack.i.h.bf16 %v6106_v39 }
0x290c   :  { %v4464_v8 = vpack.c.bf16 %v3681_v31, %v3680_v45  ;;  %v6107_v19 = vunpack.i.l.bf16 %v6106_v39  ;;  %v6132_v60 = vunpack.i.l.bf16 %v6131_v22 }
0x290d   :  { %5938 = vmatprep.mubr.msk.bf16.mxu1 %vm191_vm1, %v4341_v9  ;;  %v3675_v59 = vsel %vm430_vm2, %v7814_v56, %v6108_v12  ;;  %v6141_v24 = vpop.permute.xlu0 %6140  ;;  %v4453_v9 = vsel %vm430_vm2, %v7966_v44, %v6133_v15 }
0x290e   :  { %v6116_v48 = vpop.permute.xlu1 %6115  ;;  %5939 = vmatmul.mubr.msk.bf16.vlgmr.msra.gmra.mrb[84].mxu1 %vm191_vm1, %v4342_v23  ;;  %v3674_v1 = vsel %vm430_vm2, %v7810_v61, %v6107_v19  ;;  %v6143_v11 = vunpack.i.h.bf16 %v6141_v24  ;;  %v6142_v43 = vunpack.i.l.bf16 %v6141_v24  ;;  %v4452_v45 = vsel %vm430_vm2, %v7962_v38, %v6132_v60  ;;  %v6181_v24 = vld [vmem:[%s8396_s5 + $0x10] sm:$0xff]  }
0x290f   :  { %v6118_v27 = vunpack.i.h.bf16 %v6116_v48  ;;  %v6117_v18 = vunpack.i.l.bf16 %v6116_v48  ;;  %5946 = vmatprep.mubr.msk.bf16.mxu1 %vm191_vm1, %v4464_v8  ;;  %5943 = vmatpush3.bf16.msra.mxu1 %v6179_v17 }
0x2910   :  { %5944 = vmatprep.subr.bf16.mxu1 %v6180_v4  ;;  %v4456_v44 = vsel %vm1197_vm4, %v4452_v45, %v6142_v43  ;;  %v4457_v38 = vsel %vm1197_vm4, %v4453_v9, %v6143_v11  ;;  %5954 = vmatprep.subr.bf16.mxu0 %v6181_v24 }
0x2911   :  { %v3678_v55 = vsel %vm1197_vm4, %v3674_v1, %v6117_v18  ;;  %v3679_v13 = vsel %vm1197_vm4, %v3675_v59, %v6118_v27  ;;  %5955 = vmatpush3.bf16.msra.mxu0 %v6181_v24 }
0x2912   :  { %v6126_v0 = vpop.permute.xlu1 %6125 }
0x2913   :  { %v6128_v63 = vunpack.i.h.bf16 %v6126_v0  ;;  %v6127_v51 = vunpack.i.l.bf16 %v6126_v0  ;;  %5945 = vmatpush3.bf16.msra.mxu1 %v6180_v4 }
0x2915   :  { %v3682_v41 = vsel %vm1202_vm5, %v3678_v55, %v6127_v51  ;;  %v3683_v20 = vsel %vm1202_vm5, %v3679_v13, %v6128_v63 }
0x2916   :  { %v4465_v57 = vpack.c.bf16 %v3683_v20, %v3682_v41  ;;  %v6136_v52 = vpop.permute.xlu1 %6135 }
0x2917   :  { %v6138_v35 = vunpack.i.h.bf16 %v6136_v52  ;;  %v6137_v50 = vunpack.i.l.bf16 %v6136_v52 }
0x2918   :  { %5947 = vmatmul.mubr.msk.bf16.vlgmr.msra.gmra.mrb[88].mxu1 %vm191_vm1, %v4465_v57 }
0x2919   :  { %v4455_v23 = vsel %vm430_vm2, %v7964_v28, %v6138_v35  ;;  %v4454_v8 = vsel %vm430_vm2, %v7960_v37, %v6137_v50  ;;  %v6182_v35 = vld [vmem:[%s8396_s5 + $0x18] sm:$0xff]  }
0x291a   :  { %v6146_v58 = vpop.permute.xlu1 %6145  ;;  %5956 = vmatprep.subr.bf16.mxu0 %v6182_v35 }
0x291b   :  { %v6148_v39 = vunpack.i.h.bf16 %v6146_v58  ;;  %v6147_v62 = vunpack.i.l.bf16 %v6146_v58  ;;  %5957 = vmatpush3.bf16.msra.mxu0 %v6182_v35 }
0x291d   :  { %v4458_v19 = vsel %vm1197_vm4, %v4454_v8, %v6147_v62  ;;  %v4459_v27 = vsel %vm1197_vm4, %v4455_v23, %v6148_v39 }
0x29e1   :  { %v5940_v49 = vpop.f32.mrb[84].mxu1 }
0x29e2   :  { %v4389_v7 = vpop.f32.mrb[85].mxu1 }
0x29e3   :  { %v5941_v56 = vpop.f32.mrb[86].mxu1 }
0x29e4   :  { %v6154_v53 = vpack.i.bf16 %v5941_v56, %v5940_v49  ;;  %v4392_v33 = vpop.f32.mrb[87].mxu1 }
0x29e5   :  { %v6149_v61 = vpack.i.bf16 %v4392_v33, %v4389_v7 }
0x29e6   :  { %6155 = vrot.lane.b32.xlu1 %v6154_v53, %s6612_s17 }
0x29e7   :  { %6150 = vrot.lane.b32.xlu0 %v6149_v61, %s6612_s17 }
0x29eb   :  { %v5948_v40 = vpop.f32.mrb[88].mxu1 }
0x29ec   :  { %v4531_v17 = vpop.f32.mrb[89].mxu1  ;;  %v4564_v32 = vadd.f32 %v5948_v40, %v7461_v42 }
0x29ed   :  { %v5949_v6 = vpop.f32.mrb[90].mxu1  ;;  %v4562_v2 = vadd.f32 %v4531_v17, %v7453_v26 }
0x29ee   :  { %v4534_v46 = vpop.f32.mrb[91].mxu1  ;;  %v8146_v34 = vadd.f32 %v8138_v3, %v4564_v32  ;;  %v4565_v54 = vadd.f32 %v5949_v6, %v7472_v21 }
0x29ef   :  { %v8142_v36 = vadd.f32 %v8138_v3, %v4562_v2  ;;  %v4563_v5 = vadd.f32 %v4534_v46, %v7464_v16 }
0x29f0   :  { %v8155_v10 = vadd.f32 %v8138_v3, %v4565_v54  ;;  %v4588_v42 = vsel %vm191_vm1, %v8146_v34, 0.0 }
0x29f1   :  { %v8150_v30 = vadd.f32 %v8138_v3, %v4563_v5  ;;  %v4582_v26 = vsel %vm191_vm1, %v8142_v36, 0.0 }
0x29f2   :  { %v4591_v21 = vsel %vm191_vm1, %v8155_v10, 0.0 }
0x29f3   :  { %v4585_v16 = vsel %vm191_vm1, %v8150_v30, 0.0 }
0x2a06   :  { %4583 = vadd.xlane.f32.xlu0 %v4582_v26 }
0x2a0a   :  { %4589 = vadd.xlane.f32.xlu0 %v4588_v42  ;;  %4586 = vadd.xlane.f32.xlu1 %v4585_v16 }
0x2a0e   :  { %4592 = vadd.xlane.f32.xlu0 %v4591_v21 }
0x2a58   :  { %v6156_v31 = vpop.permute.xlu1 %6155 }
0x2a59   :  { %v6158_v4 = vunpack.i.h.bf16 %v6156_v31  ;;  %v6157_v48 = vunpack.i.l.bf16 %v6156_v31  ;;  %v6151_v12 = vpop.permute.xlu0 %6150 }
0x2a5a   :  { %v6153_v18 = vunpack.i.h.bf16 %v6151_v12  ;;  %v6152_v0 = vunpack.i.l.bf16 %v6151_v12 }
0x2a5b   :  { %v4462_v59 = vsel %vm1202_vm5, %v4458_v19, %v6157_v48  ;;  %v4463_v28 = vsel %vm1202_vm5, %v4459_v27, %v6158_v4 }
0x2a5c   :  { %v4467_v1 = vpack.c.bf16 %v4463_v28, %v4462_v59  ;;  %v4461_v37 = vsel %vm1202_vm5, %v4457_v38, %v6153_v18  ;;  %v4460_v63 = vsel %vm1202_vm5, %v4456_v44, %v6152_v0 }
0x2a5d   :  { %v4466_v51 = vpack.c.bf16 %v4461_v37, %v4460_v63 }
0x2a5f   :  { %5950 = vmatprep.mubr.msk.bf16.mxu1 %vm191_vm1, %v4466_v51 }
0x2a60   :  { %5951 = vmatmul.mubr.msk.bf16.gmra.mrb[92].mxu1 %vm191_vm1, %v4467_v1 }
0x2a93   :  { %v4584_v55 = vpop.xlane.xlu0 %4583 }
0x2a94   :  { %v4606_v20 = vmul.f32 0.03125, %v4584_v55 }
0x2a96   :  { %v8189_v46 = vsub.f32 %v8142_v36, %v4606_v20 }
0x2a97   :  { %v4590_v13 = vpop.xlane.xlu0 %4589  ;;  %v4587_v57 = vpop.xlane.xlu1 %4586 }
0x2a98   :  { %v4607_v61 = vmul.f32 0.03125, %v4587_v57  ;;  %v4608_v32 = vmul.f32 0.03125, %v4590_v13  ;;  %v4622_v21 = vmul.f32 %v8189_v46, %v8189_v46 }
0x2a9a   :  { %v8196_v54 = vsub.f32 %v8150_v30, %v4607_v61  ;;  %v8201_v42 = vsub.f32 %v8146_v34, %v4608_v32  ;;  %v4630_v22 = vsel %vm191_vm1, %v4622_v21, 0.0  ;;  %v5380_v32 = vld [vmem:[%s8398_s7 + $0xb] ss:$0 sm:$0xff] }
0x2a9b   :  { %v4593_v2 = vpop.xlane.xlu0 %4592 }
0x2a9c   :  { %v4609_v26 = vmul.f32 0.03125, %v4593_v2  ;;  %v4624_v34 = vmul.f32 %v8201_v42, %v8201_v42 }
0x2a9e   :  { %v8207_v52 = vsub.f32 %v8155_v10, %v4609_v26  ;;  %v4636_v10 = vsel %vm191_vm1, %v4624_v34, 0.0 }
0x2aa0   :  { %v4625_v15 = vmul.f32 %v8207_v52, %v8207_v52 }
0x2aa2   :  { %v4639_v60 = vsel %vm191_vm1, %v4625_v15, 0.0 }
0x2b33   :  { %v5952_v41 = vpop.f32.mrb[92].mxu1 }
0x2b34   :  { %v4547_v49 = vpop.f32.mrb[93].mxu1  ;;  %v4568_v7 = vadd.f32 %v5952_v41, %v7643_v14 }
0x2b35   :  { %v4566_v56 = vadd.f32 %v4547_v49, %v7639_v29  ;;  %v5953_v53 = vpop.f32.mrb[94].mxu1 }
0x2b36   :  { %v4550_v33 = vpop.f32.mrb[95].mxu1  ;;  %v4569_v17 = vadd.f32 %v5953_v53, %v7657_v25  ;;  %v4580_v5 = vadd.f32 %v8138_v3, %v4568_v7  ;;  %v5379_v53 = vld [vmem:[%s8398_s7 + $0xa] ss:$0 sm:$0xff] }
0x2b37   :  { %v8184_v40 = vadd.f32 %v8138_v3, %v4566_v56  ;;  %v4567_v6 = vadd.f32 %v4550_v33, %v7647_v47 }
0x2b38   :  { %v4581_v25 = vadd.f32 %v8138_v3, %v4569_v17  ;;  %v4600_v16 = vsel %vm191_vm1, %v4580_v5, 0.0 }
0x2b39   :  { %v4579_v14 = vadd.f32 %v8138_v3, %v4567_v6  ;;  %v4594_v29 = vsel %vm191_vm1, %v8184_v40, 0.0  ;;  %v4623_v3 = vmul.f32 %v8196_v54, %v8196_v54 }
0x2b3a   :  { %4595 = vadd.xlane.f32.xlu0 %v4594_v29  ;;  %v4603_v30 = vsel %vm191_vm1, %v4581_v25, 0.0 }
0x2b3b   :  { %v4597_v47 = vsel %vm191_vm1, %v4579_v14, 0.0  ;;  %v4633_v58 = vsel %vm191_vm1, %v4623_v3, 0.0 }
0x2b3c   :  { %4598 = vadd.xlane.f32.xlu1 %v4597_v47 }
0x2b3e   :  { %4601 = vadd.xlane.f32.xlu0 %v4600_v16 }
0x2b40   :  { %4604 = vadd.xlane.f32.xlu1 %v4603_v30 }
0x2b42   :  { %4631 = vadd.xlane.f32.xlu0 %v4630_v22 }
0x2b44   :  { %4634 = vadd.xlane.f32.xlu1 %v4633_v58 }
0x2b46   :  { %4637 = vadd.xlane.f32.xlu0 %v4636_v10 }
0x2b48   :  { %4640 = vadd.xlane.f32.xlu1 %v4639_v60 }
0x2bc7   :  { %v4596_v50 = vpop.xlane.xlu0 %4595 }
0x2bc8   :  { %v4610_v39 = vmul.f32 0.03125, %v4596_v50 }
0x2bc9   :  { %v4599_v62 = vpop.xlane.xlu1 %4598 }
0x2bca   :  { %v8227_v11 = vsub.f32 %v8184_v40, %v4610_v39  ;;  %v4611_v43 = vmul.f32 0.03125, %v4599_v62  ;;  %v6183_v62 = vld [vmem:[%s8397_s6 + $0x20] sm:$0xff]  }
0x2bcb   :  { %v4602_v9 = vpop.xlane.xlu0 %4601  ;;  %5966 = vmatprep.subr.bf16.mxu1 %v6183_v62 }
0x2bcc   :  { %v8229_v45 = vsub.f32 %v4579_v14, %v4611_v43  ;;  %v4612_v31 = vmul.f32 0.03125, %v4602_v9  ;;  %v4626_v23 = vmul.f32 %v8227_v11, %v8227_v11  ;;  %5967 = vmatpush3.bf16.msra.mxu1 %v6183_v62 }
0x2bcd   :  { %v4605_v8 = vpop.xlane.xlu1 %4604 }
0x2bce   :  { %v8233_v4 = vsub.f32 %v4580_v5, %v4612_v31  ;;  %v4613_v48 = vmul.f32 0.03125, %v4605_v8  ;;  %v4642_v12 = vsel %vm191_vm1, %v4626_v23, 0.0  ;;  %v4627_v19 = vmul.f32 %v8229_v45, %v8229_v45 }
0x2bcf   :  { %4643 = vadd.xlane.f32.xlu0 %v4642_v12  ;;  %v4632_v27 = vpop.xlane.xlu0 %4631 }
0x2bd0   :  { %v8238_v18 = vsub.f32 %v4581_v25, %v4613_v48  ;;  %v4654_v0 = vmul.f32 0.03125, %v4632_v27  ;;  %v4645_v44 = vsel %vm191_vm1, %v4627_v19, 0.0  ;;  %v4628_v38 = vmul.f32 %v8233_v4, %v8233_v4  ;;  %v6184_v48 = vld [vmem:[%s8397_s6 + $0x28] sm:$0xff]  }
0x2bd1   :  { %4646 = vadd.xlane.f32.xlu1 %v4645_v44  ;;  %v4635_v59 = vpop.xlane.xlu1 %4634  ;;  %5968 = vmatprep.subr.bf16.mxu1 %v6184_v48 }
0x2bd2   :  { %v4662_v28 = vadd.f32 1e-05, %v4654_v0  ;;  %v4655_v1 = vmul.f32 0.03125, %v4635_v59  ;;  %v4648_v37 = vsel %vm191_vm1, %v4628_v38, 0.0  ;;  %v4629_v63 = vmul.f32 %v8238_v18, %v8238_v18  ;;  %5969 = vmatpush3.bf16.msra.mxu1 %v6184_v48 }
0x2bd3   :  { %4649 = vadd.xlane.f32.xlu0 %v4648_v37  ;;  %v4638_v51 = vpop.xlane.xlu0 %4637 }
0x2bd4   :  { %6525 = vrsqrt.f32 %v4662_v28  ;;  %v4663_v55 = vadd.f32 1e-05, %v4655_v1  ;;  %v4656_v13 = vmul.f32 0.03125, %v4638_v51  ;;  %v4651_v41 = vsel %vm191_vm1, %v4629_v63, 0.0  ;;  %v6186_v63 = vld [vmem:[%s8397_s6 + $0x38] sm:$0xff]  }
0x2bd5   :  { %4652 = vadd.xlane.f32.xlu1 %v4651_v41  ;;  %v4641_v20 = vpop.xlane.xlu1 %4640  ;;  %v8280_v51 = vld [vmem:[%s8398_s7 + $0xe] ss:$0 sm:$0xff] }
0x2bd6   :  { %6527 = vrsqrt.f32 %v4663_v55  ;;  %v4664_v57 = vadd.f32 1e-05, %v4656_v13  ;;  %v4657_v49 = vmul.f32 0.03125, %v4641_v20 }
0x2bd8   :  { %6529 = vrsqrt.f32 %v4664_v57  ;;  %v4665_v7 = vadd.f32 1e-05, %v4657_v49 }
0x2bda   :  { %6531 = vrsqrt.f32 %v4665_v7 }
0x2bde   :  { %v6526_v56 = vpop.eup %6525 }
0x2bdf   :  { %v4678_v33 = vmul.f32 %v6526_v56, %v8189_v46 }
0x2be0   :  { %v6528_v61 = vpop.eup %6527 }
0x2be1   :  { %v4679_v17 = vmul.f32 %v6528_v61, %v8196_v54  ;;  %v4690_v6 = vmul.f32 %v5379_v53, %v4678_v33 }
0x2be2   :  { %v6530_v2 = vpop.eup %6529 }
0x2be3   :  { %v4680_v5 = vmul.f32 %v6530_v2, %v8201_v42  ;;  %v4691_v14 = vmul.f32 %v5379_v53, %v4679_v17  ;;  %v4702_v47 = vadd.f32 %v5380_v32, %v4690_v6 }
0x2be4   :  { %v6532_v29 = vpop.eup %6531 }
0x2be5   :  { %v4692_v26 = vmul.f32 %v5379_v53, %v4680_v5  ;;  %v4681_v25 = vmul.f32 %v6532_v29, %v8207_v52  ;;  %v4703_v16 = vadd.f32 %v5380_v32, %v4691_v14 }
0x2be7   :  { %v4693_v21 = vmul.f32 %v5379_v53, %v4681_v25  ;;  %v4710_v46 = vpack.c.bf16 %v4703_v16, %v4702_v47  ;;  %v4704_v54 = vadd.f32 %v5380_v32, %v4692_v26 }
0x2be9   :  { %5958 = vmatprep.mubr.msk.bf16.mxu0 %vm191_vm1, %v4710_v46  ;;  %v4705_v30 = vadd.f32 %v5380_v32, %v4693_v21 }
0x2beb   :  { %v4711_v3 = vpack.c.bf16 %v4705_v30, %v4704_v54 }
0x2bed   :  { %5959 = vmatmul.mubr.msk.bf16.vlgmr.msra.gmra.mrb[88].mxu0 %vm191_vm1, %v4711_v3 }
0x2c5c   :  { %v4644_v22 = vpop.xlane.xlu0 %4643 }
0x2c5d   :  { %v4658_v34 = vmul.f32 0.03125, %v4644_v22 }
0x2c5e   :  { %v4647_v58 = vpop.xlane.xlu1 %4646 }
0x2c5f   :  { %v4666_v42 = vadd.f32 1e-05, %v4658_v34  ;;  %v4659_v15 = vmul.f32 0.03125, %v4647_v58 }
0x2c60   :  { %v4650_v10 = vpop.xlane.xlu0 %4649 }
0x2c61   :  { %6533 = vrsqrt.f32 %v4666_v42  ;;  %v4667_v60 = vadd.f32 1e-05, %v4659_v15  ;;  %v4660_v52 = vmul.f32 0.03125, %v4650_v10 }
0x2c62   :  { %v4653_v24 = vpop.xlane.xlu1 %4652 }
0x2c63   :  { %6535 = vrsqrt.f32 %v4667_v60  ;;  %v4668_v35 = vadd.f32 1e-05, %v4660_v52  ;;  %v4661_v50 = vmul.f32 0.03125, %v4653_v24 }
0x2c65   :  { %6537 = vrsqrt.f32 %v4668_v35  ;;  %v4669_v39 = vadd.f32 1e-05, %v4661_v50 }
0x2c67   :  { %6539 = vrsqrt.f32 %v4669_v39 }
0x2c6b   :  { %v6534_v43 = vpop.eup %6533 }
0x2c6c   :  { %v4682_v9 = vmul.f32 %v6534_v43, %v8227_v11 }
0x2c6d   :  { %v6536_v31 = vpop.eup %6535 }
0x2c6e   :  { %v4683_v23 = vmul.f32 %v6536_v31, %v8229_v45  ;;  %v4694_v8 = vmul.f32 %v5379_v53, %v4682_v9  ;;  %v6185_v45 = vld [vmem:[%s8397_s6 + $0x30] sm:$0xff]  }
0x2c6f   :  { %v6538_v12 = vpop.eup %6537  ;;  %5970 = vmatprep.subr.bf16.mxu1 %v6185_v45 }
0x2c70   :  { %v4684_v19 = vmul.f32 %v6538_v12, %v8233_v4  ;;  %v4695_v27 = vmul.f32 %v5379_v53, %v4683_v23  ;;  %v4706_v11 = vadd.f32 %v5380_v32, %v4694_v8  ;;  %5971 = vmatpush3.bf16.msra.mxu1 %v6185_v45 }
0x2c71   :  { %v6540_v0 = vpop.eup %6539  ;;  %5972 = vmatprep.subr.bf16.mxu1 %v6186_v63 }
0x2c72   :  { %v4685_v44 = vmul.f32 %v6540_v0, %v8238_v18  ;;  %v4707_v38 = vadd.f32 %v5380_v32, %v4695_v27  ;;  %v4696_v59 = vmul.f32 %v5379_v53, %v4684_v19 }
0x2c74   :  { %v4712_v28 = vpack.c.bf16 %v4707_v38, %v4706_v11  ;;  %v4697_v1 = vmul.f32 %v5379_v53, %v4685_v44  ;;  %v4708_v4 = vadd.f32 %v5380_v32, %v4696_v59  ;;  %5973 = vmatpush3.bf16.msra.mxu1 %v6186_v63 }
0x2c76   :  { %5962 = vmatprep.mubr.msk.bf16.mxu0 %vm191_vm1, %v4712_v28  ;;  %v4709_v37 = vadd.f32 %v5380_v32, %v4697_v1 }
0x2c78   :  { %v4713_v18 = vpack.c.bf16 %v4709_v37, %v4708_v4 }
0x2c7a   :  { %5963 = vmatmul.mubr.msk.bf16.gmra.mrb[92].mxu0 %vm191_vm1, %v4713_v18 }
0x2cc0   :  { %v5960_v55 = vpop.f32.mrb[88].mxu0 }
0x2cc1   :  { %v8283_v13 = vadd.f32 %v5960_v55, %v8280_v51  ;;  %v4781_v41 = vpop.f32.mrb[89].mxu0 }
0x2cc2   :  { %v8286_v20 = vadd.f32 %v8280_v51, %v4781_v41  ;;  %v5961_v57 = vpop.f32.mrb[90].mxu0 }
0x2cc3   :  { %v8289_v49 = vmul.f32 0.70710677, %v8283_v13  ;;  %v8292_v7 = vadd.f32 %v5961_v57, %v8280_v51  ;;  %v4784_v56 = vpop.f32.mrb[91].mxu0 }
0x2cc4   :  { %v8295_v53 = vmul.f32 0.70710677, %v8286_v20  ;;  %v8298_v33 = vadd.f32 %v8280_v51, %v4784_v56 }
0x2cc5   :  { %v4830_v61 = vand.u32 2147483647, %v8289_v49  ;;  %v8302_v17 = vmul.f32 0.70710677, %v8292_v7  ;;  %vm4982_vm14 = vcmp.ge.f32.partialorder %v8289_v49, 0.0 }
0x2cc6   :  { %v4828_v6 = vand.u32 2147483647, %v8295_v53  ;;  %v8306_v2 = vmul.f32 0.70710677, %v8298_v33  ;;  %vm4980_vm15 = vcmp.ge.f32.partialorder %v8295_v53, 0.0 }
0x2cc7   :  { %v4838_v32 = vmul.f32 0.3275911, %v4830_v61  ;;  %v4831_v5 = vand.u32 2147483647, %v8302_v17  ;;  %v4934_v54 = vsub.f32 0.0, %v4830_v61  ;;  %vm4983_vm2 = vcmp.ge.f32.partialorder %v8302_v17, 0.0 }
0x2cc8   :  { %v4836_v14 = vmul.f32 0.3275911, %v4828_v6  ;;  %v4829_v29 = vand.u32 2147483647, %v8306_v2  ;;  %v4932_v30 = vsub.f32 0.0, %v4828_v6  ;;  %vm4981_vm3 = vcmp.ge.f32.partialorder %v8306_v2, 0.0 }
0x2cc9   :  { %v4846_v26 = vadd.f32 1.0, %v4838_v32  ;;  %v4839_v25 = vmul.f32 0.3275911, %v4831_v5  ;;  %v4942_v22 = vmul.f32 %v4934_v54, %v4830_v61  ;;  %v4935_v34 = vsub.f32 0.0, %v4831_v5 }
0x2cca   :  { %v4844_v47 = vadd.f32 1.0, %v4836_v14  ;;  %v4837_v16 = vmul.f32 0.3275911, %v4829_v29  ;;  %v4940_v15 = vmul.f32 %v4932_v30, %v4828_v6  ;;  %v4933_v60 = vsub.f32 0.0, %v4829_v29 }
0x2ccb   :  { %6541 = vrcp.f32 %v4846_v26  ;;  %v4847_v21 = vadd.f32 1.0, %v4839_v25  ;;  %v4952_v35 = vmul.f32 1.442695, %v4942_v22  ;;  %v4943_v39 = vmul.f32 %v4935_v34, %v4831_v5 }
0x2ccc   :  { %6543 = vrcp.f32 %v4844_v47  ;;  %v4845_v46 = vadd.f32 1.0, %v4837_v16  ;;  %v4948_v43 = vmul.f32 1.442695, %v4940_v15  ;;  %v4941_v8 = vmul.f32 %v4933_v60, %v4829_v29 }
0x2ccd   :  { %6545 = vrcp.f32 %v4847_v21  ;;  %v4954_v0 = vmul.f32 1.442695, %v4943_v39 }
0x2cce   :  { %6547 = vrcp.f32 %v4845_v46  ;;  %v4950_v45 = vmul.f32 1.442695, %v4941_v8 }
0x2ccf   :  { %6549 = vpow2.f32 %v4952_v35 }
0x2cd0   :  { %6551 = vpow2.f32 %v4948_v43 }
0x2cd1   :  { %6553 = vpow2.f32 %v4954_v0  ;;  %v4813_v0 = vmul.f32 0.5, %v8298_v33 }
0x2cd2   :  { %6555 = vpow2.f32 %v4950_v45 }
0x2cd5   :  { %v6542_v3 = vpop.eup %6541 }
0x2cd6   :  { %v6544_v58 = vpop.eup %6543  ;;  %v4862_v42 = vmul.f32 1.0614054, %v6542_v3 }
0x2cd7   :  { %v4860_v10 = vmul.f32 1.0614054, %v6544_v58  ;;  %v6546_v24 = vpop.eup %6545 }
0x2cd8   :  { %v4870_v52 = vadd.f32 -1.4531521, %v4862_v42  ;;  %v4863_v9 = vmul.f32 1.0614054, %v6546_v24  ;;  %v6548_v31 = vpop.eup %6547 }
0x2cd9   :  { %v4868_v50 = vadd.f32 -1.4531521, %v4860_v10  ;;  %v4861_v19 = vmul.f32 1.0614054, %v6548_v31  ;;  %v6550_v29 = vpop.eup %6549 }
0x2cda   :  { %v4878_v62 = vmul.f32 %v6542_v3, %v4870_v52  ;;  %v4871_v12 = vadd.f32 -1.4531521, %v4863_v9  ;;  %v6552_v25 = vpop.eup %6551 }
0x2cdb   :  { %v4876_v23 = vmul.f32 %v6544_v58, %v4868_v50  ;;  %v4869_v38 = vadd.f32 -1.4531521, %v4861_v19  ;;  %v6554_v34 = vpop.eup %6553 }
0x2cdc   :  { %v4886_v48 = vadd.f32 1.4214138, %v4878_v62  ;;  %v4879_v11 = vmul.f32 %v6546_v24, %v4871_v12  ;;  %v6556_v52 = vpop.eup %6555  ;;  %v4812_v12 = vmul.f32 0.5, %v8286_v20 }
0x2cdd   :  { %v4884_v27 = vadd.f32 1.4214138, %v4876_v23  ;;  %v4877_v4 = vmul.f32 %v6548_v31, %v4869_v38 }
0x2cde   :  { %v4894_v44 = vmul.f32 %v6542_v3, %v4886_v48  ;;  %v4887_v1 = vadd.f32 1.4214138, %v4879_v11  ;;  %v4815_v48 = vmul.f32 0.5, %v8292_v7 }
0x2cdf   :  { %v4892_v59 = vmul.f32 %v6544_v58, %v4884_v27  ;;  %v4885_v55 = vadd.f32 1.4214138, %v4877_v4 }
0x2ce0   :  { %v4902_v28 = vadd.f32 -0.28449672, %v4894_v44  ;;  %v4895_v18 = vmul.f32 %v6546_v24, %v4887_v1 }
0x2ce1   :  { %v4900_v37 = vadd.f32 -0.28449672, %v4892_v59  ;;  %v4893_v61 = vmul.f32 %v6548_v31, %v4885_v55 }
0x2ce2   :  { %v4910_v63 = vmul.f32 %v6542_v3, %v4902_v28  ;;  %v4903_v56 = vadd.f32 -0.28449672, %v4895_v18 }
0x2ce3   :  { %v4908_v41 = vmul.f32 %v6544_v58, %v4900_v37  ;;  %v4901_v14 = vadd.f32 -0.28449672, %v4893_v61 }
0x2ce4   :  { %v4918_v57 = vadd.f32 0.2548296, %v4910_v63  ;;  %v4911_v5 = vmul.f32 %v6546_v24, %v4903_v56 }
0x2ce5   :  { %v4916_v6 = vadd.f32 0.2548296, %v4908_v41  ;;  %v4909_v21 = vmul.f32 %v6548_v31, %v4901_v14 }
0x2ce6   :  { %v4926_v32 = vmul.f32 %v6542_v3, %v4918_v57  ;;  %v4919_v16 = vadd.f32 0.2548296, %v4911_v5 }
0x2ce7   :  { %v4924_v26 = vmul.f32 %v6544_v58, %v4916_v6  ;;  %v4917_v22 = vadd.f32 0.2548296, %v4909_v21 }
0x2ce8   :  { %v4966_v47 = vmul.f32 %v6550_v29, %v4926_v32  ;;  %v4927_v30 = vmul.f32 %v6546_v24, %v4919_v16  ;;  %v4814_v24 = vmul.f32 0.5, %v8283_v13 }
0x2ce9   :  { %v4964_v46 = vmul.f32 %v6552_v25, %v4924_v26  ;;  %v4925_v60 = vmul.f32 %v6548_v31, %v4917_v22 }
0x2cea   :  { %v4974_v54 = vsub.f32 1.0, %v4966_v47  ;;  %v4967_v10 = vmul.f32 %v6554_v34, %v4927_v30 }
0x2ceb   :  { %v4972_v42 = vsub.f32 1.0, %v4964_v46  ;;  %v4965_v58 = vmul.f32 %v6556_v52, %v4925_v60 }
0x2cec   :  { %v4990_v15 = vsub.f32 0.0, %v4974_v54  ;;  %v4975_v50 = vsub.f32 1.0, %v4967_v10 }
0x2ced   :  { %v4988_v3 = vsub.f32 0.0, %v4972_v42  ;;  %v4973_v43 = vsub.f32 1.0, %v4965_v58 }
0x2cee   :  { %v4998_v35 = vsel %vm4982_vm14, %v4974_v54, %v4990_v15  ;;  %v4991_v62 = vsub.f32 0.0, %v4975_v50 }
0x2cef   :  { %v4996_v39 = vsel %vm4980_vm15, %v4972_v42, %v4988_v3  ;;  %v5006_v9 = vadd.f32 1.0, %v4998_v35  ;;  %v4989_v8 = vsub.f32 0.0, %v4973_v43 }
0x2cf0   :  { %v4999_v23 = vsel %vm4983_vm2, %v4975_v50, %v4991_v62  ;;  %v5004_v31 = vadd.f32 1.0, %v4996_v39 }
0x2cf1   :  { %v5007_v49 = vadd.f32 1.0, %v4999_v23  ;;  %v4997_v19 = vsel %vm4981_vm3, %v4973_v43, %v4989_v8  ;;  %v5014_v53 = vmul.f32 %v5006_v9, %v4814_v24 }
0x2cf2   :  { %v5005_v44 = vadd.f32 1.0, %v4997_v19  ;;  %v5012_v11 = vmul.f32 %v5004_v31, %v4812_v12 }
0x2cf3   :  { %v5015_v27 = vmul.f32 %v5007_v49, %v4815_v48 }
0x2cf4   :  { %v5013_v38 = vmul.f32 %v5005_v44, %v4813_v0 }
0x2cf5   :  { %v5021_v17 = vpack.c.bf16 %v5015_v27, %v5014_v53 }
0x2cf6   :  { %v5020_v13 = vpack.c.bf16 %v5013_v38, %v5012_v11 }
0x2cf8   :  { %5974 = vmatprep.mubr.msk.bf16.mxu1 %vm102_vm0, %v5020_v13 }
0x2cf9   :  { %5975 = vmatmul.mubr.msk.bf16.vlgmr.msra.gmra.mrb[96].mxu1 %vm102_vm0, %v5021_v17 }
0x2d4d   :  { %v5964_v7 = vpop.f32.mrb[92].mxu0 }
0x2d4e   :  { %v8321_v59 = vadd.f32 %v5964_v7, %v8280_v51  ;;  %v4797_v2 = vpop.f32.mrb[93].mxu0 }
0x2d4f   :  { %v8324_v20 = vadd.f32 %v8280_v51, %v4797_v2  ;;  %v5965_v45 = vpop.f32.mrb[94].mxu0 }
0x2d50   :  { %v8327_v33 = vmul.f32 0.70710677, %v8321_v59  ;;  %v8330_v28 = vadd.f32 %v5965_v45, %v8280_v51  ;;  %v4800_v1 = vpop.f32.mrb[95].mxu0 }
0x2d51   :  { %v8333_v4 = vmul.f32 0.70710677, %v8324_v20  ;;  %v8336_v37 = vadd.f32 %v8280_v51, %v4800_v1 }
0x2d52   :  { %v4834_v63 = vand.u32 2147483647, %v8327_v33  ;;  %v8340_v18 = vmul.f32 0.70710677, %v8330_v28  ;;  %vm4986_vm4 = vcmp.ge.f32.partialorder %v8327_v33, 0.0 }
0x2d53   :  { %v4832_v55 = vand.u32 2147483647, %v8333_v4  ;;  %v8344_v41 = vmul.f32 0.70710677, %v8336_v37  ;;  %vm4984_vm5 = vcmp.ge.f32.partialorder %v8333_v4, 0.0 }
0x2d54   :  { %v4842_v57 = vmul.f32 0.3275911, %v4834_v63  ;;  %v4835_v56 = vand.u32 2147483647, %v8340_v18  ;;  %v4938_v25 = vsub.f32 0.0, %v4834_v63  ;;  %vm4987_vm6 = vcmp.ge.f32.partialorder %v8340_v18, 0.0 }
0x2d55   :  { %v4840_v61 = vmul.f32 0.3275911, %v4832_v55  ;;  %v4833_v6 = vand.u32 2147483647, %v8344_v41  ;;  %v4936_v47 = vsub.f32 0.0, %v4832_v55  ;;  %vm4985_vm7 = vcmp.ge.f32.partialorder %v8344_v41, 0.0 }
0x2d56   :  { %v4850_v32 = vadd.f32 1.0, %v4842_v57  ;;  %v4843_v5 = vmul.f32 0.3275911, %v4835_v56  ;;  %v4946_v21 = vmul.f32 %v4938_v25, %v4834_v63  ;;  %v4939_v46 = vsub.f32 0.0, %v4835_v56 }
0x2d57   :  { %v4848_v51 = vadd.f32 1.0, %v4840_v61  ;;  %v4841_v14 = vmul.f32 0.3275911, %v4833_v6  ;;  %v4944_v22 = vmul.f32 %v4936_v47, %v4832_v55  ;;  %v4937_v42 = vsub.f32 0.0, %v4833_v6 }
0x2d58   :  { %6557 = vrcp.f32 %v4850_v32  ;;  %v4851_v29 = vadd.f32 1.0, %v4843_v5  ;;  %v4960_v60 = vmul.f32 1.442695, %v4946_v21  ;;  %v4947_v3 = vmul.f32 %v4939_v46, %v4835_v56 }
0x2d59   :  { %6559 = vrcp.f32 %v4848_v51  ;;  %v4849_v26 = vadd.f32 1.0, %v4841_v14  ;;  %v4956_v50 = vmul.f32 1.442695, %v4944_v22  ;;  %v4945_v43 = vmul.f32 %v4937_v42, %v4833_v6 }
0x2d5a   :  { %6561 = vrcp.f32 %v4851_v29  ;;  %v4962_v31 = vmul.f32 1.442695, %v4947_v3 }
0x2d5b   :  { %6563 = vrcp.f32 %v4849_v26  ;;  %v4958_v53 = vmul.f32 1.442695, %v4945_v43  ;;  %v4819_v43 = vmul.f32 0.5, %v8330_v28 }
0x2d5c   :  { %6565 = vpow2.f32 %v4960_v60 }
0x2d5d   :  { %6567 = vpow2.f32 %v4956_v50 }
0x2d5e   :  { %6569 = vpow2.f32 %v4962_v31 }
0x2d5f   :  { %6571 = vpow2.f32 %v4958_v53 }
0x2d62   :  { %v6558_v16 = vpop.eup %6557 }
0x2d63   :  { %v6560_v54 = vpop.eup %6559  ;;  %v4866_v30 = vmul.f32 1.0614054, %v6558_v16 }
0x2d64   :  { %v4864_v34 = vmul.f32 1.0614054, %v6560_v54  ;;  %v6562_v10 = vpop.eup %6561 }
0x2d65   :  { %v4874_v15 = vadd.f32 -1.4531521, %v4866_v30  ;;  %v4867_v58 = vmul.f32 1.0614054, %v6562_v10  ;;  %v6564_v39 = vpop.eup %6563 }
0x2d66   :  { %v4872_v52 = vadd.f32 -1.4531521, %v4864_v34  ;;  %v4865_v23 = vmul.f32 1.0614054, %v6564_v39  ;;  %v6566_v61 = vpop.eup %6565 }
0x2d67   :  { %v4882_v35 = vmul.f32 %v6558_v16, %v4874_v15  ;;  %v4875_v24 = vadd.f32 -1.4531521, %v4867_v58  ;;  %v6568_v32 = vpop.eup %6567 }
0x2d68   :  { %v4880_v62 = vmul.f32 %v6560_v54, %v4872_v52  ;;  %v4873_v12 = vadd.f32 -1.4531521, %v4865_v23  ;;  %v6570_v21 = vpop.eup %6569 }
0x2d69   :  { %v4890_v9 = vadd.f32 1.4214138, %v4882_v35  ;;  %v4883_v49 = vmul.f32 %v6562_v10, %v4875_v24  ;;  %v6572_v42 = vpop.eup %6571 }
0x2d6a   :  { %v4888_v8 = vadd.f32 1.4214138, %v4880_v62  ;;  %v4881_v44 = vmul.f32 %v6564_v39, %v4873_v12 }
0x2d6b   :  { %v4898_v48 = vmul.f32 %v6558_v16, %v4890_v9  ;;  %v4891_v0 = vadd.f32 1.4214138, %v4883_v49  ;;  %v4816_v9 = vmul.f32 0.5, %v8324_v20  ;;  %v5400_v20 = vld [vmem:[%s8398_s7 + $0xd] ss:$0 sm:$0xff] }
0x2d6c   :  { %v4896_v19 = vmul.f32 %v6560_v54, %v4888_v8  ;;  %v4889_v13 = vadd.f32 1.4214138, %v4881_v44  ;;  %v4817_v8 = vmul.f32 0.5, %v8336_v37 }
0x2d6d   :  { %v4906_v27 = vadd.f32 -0.28449672, %v4898_v48  ;;  %v4899_v38 = vmul.f32 %v6562_v10, %v4891_v0 }
0x2d6e   :  { %v4904_v11 = vadd.f32 -0.28449672, %v4896_v19  ;;  %v4897_v1 = vmul.f32 %v6564_v39, %v4889_v13 }
0x2d6f   :  { %v4914_v17 = vmul.f32 %v6558_v16, %v4906_v27  ;;  %v4907_v45 = vadd.f32 -0.28449672, %v4899_v38 }
0x2d70   :  { %v4912_v7 = vmul.f32 %v6560_v54, %v4904_v11  ;;  %v4905_v56 = vadd.f32 -0.28449672, %v4897_v1 }
0x2d71   :  { %v4922_v2 = vadd.f32 0.2548296, %v4914_v17  ;;  %v4915_v57 = vmul.f32 %v6562_v10, %v4907_v45 }
0x2d72   :  { %v4920_v63 = vadd.f32 0.2548296, %v4912_v7  ;;  %v4913_v14 = vmul.f32 %v6564_v39, %v4905_v56  ;;  %v6187_v56 = vld [vmem:[%s8399_s8] sm:$0xff]  }
0x2d73   :  { %v4930_v55 = vmul.f32 %v6558_v16, %v4922_v2  ;;  %v4923_v51 = vadd.f32 0.2548296, %v4915_v57 }
0x2d74   :  { %v4928_v6 = vmul.f32 %v6560_v54, %v4920_v63  ;;  %v4921_v47 = vadd.f32 0.2548296, %v4913_v14 }
0x2d75   :  { %v4970_v5 = vmul.f32 %v6566_v61, %v4930_v55  ;;  %v4931_v25 = vmul.f32 %v6562_v10, %v4923_v51  ;;  %v4818_v10 = vmul.f32 0.5, %v8321_v59  ;;  %v6613_v61 = vmov 0.0   ;;  %v5409_v51 = vld [vmem:[%s8398_s7 + $0x10] ss:$0 sm:$0xff] }
0x2d76   :  { %v4968_v29 = vmul.f32 %v6568_v32, %v4928_v6  ;;  %v4929_v34 = vmul.f32 %v6564_v39, %v4921_v47  ;;  %5982 = vmatprep.subr.bf16.mxu0 %v6613_v61  ;;  %5986 = vmatprep.mubr.msk.bf16.mxu0 %vm6614_vm9, %v6613_v61 }
0x2d77   :  { %v4978_v26 = vsub.f32 1.0, %v4970_v5  ;;  %v4971_v22 = vmul.f32 %v6570_v21, %v4931_v25  ;;  %5983 = vmatpush3.bf16.msra.mxu0 %v6187_v56  ;;  %v5411_v21 = vld [vmem:[%s8398_s7 + $0x12] ss:$0 sm:$0xff] }
0x2d78   :  { %v4976_v46 = vsub.f32 1.0, %v4968_v29  ;;  %v4969_v54 = vmul.f32 %v6572_v42, %v4929_v34  ;;  %5984 = vmatprep.subr.bf16.mxu0 %v6613_v61  ;;  %v5410_v29 = vld [vmem:[%s8398_s7 + $0x11] ss:$0 sm:$0xff] }
0x2d79   :  { %v4994_v30 = vsub.f32 0.0, %v4978_v26  ;;  %v4979_v60 = vsub.f32 1.0, %v4971_v22 }
0x2d7a   :  { %v4992_v16 = vsub.f32 0.0, %v4976_v46  ;;  %v4977_v35 = vsub.f32 1.0, %v4969_v54 }
0x2d7b   :  { %v5002_v15 = vsel %vm4986_vm4, %v4978_v26, %v4994_v30  ;;  %v4995_v3 = vsub.f32 0.0, %v4979_v60 }
0x2d7c   :  { %v5000_v52 = vsel %vm4984_vm5, %v4976_v46, %v4992_v16  ;;  %v5010_v50 = vadd.f32 1.0, %v5002_v15  ;;  %v4993_v62 = vsub.f32 0.0, %v4977_v35 }
0x2d7d   :  { %v5003_v58 = vsel %vm4987_vm6, %v4979_v60, %v4995_v3  ;;  %v5008_v39 = vadd.f32 1.0, %v5000_v52 }
0x2d7e   :  { %v5011_v33 = vadd.f32 1.0, %v5003_v58  ;;  %v5001_v24 = vsel %vm4985_vm7, %v4977_v35, %v4993_v62  ;;  %v5018_v4 = vmul.f32 %v5010_v50, %v4818_v10 }
0x2d7f   :  { %v5009_v31 = vadd.f32 1.0, %v5001_v24  ;;  %v5016_v48 = vmul.f32 %v5008_v39, %v4816_v9 }
0x2d80   :  { %v5019_v23 = vmul.f32 %v5011_v33, %v4819_v43 }
0x2d81   :  { %v5017_v49 = vmul.f32 %v5009_v31, %v4817_v8 }
0x2d82   :  { %v5023_v18 = vpack.c.bf16 %v5019_v23, %v5018_v4 }
0x2d83   :  { %v5022_v59 = vpack.c.bf16 %v5017_v49, %v5016_v48 }
0x2d85   :  { %5978 = vmatprep.mubr.msk.bf16.mxu1 %vm102_vm0, %v5022_v59 }
0x2d86   :  { %5979 = vmatmul.mubr.msk.bf16.gmra.mrb[100].mxu1 %vm102_vm0, %v5023_v18  ;;  %vm5142_vm0 = vcmask 254976  }
0x2dcc   :  { %v5976_v28 = vpop.f32.mrb[96].mxu1 }
0x2dcd   :  { %v5107_v12 = vpop.f32.mrb[97].mxu1 }
0x2dce   :  { %v5977_v19 = vpop.f32.mrb[98].mxu1  ;;  %v5108_v37 = vadd.f32 %v5400_v20, %v5107_v12 }
0x2dcf   :  { %v5110_v41 = vpop.f32.mrb[99].mxu1 }
0x2dd0   :  { %v5132_v38 = vadd.f32 %v5108_v37, %v8142_v36  ;;  %v6188_v36 = vld [vmem:[%s8399_s8 + $0x8] sm:$0xff]  }
0x2dd1   :  { %5985 = vmatpush3.bf16.msra.mxu0 %v6188_v36 }
0x2e59   :  { %v5980_v53 = vpop.f32.mrb[100].mxu1 }
0x2e5a   :  { %v5120_v27 = vpop.f32.mrb[101].mxu1 }
0x2e5b   :  { %v5121_v0 = vadd.f32 %v5400_v20, %v5120_v27  ;;  %v5981_v44 = vpop.f32.mrb[102].mxu1 }
0x2e5c   :  { %v5123_v11 = vpop.f32.mrb[103].mxu1 }
0x2e5d   :  { %v5133_v17 = vadd.f32 %v5121_v0, %v8184_v40 }
0x2e5f   :  { %v5138_v13 = vrot.slane %v5133_v17, 7 }
0x2e61   :  { %v5141_v7 = vsel %vm5140_vm8, %v5132_v38, %v5138_v13 }
0x2e62   :  { %v5143_v2 = vsel %vm5142_vm0, %v5141_v7, 0.0 }
0x2e63   :  { %5144 = vadd.xlane.f32.xlu0 %v5143_v2 }
0x2ef0   :  { %v5145_v45 = vpop.xlane.xlu0 %5144 }
0x2ef1   :  { %v5146_v1 = vmul.f32 0.03125, %v5145_v45 }
0x2ef3   :  { %v5147_v63 = vsub.f32 %v5141_v7, %v5146_v1 }
0x2ef5   :  { %v5148_v55 = vmul.f32 %v5147_v63, %v5147_v63 }
0x2ef7   :  { %v5149_v57 = vsel %vm5142_vm0, %v5148_v55, 0.0 }
0x2ef8   :  { %5150 = vadd.xlane.f32.xlu1 %v5149_v57 }
0x2f85   :  { %v5151_v40 = vpop.xlane.xlu1 %5150 }
0x2f86   :  { %v5152_v6 = vmul.f32 0.03125, %v5151_v40 }
0x2f88   :  { %v5153_v32 = vadd.f32 1e-05, %v5152_v6 }
0x2f8a   :  { %6573 = vrsqrt.f32 %v5153_v32 }
0x2f94   :  { %v6574_v5 = vpop.eup %6573 }
0x2f95   :  { %v5155_v14 = vmul.f32 %v6574_v5, %v5147_v63 }
0x2f97   :  { %v5160_v26 = vmul.f32 %v5409_v51, %v5155_v14 }
0x2f99   :  { %v5165_v25 = vadd.f32 %v5410_v29, %v5160_v26 }
0x2f9b   :  { %v5166_v47 = vpack.c.bf16 %v5165_v25, %v5165_v25 }
0x2f9d   :  { %5987 = vmatmul.mubr.msk.bf16.vlgmr.msra.gmra.mrb[96].mxu0 %vm191_vm1, %v5166_v47 }
0x3070   :  { %v5224_v46 = vpop.f32.mrb[96].mxu0 }
0x3071   :  { %v5225_v30 = vadd.f32 %v5411_v21, %v5224_v46  ;;  %v5988_v22 = vpop.f32.mrb[97].mxu0 }
0x3072   :  { %v5227_v34 = vpop.f32.mrb[98].mxu0 }
0x3073   :  { %5230 = vst [vmem:[#allocation2] sm:$0x3] %v5225_v30  ;;  %v5989_v42 = vpop.f32.mrb[99].mxu0 }
0x3074   :  { %6586 = shalt.err (!%p6583_p4)
}
0x3075   :  { %s6587_s7 = scalar_lea.hbm %s8400_s9, 32 }
0x3076   :  { %p6588_p5 = scmp.ne.s32.totalorder %s8400_s9, %s6587_s7  ;;  %p6591_p6 = scmp.lt.u32.totalorder %s6587_s7, %s8400_s9 }
0x3078   :  { %p6593_p7 = pnand %p6591_p6, %p6588_p5 }
0x307a   :  { %6596 = shalt.err (!%p6593_p7)
}
0x307b   :  { %5240 = dma.vmem_to_hbm [thread:$0]  %s5238_s11, 32, %s8400_s9, [#allocation3]  }
0x307c   :  { %6597 = dma.done.wait [#allocation3], 32  }
0x307d   :  { %6598 = vsyncadd [#allocation3], 4294967264 }
0x307e   :  { %5244 = vsyncpa [#allocation3], 1 }

</bundles_post_ra>
